<compile_context>
chip_gen: v6e
topology: v6e:2x2x1
jax: 0.10.0
libtpu: 0.0.40
codegen_flags: <defaults>
</compile_context>

<pallas_src>
import functools

import jax
import jax.numpy as jnp
from jax.experimental import pallas as pl
from jax.experimental.pallas import tpu as pltpu

KSIZE = 7
PAD = 3


def _round_up(n, m):
    return ((n + m - 1) // m) * m


def _largest_divisor_leq(n, cap):
    cap = int(max(1, min(n, cap)))
    for d in range(cap, 0, -1):
        if n % d == 0:
            return d
    return 1


def _reduce_kernel(x_ref, avg_ref, max_ref, *, inv_c):
    # x_ref   : VMEM (Bn, Ct, H*W)  -- lane-dense channel tile
    # avg_ref : VMEM (Bn, 1, H*W)   -- resident across the C grid axis (sum -> mean)
    # max_ref : VMEM (Bn, 1, H*W)   -- resident running max
    c = pl.program_id(1)
    x = x_ref[...].astype(jnp.float32)
    psum = jnp.sum(x, axis=1, keepdims=True)      # (Bn, 1, H*W)
    pmax = jnp.max(x, axis=1, keepdims=True)

    @pl.when(c == 0)
    def _():
        avg_ref[...] = psum
        max_ref[...] = pmax

    @pl.when(c > 0)
    def _():
        avg_ref[...] += psum
        max_ref[...] = jnp.maximum(max_ref[...], pmax)

    @pl.when(c == pl.num_programs(1) - 1)
    def _():
        avg_ref[...] *= inv_c                     # finalize sum -> mean


def _conv_kernel(band_ref, avg_ref, max_ref, o_ref, pad_ref, *, H, W, Bn):
    # band_ref : VMEM (2, 7, Kd, W) f32 -- banded conv matrices (lane-aligned Kd)
    # avg_ref  : VMEM (Bn, H, W) f32
    # max_ref  : VMEM (Bn, H, W) f32
    # o_ref    : VMEM (Bn, H, W)
    # pad_ref  : VMEM (Bn, 2, H+6, Kd) f32 scratch (zero border + zero tail cols)

    # Zero the padded scratch only on the first grid step; the interior is
    # fully overwritten every step and the zero border/tail persists across
    # steps (this kernel's grid axis is sequential / "arbitrary").
    @pl.when(pl.program_id(0) == 0)
    def _():
        pad_ref[...] = jnp.zeros(pad_ref.shape, jnp.float32)

    pad_ref[:, 0, PAD:PAD + H, PAD:PAD + W] = avg_ref[...]
    pad_ref[:, 1, PAD:PAD + H, PAD:PAD + W] = max_ref[...]

    # 7x7, 2->1 channel conv as 14 banded MXU matmuls per image, with one f32
    # accumulator per input channel (breaks the serial dependence chain).
    for b in range(Bn):
        acc0 = jnp.zeros((H, W), jnp.float32)
        acc1 = jnp.zeros((H, W), jnp.float32)
        for ky in range(KSIZE):
            acc0 = acc0 + jnp.dot(pad_ref[b, 0, ky:ky + H, :], band_ref[0, ky],
                                  preferred_element_type=jnp.float32)
            acc1 = acc1 + jnp.dot(pad_ref[b, 1, ky:ky + H, :], band_ref[1, ky],
                                  preferred_element_type=jnp.float32)
        # NOTE: this store is W lanes wide (masked vst).  The output is the
        # smallest array in the whole op (C x smaller than the input read), so
        # an in-kernel (H,W)->(H*W,) relayout to lane-densify it would cost
        # more cross-lane work than it saves.
        o_ref[b] = jax.nn.sigmoid(acc0 + acc1).astype(o_ref.dtype)


@jax.jit
def spatial_attention(x, weight):
    """x: (N, C, H, W); weight: (1, 2, 7, 7) conv weight (no bias)."""
    N, C, H, W = x.shape
    HW = H * W
    Hp = H + 2 * PAD
    Kd = _round_up(W + 2 * PAD, 128)     # lane-aligned contraction dim for MXU

    # ---------------- block-size heuristics ----------------
    itemsize = x.dtype.itemsize
    blk_budget = 2 * 1024 * 1024         # x-block bytes (before double-buffering)
    # batch tile: amortize per-step overhead but keep >= 2 parallel grid steps
    bn_cap = max(1, N // 2) if N >= 2 else 1
    bn_cap = min(bn_cap, max(1, blk_budget // max(1, C * HW * itemsize)))
    bn = _largest_divisor_leq(N, bn_cap)
    # channel tile: full C if it fits, else a multiple-of-8 divisor of C
    ct_cap = max(1, blk_budget // max(1, bn * HW * itemsize))
    ct = C
    if C > ct_cap:
        for d in range(min(C, ct_cap), 0, -1):
            if C % d == 0 and d % 8 == 0:
                ct = d
                break

    # ---------------- kernel A: lane-dense channel mean / max ----------------
    xf = x.reshape(N, C, HW)             # free reshape on contiguous NCHW
    avg_flat, max_flat = pl.pallas_call(
        functools.partial(_reduce_kernel, inv_c=1.0 / C),
        out_shape=(jax.ShapeDtypeStruct((N, 1, HW), jnp.float32),
                   jax.ShapeDtypeStruct((N, 1, HW), jnp.float32)),
        grid_spec=pltpu.PrefetchScalarGridSpec(
            num_scalar_prefetch=0,
            grid=(N // bn, C // ct),
            in_specs=[pl.BlockSpec((bn, ct, HW), lambda n, c: (n, c, 0))],
            out_specs=[pl.BlockSpec((bn, 1, HW), lambda n, c: (n, 0, 0)),
                       pl.BlockSpec((bn, 1, HW), lambda n, c: (n, 0, 0))]),
        compiler_params=pltpu.CompilerParams(
            dimension_semantics=("parallel", "arbitrary"),
            vmem_limit_bytes=32 * 1024 * 1024),
    )(xf)
    avg_hw = avg_flat.reshape(N, H, W)   # free HBM reshapes
    max_hw = max_flat.reshape(N, H, W)

    # ----- banded matrices: the 7x7 conv becomes (H, Kd) @ (Kd, W) matmuls -----
    # band[c, ky, x + kx, x] = w[c, ky, kx]; rows >= W+6 stay zero (match the
    # zero tail columns of the padded scratch).
    w = weight.astype(jnp.float32).reshape(2, KSIZE, KSIZE)
    eyes = jnp.stack([jnp.eye(Kd, W, k=-kx, dtype=jnp.float32)
                      for kx in range(KSIZE)])             # (7, Kd, W)
    band = jnp.einsum("cyk,kpq->cypq", w, eyes)            # (2, 7, Kd, W)

    # ---------------- kernel B: pad + banded MXU conv + sigmoid ----------------
    bn2_cap = max(1, (1 << 20) // max(1, (3 * HW + 2 * Hp * Kd) * 4))
    bn2 = _largest_divisor_leq(N, bn2_cap)
    out_hw = pl.pallas_call(
        functools.partial(_conv_kernel, H=H, W=W, Bn=bn2),
        out_shape=jax.ShapeDtypeStruct((N, H, W), x.dtype),
        grid_spec=pltpu.PrefetchScalarGridSpec(
            num_scalar_prefetch=0,
            grid=(N // bn2,),
            in_specs=[pl.BlockSpec((2, KSIZE, Kd, W), lambda n: (0, 0, 0, 0)),
                      pl.BlockSpec((bn2, H, W), lambda n: (n, 0, 0)),
                      pl.BlockSpec((bn2, H, W), lambda n: (n, 0, 0))],
            out_specs=pl.BlockSpec((bn2, H, W), lambda n: (n, 0, 0)),
            scratch_shapes=[pltpu.VMEM((bn2, 2, Hp, Kd), jnp.float32)]),
        compiler_params=pltpu.CompilerParams(
            # Sequential so the program_id==0 scratch zero-init is valid even
            # on 2-TensorCore chips; kernel A carries the parallel batch axis.
            dimension_semantics=("arbitrary",),
            vmem_limit_bytes=32 * 1024 * 1024),
    )(band, avg_hw, max_hw)

    return out_hw.reshape(N, 1, H, W)


if __name__ == "__main__":
    key = jax.random.PRNGKey(0)
    kx, kw = jax.random.split(key)

    N, C, H, W = 2, 4, 16, 16
    x = jax.random.normal(kx, (N, C, H, W), dtype=jnp.float32)

    # Deterministic conv1 weight init (kaiming-uniform-like, fan_in = 2*7*7).
    fan_in = 2 * KSIZE * KSIZE
    bound = 1.0 / (fan_in ** 0.5)
    weight = jax.random.uniform(kw, (1, 2, KSIZE, KSIZE), jnp.float32,
                                minval=-bound, maxval=bound)

    out = jax.block_until_ready(spatial_attention(x, weight))

    # Pure-JAX reference for sanity.
    avg = jnp.mean(x, axis=1, keepdims=True)
    mx = jnp.max(x, axis=1, keepdims=True)
    cat = jnp.concatenate([avg, mx], axis=1)
    ref = jax.lax.conv_general_dilated(
        cat, weight, window_strides=(1, 1),
        padding=((PAD, PAD), (PAD, PAD)),
        dimension_numbers=("NCHW", "OIHW", "NCHW"))
    ref = jax.nn.sigmoid(ref)

    assert out.shape == (N, 1, H, W), out.shape
    err = float(jnp.max(jnp.abs(out - ref)))
    assert err < 1e-4, err
    print("KERNEL_OK")
</pallas_src>

<mosaic_0001>
module attributes {stable_mosaic.version = 11 : i64} {
  func.func @_reduce_kernel(%arg0: i32, %arg1: i32, %arg2: memref<1x4x256xf32, #tpu.memory_space<vmem>>, %arg3: memref<1x1x256xf32, #tpu.memory_space<vmem>>, %arg4: memref<1x1x256xf32, #tpu.memory_space<vmem>>) attributes {dimension_semantics = [#tpu.dimension_semantics<parallel>, #tpu.dimension_semantics<arbitrary>], iteration_bounds = array<i64: 2, 1>, scalar_prefetch = 0 : i64, scratch_operands = 0 : i64, tpu.core_type = #tpu.core_type<tc>, window_params = [{transform_indices = @transform_0, window_bounds = array<i64: 1, 4, 256>}, {transform_indices = @transform_1, window_bounds = array<i64: 1, 1, 256>}, {transform_indices = @transform_2, window_bounds = array<i64: 1, 1, 256>}]} {
    %c0 = arith.constant 0 : index
    %c0_0 = arith.constant 0 : index
    %c0_1 = arith.constant 0 : index
    %0 = vector.load %arg2[%c0, %c0_0, %c0_1] : memref<1x4x256xf32, #tpu.memory_space<vmem>>, vector<1x4x256xf32>
    %cst = arith.constant dense<0.000000e+00> : vector<1x256xf32>
    %1 = vector.multi_reduction <add>, %0, %cst [1] : vector<1x4x256xf32> to vector<1x256xf32>
    %2 = vector.shape_cast %1 : vector<1x256xf32> to vector<1x1x256xf32>
    %cst_2 = arith.constant dense<0xFF800000> : vector<1x256xf32>
    %3 = vector.multi_reduction <maximumf>, %0, %cst_2 [1] : vector<1x4x256xf32> to vector<1x256xf32>
    %4 = vector.shape_cast %3 : vector<1x256xf32> to vector<1x1x256xf32>
    %c0_i32 = arith.constant 0 : i32
    %5 = arith.cmpi eq, %arg1, %c0_i32 : i32
    %6 = arith.extui %5 : i1 to i32
    %c0_i32_3 = arith.constant 0 : i32
    %7 = arith.cmpi ne, %6, %c0_i32_3 : i32
    scf.if %7 {
      %c0_8 = arith.constant 0 : index
      %c0_9 = arith.constant 0 : index
      %c0_10 = arith.constant 0 : index
      %14 = vector.load %arg3[%c0_8, %c0_9, %c0_10] : memref<1x1x256xf32, #tpu.memory_space<vmem>>, vector<1x1x256xf32>
      tpu.vector_store %arg3[%c0_8, %c0_9, %c0_10], %2 {strides = array<i32>} : memref<1x1x256xf32, #tpu.memory_space<vmem>>, vector<1x1x256xf32>,
      %c0_11 = arith.constant 0 : index
      %c0_12 = arith.constant 0 : index
      %c0_13 = arith.constant 0 : index
      %15 = vector.load %arg4[%c0_11, %c0_12, %c0_13] : memref<1x1x256xf32, #tpu.memory_space<vmem>>, vector<1x1x256xf32>
      tpu.vector_store %arg4[%c0_11, %c0_12, %c0_13], %4 {strides = array<i32>} : memref<1x1x256xf32, #tpu.memory_space<vmem>>, vector<1x1x256xf32>,
    } else {
    }
    %c0_i32_4 = arith.constant 0 : i32
    %8 = arith.cmpi sgt, %arg1, %c0_i32_4 : i32
    %9 = arith.extui %8 : i1 to i32
    %c0_i32_5 = arith.constant 0 : i32
    %10 = arith.cmpi ne, %9, %c0_i32_5 : i32
    scf.if %10 {
      %c0_8 = arith.constant 0 : index
      %c0_9 = arith.constant 0 : index
      %c0_10 = arith.constant 0 : index
      %14 = vector.load %arg3[%c0_8, %c0_9, %c0_10] : memref<1x1x256xf32, #tpu.memory_space<vmem>>, vector<1x1x256xf32>
      %15 = arith.addf %14, %2 : vector<1x1x256xf32>
      %c0_11 = arith.constant 0 : index
      %c0_12 = arith.constant 0 : index
      %c0_13 = arith.constant 0 : index
      %16 = vector.load %arg3[%c0_11, %c0_12, %c0_13] : memref<1x1x256xf32, #tpu.memory_space<vmem>>, vector<1x1x256xf32>
      tpu.vector_store %arg3[%c0_11, %c0_12, %c0_13], %15 {strides = array<i32>} : memref<1x1x256xf32, #tpu.memory_space<vmem>>, vector<1x1x256xf32>,
      %c0_14 = arith.constant 0 : index
      %c0_15 = arith.constant 0 : index
      %c0_16 = arith.constant 0 : index
      %17 = vector.load %arg4[%c0_14, %c0_15, %c0_16] : memref<1x1x256xf32, #tpu.memory_space<vmem>>, vector<1x1x256xf32>
      %18 = arith.maximumf %17, %4 : vector<1x1x256xf32>
      %c0_17 = arith.constant 0 : index
      %c0_18 = arith.constant 0 : index
      %c0_19 = arith.constant 0 : index
      %19 = vector.load %arg4[%c0_17, %c0_18, %c0_19] : memref<1x1x256xf32, #tpu.memory_space<vmem>>, vector<1x1x256xf32>
      tpu.vector_store %arg4[%c0_17, %c0_18, %c0_19], %18 {strides = array<i32>} : memref<1x1x256xf32, #tpu.memory_space<vmem>>, vector<1x1x256xf32>,
    } else {
    }
    %c0_i32_6 = arith.constant 0 : i32
    %11 = arith.cmpi eq, %arg1, %c0_i32_6 : i32
    %12 = arith.extui %11 : i1 to i32
    %c0_i32_7 = arith.constant 0 : i32
    %13 = arith.cmpi ne, %12, %c0_i32_7 : i32
    scf.if %13 {
      %c0_8 = arith.constant 0 : index
      %c0_9 = arith.constant 0 : index
      %c0_10 = arith.constant 0 : index
      %14 = vector.load %arg3[%c0_8, %c0_9, %c0_10] : memref<1x1x256xf32, #tpu.memory_space<vmem>>, vector<1x1x256xf32>
      %cst_11 = arith.constant 2.500000e-01 : f32
      %15 = vector.broadcast %cst_11 : f32 to vector<1x1x256xf32>
      %16 = arith.mulf %14, %15 : vector<1x1x256xf32>
      %c0_12 = arith.constant 0 : index
      %c0_13 = arith.constant 0 : index
      %c0_14 = arith.constant 0 : index
      %17 = vector.load %arg3[%c0_12, %c0_13, %c0_14] : memref<1x1x256xf32, #tpu.memory_space<vmem>>, vector<1x1x256xf32>
      tpu.vector_store %arg3[%c0_12, %c0_13, %c0_14], %16 {strides = array<i32>} : memref<1x1x256xf32, #tpu.memory_space<vmem>>, vector<1x1x256xf32>,
    } else {
    }
    return
  }
  func.func @transform_0(%arg0: i32, %arg1: i32) -> (i32, i32, i32) {
    %c0_i32 = arith.constant 0 : i32
    %c0_i32_0 = arith.constant 0 : i32
    return %arg0, %arg1, %c0_i32 : i32, i32, i32
  }
  func.func @transform_1(%arg0: i32, %arg1: i32) -> (i32, i32, i32) {
    %c0_i32 = arith.constant 0 : i32
    %c0_i32_0 = arith.constant 0 : i32
    %c0_i32_1 = arith.constant 0 : i32
    return %arg0, %c0_i32, %c0_i32_0 : i32, i32, i32
  }
  func.func @transform_2(%arg0: i32, %arg1: i32) -> (i32, i32, i32) {
    %c0_i32 = arith.constant 0 : i32
    %c0_i32_0 = arith.constant 0 : i32
    %c0_i32_1 = arith.constant 0 : i32
    return %arg0, %c0_i32, %c0_i32_0 : i32, i32, i32
  }
}

module attributes {stable_mosaic.version = 11 : i64} {
  func.func @_conv_kernel(%arg0: i32, %arg1: memref<2x7x128x16xf32, #tpu.memory_space<vmem>>, %arg2: memref<2x16x16xf32, #tpu.memory_space<vmem>>, %arg3: memref<2x16x16xf32, #tpu.memory_space<vmem>>, %arg4: memref<2x16x16xf32, #tpu.memory_space<vmem>>, %arg5: memref<2x2x22x128xf32, #tpu.memory_space<vmem>>) attributes {dimension_semantics = [#tpu.dimension_semantics<arbitrary>], iteration_bounds = array<i64: 1>, scalar_prefetch = 0 : i64, scratch_operands = 1 : i64, tpu.core_type = #tpu.core_type<tc>, window_params = [{pipeline_mode = #tpu.pipeline_mode<synchronous>, transform_indices = @transform_0, window_bounds = array<i64: 2, 7, 128, 16>}, {transform_indices = @transform_1, window_bounds = array<i64: 2, 16, 16>}, {transform_indices = @transform_2, window_bounds = array<i64: 2, 16, 16>}, {transform_indices = @transform_3, window_bounds = array<i64: 2, 16, 16>}]} {
    %c0_i32 = arith.constant 0 : i32
    %0 = arith.cmpi eq, %arg0, %c0_i32 : i32
    %1 = arith.extui %0 : i1 to i32
    %c0_i32_0 = arith.constant 0 : i32
    %2 = arith.cmpi ne, %1, %c0_i32_0 : i32
    scf.if %2 {
      %cst_271 = arith.constant 0.000000e+00 : f32
      %201 = vector.broadcast %cst_271 : f32 to vector<2x2x22x128xf32>
      %c0_272 = arith.constant 0 : index
      %c0_273 = arith.constant 0 : index
      %c0_274 = arith.constant 0 : index
      %c0_275 = arith.constant 0 : index
      %202 = vector.load %arg5[%c0_272, %c0_273, %c0_274, %c0_275] : memref<2x2x22x128xf32, #tpu.memory_space<vmem>>, vector<2x2x22x128xf32>
      tpu.vector_store %arg5[%c0_272, %c0_273, %c0_274, %c0_275], %201 {strides = array<i32>} : memref<2x2x22x128xf32, #tpu.memory_space<vmem>>, vector<2x2x22x128xf32>,
    } else {
    }
    %c0 = arith.constant 0 : index
    %c0_1 = arith.constant 0 : index
    %c0_2 = arith.constant 0 : index
    %3 = vector.load %arg2[%c0, %c0_1, %c0_2] : memref<2x16x16xf32, #tpu.memory_space<vmem>>, vector<2x16x16xf32>
    %c0_3 = arith.constant 0 : index
    %c0_4 = arith.constant 0 : index
    %c3 = arith.constant 3 : index
    %c3_5 = arith.constant 3 : index
    %4 = vector.load %arg5[%c0_3, %c0_4, %c3, %c3_5] : memref<2x2x22x128xf32, #tpu.memory_space<vmem>>, vector<2x1x16x16xf32>
    %5 = vector.shape_cast %4 : vector<2x1x16x16xf32> to vector<2x16x16xf32>
    %6 = vector.shape_cast %3 : vector<2x16x16xf32> to vector<2x1x16x16xf32>
    tpu.vector_store %arg5[%c0_3, %c0_4, %c3, %c3_5], %6 {strides = array<i32>} : memref<2x2x22x128xf32, #tpu.memory_space<vmem>>, vector<2x1x16x16xf32>,
    %c0_6 = arith.constant 0 : index
    %c0_7 = arith.constant 0 : index
    %c0_8 = arith.constant 0 : index
    %7 = vector.load %arg3[%c0_6, %c0_7, %c0_8] : memref<2x16x16xf32, #tpu.memory_space<vmem>>, vector<2x16x16xf32>
    %c0_9 = arith.constant 0 : index
    %c1 = arith.constant 1 : index
    %c3_10 = arith.constant 3 : index
    %c3_11 = arith.constant 3 : index
    %8 = vector.load %arg5[%c0_9, %c1, %c3_10, %c3_11] : memref<2x2x22x128xf32, #tpu.memory_space<vmem>>, vector<2x1x16x16xf32>
    %9 = vector.shape_cast %8 : vector<2x1x16x16xf32> to vector<2x16x16xf32>
    %10 = vector.shape_cast %7 : vector<2x16x16xf32> to vector<2x1x16x16xf32>
    tpu.vector_store %arg5[%c0_9, %c1, %c3_10, %c3_11], %10 {strides = array<i32>} : memref<2x2x22x128xf32, #tpu.memory_space<vmem>>, vector<2x1x16x16xf32>,
    %cst = arith.constant 0.000000e+00 : f32
    %11 = vector.broadcast %cst : f32 to vector<16x16xf32>
    %cst_12 = arith.constant 0.000000e+00 : f32
    %12 = vector.broadcast %cst_12 : f32 to vector<16x16xf32>
    %c0_13 = arith.constant 0 : index
    %c0_14 = arith.constant 0 : index
    %c0_15 = arith.constant 0 : index
    %c0_16 = arith.constant 0 : index
    %13 = vector.load %arg5[%c0_13, %c0_14, %c0_15, %c0_16] : memref<2x2x22x128xf32, #tpu.memory_space<vmem>>, vector<1x1x16x128xf32>
    %14 = vector.shape_cast %13 : vector<1x1x16x128xf32> to vector<16x128xf32>
    %c0_17 = arith.constant 0 : index
    %c0_18 = arith.constant 0 : index
    %c0_19 = arith.constant 0 : index
    %c0_20 = arith.constant 0 : index
    %15 = vector.load %arg1[%c0_17, %c0_18, %c0_19, %c0_20] : memref<2x7x128x16xf32, #tpu.memory_space<vmem>>, vector<1x1x128x16xf32>
    %16 = vector.shape_cast %15 : vector<1x1x128x16xf32> to vector<128x16xf32>
    %cst_21 = arith.constant dense<0.000000e+00> : vector<16x16xf32>
    %17 = tpu.matmul %14, %16, %cst_21 {dimension_numbers = #tpu.dot_dimension_numbers<[1], [0], [0], [1], [0, 0, 1, 1], [], []>} : vector<16x128xf32>, vector<128x16xf32>, vector<16x16xf32> -> vector<16x16xf32>
    %18 = arith.addf %11, %17 : vector<16x16xf32>
    %c0_22 = arith.constant 0 : index
    %c1_23 = arith.constant 1 : index
    %c0_24 = arith.constant 0 : index
    %c0_25 = arith.constant 0 : index
    %19 = vector.load %arg5[%c0_22, %c1_23, %c0_24, %c0_25] : memref<2x2x22x128xf32, #tpu.memory_space<vmem>>, vector<1x1x16x128xf32>
    %20 = vector.shape_cast %19 : vector<1x1x16x128xf32> to vector<16x128xf32>
    %c1_26 = arith.constant 1 : index
    %c0_27 = arith.constant 0 : index
    %c0_28 = arith.constant 0 : index
    %c0_29 = arith.constant 0 : index
    %21 = vector.load %arg1[%c1_26, %c0_27, %c0_28, %c0_29] : memref<2x7x128x16xf32, #tpu.memory_space<vmem>>, vector<1x1x128x16xf32>
    %22 = vector.shape_cast %21 : vector<1x1x128x16xf32> to vector<128x16xf32>
    %cst_30 = arith.constant dense<0.000000e+00> : vector<16x16xf32>
    %23 = tpu.matmul %20, %22, %cst_30 {dimension_numbers = #tpu.dot_dimension_numbers<[1], [0], [0], [1], [0, 0, 1, 1], [], []>} : vector<16x128xf32>, vector<128x16xf32>, vector<16x16xf32> -> vector<16x16xf32>
    %24 = arith.addf %12, %23 : vector<16x16xf32>
    %c0_31 = arith.constant 0 : index
    %c0_32 = arith.constant 0 : index
    %c1_33 = arith.constant 1 : index
    %c0_34 = arith.constant 0 : index
    %25 = vector.load %arg5[%c0_31, %c0_32, %c1_33, %c0_34] : memref<2x2x22x128xf32, #tpu.memory_space<vmem>>, vector<1x1x16x128xf32>
    %26 = vector.shape_cast %25 : vector<1x1x16x128xf32> to vector<16x128xf32>
    %c0_35 = arith.constant 0 : index
    %c1_36 = arith.constant 1 : index
    %c0_37 = arith.constant 0 : index
    %c0_38 = arith.constant 0 : index
    %27 = vector.load %arg1[%c0_35, %c1_36, %c0_37, %c0_38] : memref<2x7x128x16xf32, #tpu.memory_space<vmem>>, vector<1x1x128x16xf32>
    %28 = vector.shape_cast %27 : vector<1x1x128x16xf32> to vector<128x16xf32>
    %cst_39 = arith.constant dense<0.000000e+00> : vector<16x16xf32>
    %29 = tpu.matmul %26, %28, %cst_39 {dimension_numbers = #tpu.dot_dimension_numbers<[1], [0], [0], [1], [0, 0, 1, 1], [], []>} : vector<16x128xf32>, vector<128x16xf32>, vector<16x16xf32> -> vector<16x16xf32>
    %30 = arith.addf %18, %29 : vector<16x16xf32>
    %c0_40 = arith.constant 0 : index
    %c1_41 = arith.constant 1 : index
    %c1_42 = arith.constant 1 : index
    %c0_43 = arith.constant 0 : index
    %31 = vector.load %arg5[%c0_40, %c1_41, %c1_42, %c0_43] : memref<2x2x22x128xf32, #tpu.memory_space<vmem>>, vector<1x1x16x128xf32>
    %32 = vector.shape_cast %31 : vector<1x1x16x128xf32> to vector<16x128xf32>
    %c1_44 = arith.constant 1 : index
    %c1_45 = arith.constant 1 : index
    %c0_46 = arith.constant 0 : index
    %c0_47 = arith.constant 0 : index
    %33 = vector.load %arg1[%c1_44, %c1_45, %c0_46, %c0_47] : memref<2x7x128x16xf32, #tpu.memory_space<vmem>>, vector<1x1x128x16xf32>
    %34 = vector.shape_cast %33 : vector<1x1x128x16xf32> to vector<128x16xf32>
    %cst_48 = arith.constant dense<0.000000e+00> : vector<16x16xf32>
    %35 = tpu.matmul %32, %34, %cst_48 {dimension_numbers = #tpu.dot_dimension_numbers<[1], [0], [0], [1], [0, 0, 1, 1], [], []>} : vector<16x128xf32>, vector<128x16xf32>, vector<16x16xf32> -> vector<16x16xf32>
    %36 = arith.addf %24, %35 : vector<16x16xf32>
    %c0_49 = arith.constant 0 : index
    %c0_50 = arith.constant 0 : index
    %c2 = arith.constant 2 : index
    %c0_51 = arith.constant 0 : index
    %37 = vector.load %arg5[%c0_49, %c0_50, %c2, %c0_51] : memref<2x2x22x128xf32, #tpu.memory_space<vmem>>, vector<1x1x16x128xf32>
    %38 = vector.shape_cast %37 : vector<1x1x16x128xf32> to vector<16x128xf32>
    %c0_52 = arith.constant 0 : index
    %c2_53 = arith.constant 2 : index
    %c0_54 = arith.constant 0 : index
    %c0_55 = arith.constant 0 : index
    %39 = vector.load %arg1[%c0_52, %c2_53, %c0_54, %c0_55] : memref<2x7x128x16xf32, #tpu.memory_space<vmem>>, vector<1x1x128x16xf32>
    %40 = vector.shape_cast %39 : vector<1x1x128x16xf32> to vector<128x16xf32>
    %cst_56 = arith.constant dense<0.000000e+00> : vector<16x16xf32>
    %41 = tpu.matmul %38, %40, %cst_56 {dimension_numbers = #tpu.dot_dimension_numbers<[1], [0], [0], [1], [0, 0, 1, 1], [], []>} : vector<16x128xf32>, vector<128x16xf32>, vector<16x16xf32> -> vector<16x16xf32>
    %42 = arith.addf %30, %41 : vector<16x16xf32>
    %c0_57 = arith.constant 0 : index
    %c1_58 = arith.constant 1 : index
    %c2_59 = arith.constant 2 : index
    %c0_60 = arith.constant 0 : index
    %43 = vector.load %arg5[%c0_57, %c1_58, %c2_59, %c0_60] : memref<2x2x22x128xf32, #tpu.memory_space<vmem>>, vector<1x1x16x128xf32>
    %44 = vector.shape_cast %43 : vector<1x1x16x128xf32> to vector<16x128xf32>
    %c1_61 = arith.constant 1 : index
    %c2_62 = arith.constant 2 : index
    %c0_63 = arith.constant 0 : index
    %c0_64 = arith.constant 0 : index
    %45 = vector.load %arg1[%c1_61, %c2_62, %c0_63, %c0_64] : memref<2x7x128x16xf32, #tpu.memory_space<vmem>>, vector<1x1x128x16xf32>
    %46 = vector.shape_cast %45 : vector<1x1x128x16xf32> to vector<128x16xf32>
    %cst_65 = arith.constant dense<0.000000e+00> : vector<16x16xf32>
    %47 = tpu.matmul %44, %46, %cst_65 {dimension_numbers = #tpu.dot_dimension_numbers<[1], [0], [0], [1], [0, 0, 1, 1], [], []>} : vector<16x128xf32>, vector<128x16xf32>, vector<16x16xf32> -> vector<16x16xf32>
    %48 = arith.addf %36, %47 : vector<16x16xf32>
    %c0_66 = arith.constant 0 : index
    %c0_67 = arith.constant 0 : index
    %c3_68 = arith.constant 3 : index
    %c0_69 = arith.constant 0 : index
    %49 = vector.load %arg5[%c0_66, %c0_67, %c3_68, %c0_69] : memref<2x2x22x128xf32, #tpu.memory_space<vmem>>, vector<1x1x16x128xf32>
    %50 = vector.shape_cast %49 : vector<1x1x16x128xf32> to vector<16x128xf32>
    %c0_70 = arith.constant 0 : index
    %c3_71 = arith.constant 3 : index
    %c0_72 = arith.constant 0 : index
    %c0_73 = arith.constant 0 : index
    %51 = vector.load %arg1[%c0_70, %c3_71, %c0_72, %c0_73] : memref<2x7x128x16xf32, #tpu.memory_space<vmem>>, vector<1x1x128x16xf32>
    %52 = vector.shape_cast %51 : vector<1x1x128x16xf32> to vector<128x16xf32>
    %cst_74 = arith.constant dense<0.000000e+00> : vector<16x16xf32>
    %53 = tpu.matmul %50, %52, %cst_74 {dimension_numbers = #tpu.dot_dimension_numbers<[1], [0], [0], [1], [0, 0, 1, 1], [], []>} : vector<16x128xf32>, vector<128x16xf32>, vector<16x16xf32> -> vector<16x16xf32>
    %54 = arith.addf %42, %53 : vector<16x16xf32>
    %c0_75 = arith.constant 0 : index
    %c1_76 = arith.constant 1 : index
    %c3_77 = arith.constant 3 : index
    %c0_78 = arith.constant 0 : index
    %55 = vector.load %arg5[%c0_75, %c1_76, %c3_77, %c0_78] : memref<2x2x22x128xf32, #tpu.memory_space<vmem>>, vector<1x1x16x128xf32>
    %56 = vector.shape_cast %55 : vector<1x1x16x128xf32> to vector<16x128xf32>
    %c1_79 = arith.constant 1 : index
    %c3_80 = arith.constant 3 : index
    %c0_81 = arith.constant 0 : index
    %c0_82 = arith.constant 0 : index
    %57 = vector.load %arg1[%c1_79, %c3_80, %c0_81, %c0_82] : memref<2x7x128x16xf32, #tpu.memory_space<vmem>>, vector<1x1x128x16xf32>
    %58 = vector.shape_cast %57 : vector<1x1x128x16xf32> to vector<128x16xf32>
    %cst_83 = arith.constant dense<0.000000e+00> : vector<16x16xf32>
    %59 = tpu.matmul %56, %58, %cst_83 {dimension_numbers = #tpu.dot_dimension_numbers<[1], [0], [0], [1], [0, 0, 1, 1], [], []>} : vector<16x128xf32>, vector<128x16xf32>, vector<16x16xf32> -> vector<16x16xf32>
    %60 = arith.addf %48, %59 : vector<16x16xf32>
    %c0_84 = arith.constant 0 : index
    %c0_85 = arith.constant 0 : index
    %c4 = arith.constant 4 : index
    %c0_86 = arith.constant 0 : index
    %61 = vector.load %arg5[%c0_84, %c0_85, %c4, %c0_86] : memref<2x2x22x128xf32, #tpu.memory_space<vmem>>, vector<1x1x16x128xf32>
    %62 = vector.shape_cast %61 : vector<1x1x16x128xf32> to vector<16x128xf32>
    %c0_87 = arith.constant 0 : index
    %c4_88 = arith.constant 4 : index
    %c0_89 = arith.constant 0 : index
    %c0_90 = arith.constant 0 : index
    %63 = vector.load %arg1[%c0_87, %c4_88, %c0_89, %c0_90] : memref<2x7x128x16xf32, #tpu.memory_space<vmem>>, vector<1x1x128x16xf32>
    %64 = vector.shape_cast %63 : vector<1x1x128x16xf32> to vector<128x16xf32>
    %cst_91 = arith.constant dense<0.000000e+00> : vector<16x16xf32>
    %65 = tpu.matmul %62, %64, %cst_91 {dimension_numbers = #tpu.dot_dimension_numbers<[1], [0], [0], [1], [0, 0, 1, 1], [], []>} : vector<16x128xf32>, vector<128x16xf32>, vector<16x16xf32> -> vector<16x16xf32>
    %66 = arith.addf %54, %65 : vector<16x16xf32>
    %c0_92 = arith.constant 0 : index
    %c1_93 = arith.constant 1 : index
    %c4_94 = arith.constant 4 : index
    %c0_95 = arith.constant 0 : index
    %67 = vector.load %arg5[%c0_92, %c1_93, %c4_94, %c0_95] : memref<2x2x22x128xf32, #tpu.memory_space<vmem>>, vector<1x1x16x128xf32>
    %68 = vector.shape_cast %67 : vector<1x1x16x128xf32> to vector<16x128xf32>
    %c1_96 = arith.constant 1 : index
    %c4_97 = arith.constant 4 : index
    %c0_98 = arith.constant 0 : index
    %c0_99 = arith.constant 0 : index
    %69 = vector.load %arg1[%c1_96, %c4_97, %c0_98, %c0_99] : memref<2x7x128x16xf32, #tpu.memory_space<vmem>>, vector<1x1x128x16xf32>
    %70 = vector.shape_cast %69 : vector<1x1x128x16xf32> to vector<128x16xf32>
    %cst_100 = arith.constant dense<0.000000e+00> : vector<16x16xf32>
    %71 = tpu.matmul %68, %70, %cst_100 {dimension_numbers = #tpu.dot_dimension_numbers<[1], [0], [0], [1], [0, 0, 1, 1], [], []>} : vector<16x128xf32>, vector<128x16xf32>, vector<16x16xf32> -> vector<16x16xf32>
    %72 = arith.addf %60, %71 : vector<16x16xf32>
    %c0_101 = arith.constant 0 : index
    %c0_102 = arith.constant 0 : index
    %c5 = arith.constant 5 : index
    %c0_103 = arith.constant 0 : index
    %73 = vector.load %arg5[%c0_101, %c0_102, %c5, %c0_103] : memref<2x2x22x128xf32, #tpu.memory_space<vmem>>, vector<1x1x16x128xf32>
    %74 = vector.shape_cast %73 : vector<1x1x16x128xf32> to vector<16x128xf32>
    %c0_104 = arith.constant 0 : index
    %c5_105 = arith.constant 5 : index
    %c0_106 = arith.constant 0 : index
    %c0_107 = arith.constant 0 : index
    %75 = vector.load %arg1[%c0_104, %c5_105, %c0_106, %c0_107] : memref<2x7x128x16xf32, #tpu.memory_space<vmem>>, vector<1x1x128x16xf32>
    %76 = vector.shape_cast %75 : vector<1x1x128x16xf32> to vector<128x16xf32>
    %cst_108 = arith.constant dense<0.000000e+00> : vector<16x16xf32>
    %77 = tpu.matmul %74, %76, %cst_108 {dimension_numbers = #tpu.dot_dimension_numbers<[1], [0], [0], [1], [0, 0, 1, 1], [], []>} : vector<16x128xf32>, vector<128x16xf32>, vector<16x16xf32> -> vector<16x16xf32>
    %78 = arith.addf %66, %77 : vector<16x16xf32>
    %c0_109 = arith.constant 0 : index
    %c1_110 = arith.constant 1 : index
    %c5_111 = arith.constant 5 : index
    %c0_112 = arith.constant 0 : index
    %79 = vector.load %arg5[%c0_109, %c1_110, %c5_111, %c0_112] : memref<2x2x22x128xf32, #tpu.memory_space<vmem>>, vector<1x1x16x128xf32>
    %80 = vector.shape_cast %79 : vector<1x1x16x128xf32> to vector<16x128xf32>
    %c1_113 = arith.constant 1 : index
    %c5_114 = arith.constant 5 : index
    %c0_115 = arith.constant 0 : index
    %c0_116 = arith.constant 0 : index
    %81 = vector.load %arg1[%c1_113, %c5_114, %c0_115, %c0_116] : memref<2x7x128x16xf32, #tpu.memory_space<vmem>>, vector<1x1x128x16xf32>
    %82 = vector.shape_cast %81 : vector<1x1x128x16xf32> to vector<128x16xf32>
    %cst_117 = arith.constant dense<0.000000e+00> : vector<16x16xf32>
    %83 = tpu.matmul %80, %82, %cst_117 {dimension_numbers = #tpu.dot_dimension_numbers<[1], [0], [0], [1], [0, 0, 1, 1], [], []>} : vector<16x128xf32>, vector<128x16xf32>, vector<16x16xf32> -> vector<16x16xf32>
    %84 = arith.addf %72, %83 : vector<16x16xf32>
    %c0_118 = arith.constant 0 : index
    %c0_119 = arith.constant 0 : index
    %c6 = arith.constant 6 : index
    %c0_120 = arith.constant 0 : index
    %85 = vector.load %arg5[%c0_118, %c0_119, %c6, %c0_120] : memref<2x2x22x128xf32, #tpu.memory_space<vmem>>, vector<1x1x16x128xf32>
    %86 = vector.shape_cast %85 : vector<1x1x16x128xf32> to vector<16x128xf32>
    %c0_121 = arith.constant 0 : index
    %c6_122 = arith.constant 6 : index
    %c0_123 = arith.constant 0 : index
    %c0_124 = arith.constant 0 : index
    %87 = vector.load %arg1[%c0_121, %c6_122, %c0_123, %c0_124] : memref<2x7x128x16xf32, #tpu.memory_space<vmem>>, vector<1x1x128x16xf32>
    %88 = vector.shape_cast %87 : vector<1x1x128x16xf32> to vector<128x16xf32>
    %cst_125 = arith.constant dense<0.000000e+00> : vector<16x16xf32>
    %89 = tpu.matmul %86, %88, %cst_125 {dimension_numbers = #tpu.dot_dimension_numbers<[1], [0], [0], [1], [0, 0, 1, 1], [], []>} : vector<16x128xf32>, vector<128x16xf32>, vector<16x16xf32> -> vector<16x16xf32>
    %90 = arith.addf %78, %89 : vector<16x16xf32>
    %c0_126 = arith.constant 0 : index
    %c1_127 = arith.constant 1 : index
    %c6_128 = arith.constant 6 : index
    %c0_129 = arith.constant 0 : index
    %91 = vector.load %arg5[%c0_126, %c1_127, %c6_128, %c0_129] : memref<2x2x22x128xf32, #tpu.memory_space<vmem>>, vector<1x1x16x128xf32>
    %92 = vector.shape_cast %91 : vector<1x1x16x128xf32> to vector<16x128xf32>
    %c1_130 = arith.constant 1 : index
    %c6_131 = arith.constant 6 : index
    %c0_132 = arith.constant 0 : index
    %c0_133 = arith.constant 0 : index
    %93 = vector.load %arg1[%c1_130, %c6_131, %c0_132, %c0_133] : memref<2x7x128x16xf32, #tpu.memory_space<vmem>>, vector<1x1x128x16xf32>
    %94 = vector.shape_cast %93 : vector<1x1x128x16xf32> to vector<128x16xf32>
    %cst_134 = arith.constant dense<0.000000e+00> : vector<16x16xf32>
    %95 = tpu.matmul %92, %94, %cst_134 {dimension_numbers = #tpu.dot_dimension_numbers<[1], [0], [0], [1], [0, 0, 1, 1], [], []>} : vector<16x128xf32>, vector<128x16xf32>, vector<16x16xf32> -> vector<16x16xf32>
    %96 = arith.addf %84, %95 : vector<16x16xf32>
    %97 = arith.addf %90, %96 : vector<16x16xf32>
    %98 = arith.negf %97 : vector<16x16xf32>
    %99 = math.exp %98 : vector<16x16xf32>
    %cst_135 = arith.constant 1.000000e+00 : f32
    %100 = vector.broadcast %cst_135 : f32 to vector<16x16xf32>
    %101 = arith.addf %100, %99 : vector<16x16xf32>
    %102 = arith.divf %100, %101 : vector<16x16xf32>
    %c0_136 = arith.constant 0 : index
    %c0_137 = arith.constant 0 : index
    %c0_138 = arith.constant 0 : index
    %103 = vector.load %arg4[%c0_136, %c0_137, %c0_138] : memref<2x16x16xf32, #tpu.memory_space<vmem>>, vector<1x16x16xf32>
    %104 = vector.shape_cast %103 : vector<1x16x16xf32> to vector<16x16xf32>
    %105 = vector.shape_cast %102 : vector<16x16xf32> to vector<1x16x16xf32>
    tpu.vector_store %arg4[%c0_136, %c0_137, %c0_138], %105 {strides = array<i32>} : memref<2x16x16xf32, #tpu.memory_space<vmem>>, vector<1x16x16xf32>,
    %cst_139 = arith.constant 0.000000e+00 : f32
    %106 = vector.broadcast %cst_139 : f32 to vector<16x16xf32>
    %cst_140 = arith.constant 0.000000e+00 : f32
    %107 = vector.broadcast %cst_140 : f32 to vector<16x16xf32>
    %c1_141 = arith.constant 1 : index
    %c0_142 = arith.constant 0 : index
    %c0_143 = arith.constant 0 : index
    %c0_144 = arith.constant 0 : index
    %108 = vector.load %arg5[%c1_141, %c0_142, %c0_143, %c0_144] : memref<2x2x22x128xf32, #tpu.memory_space<vmem>>, vector<1x1x16x128xf32>
    %109 = vector.shape_cast %108 : vector<1x1x16x128xf32> to vector<16x128xf32>
    %c0_145 = arith.constant 0 : index
    %c0_146 = arith.constant 0 : index
    %c0_147 = arith.constant 0 : index
    %c0_148 = arith.constant 0 : index
    %110 = vector.load %arg1[%c0_145, %c0_146, %c0_147, %c0_148] : memref<2x7x128x16xf32, #tpu.memory_space<vmem>>, vector<1x1x128x16xf32>
    %111 = vector.shape_cast %110 : vector<1x1x128x16xf32> to vector<128x16xf32>
    %cst_149 = arith.constant dense<0.000000e+00> : vector<16x16xf32>
    %112 = tpu.matmul %109, %111, %cst_149 {dimension_numbers = #tpu.dot_dimension_numbers<[1], [0], [0], [1], [0, 0, 1, 1], [], []>} : vector<16x128xf32>, vector<128x16xf32>, vector<16x16xf32> -> vector<16x16xf32>
    %113 = arith.addf %106, %112 : vector<16x16xf32>
    %c1_150 = arith.constant 1 : index
    %c1_151 = arith.constant 1 : index
    %c0_152 = arith.constant 0 : index
    %c0_153 = arith.constant 0 : index
    %114 = vector.load %arg5[%c1_150, %c1_151, %c0_152, %c0_153] : memref<2x2x22x128xf32, #tpu.memory_space<vmem>>, vector<1x1x16x128xf32>
    %115 = vector.shape_cast %114 : vector<1x1x16x128xf32> to vector<16x128xf32>
    %c1_154 = arith.constant 1 : index
    %c0_155 = arith.constant 0 : index
    %c0_156 = arith.constant 0 : index
    %c0_157 = arith.constant 0 : index
    %116 = vector.load %arg1[%c1_154, %c0_155, %c0_156, %c0_157] : memref<2x7x128x16xf32, #tpu.memory_space<vmem>>, vector<1x1x128x16xf32>
    %117 = vector.shape_cast %116 : vector<1x1x128x16xf32> to vector<128x16xf32>
    %cst_158 = arith.constant dense<0.000000e+00> : vector<16x16xf32>
    %118 = tpu.matmul %115, %117, %cst_158 {dimension_numbers = #tpu.dot_dimension_numbers<[1], [0], [0], [1], [0, 0, 1, 1], [], []>} : vector<16x128xf32>, vector<128x16xf32>, vector<16x16xf32> -> vector<16x16xf32>
    %119 = arith.addf %107, %118 : vector<16x16xf32>
    %c1_159 = arith.constant 1 : index
    %c0_160 = arith.constant 0 : index
    %c1_161 = arith.constant 1 : index
    %c0_162 = arith.constant 0 : index
    %120 = vector.load %arg5[%c1_159, %c0_160, %c1_161, %c0_162] : memref<2x2x22x128xf32, #tpu.memory_space<vmem>>, vector<1x1x16x128xf32>
    %121 = vector.shape_cast %120 : vector<1x1x16x128xf32> to vector<16x128xf32>
    %c0_163 = arith.constant 0 : index
    %c1_164 = arith.constant 1 : index
    %c0_165 = arith.constant 0 : index
    %c0_166 = arith.constant 0 : index
    %122 = vector.load %arg1[%c0_163, %c1_164, %c0_165, %c0_166] : memref<2x7x128x16xf32, #tpu.memory_space<vmem>>, vector<1x1x128x16xf32>
    %123 = vector.shape_cast %122 : vector<1x1x128x16xf32> to vector<128x16xf32>
    %cst_167 = arith.constant dense<0.000000e+00> : vector<16x16xf32>
    %124 = tpu.matmul %121, %123, %cst_167 {dimension_numbers = #tpu.dot_dimension_numbers<[1], [0], [0], [1], [0, 0, 1, 1], [], []>} : vector<16x128xf32>, vector<128x16xf32>, vector<16x16xf32> -> vector<16x16xf32>
    %125 = arith.addf %113, %124 : vector<16x16xf32>
    %c1_168 = arith.constant 1 : index
    %c1_169 = arith.constant 1 : index
    %c1_170 = arith.constant 1 : index
    %c0_171 = arith.constant 0 : index
    %126 = vector.load %arg5[%c1_168, %c1_169, %c1_170, %c0_171] : memref<2x2x22x128xf32, #tpu.memory_space<vmem>>, vector<1x1x16x128xf32>
    %127 = vector.shape_cast %126 : vector<1x1x16x128xf32> to vector<16x128xf32>
    %c1_172 = arith.constant 1 : index
    %c1_173 = arith.constant 1 : index
    %c0_174 = arith.constant 0 : index
    %c0_175 = arith.constant 0 : index
    %128 = vector.load %arg1[%c1_172, %c1_173, %c0_174, %c0_175] : memref<2x7x128x16xf32, #tpu.memory_space<vmem>>, vector<1x1x128x16xf32>
    %129 = vector.shape_cast %128 : vector<1x1x128x16xf32> to vector<128x16xf32>
    %cst_176 = arith.constant dense<0.000000e+00> : vector<16x16xf32>
    %130 = tpu.matmul %127, %129, %cst_176 {dimension_numbers = #tpu.dot_dimension_numbers<[1], [0], [0], [1], [0, 0, 1, 1], [], []>} : vector<16x128xf32>, vector<128x16xf32>, vector<16x16xf32> -> vector<16x16xf32>
    %131 = arith.addf %119, %130 : vector<16x16xf32>
    %c1_177 = arith.constant 1 : index
    %c0_178 = arith.constant 0 : index
    %c2_179 = arith.constant 2 : index
    %c0_180 = arith.constant 0 : index
    %132 = vector.load %arg5[%c1_177, %c0_178, %c2_179, %c0_180] : memref<2x2x22x128xf32, #tpu.memory_space<vmem>>, vector<1x1x16x128xf32>
    %133 = vector.shape_cast %132 : vector<1x1x16x128xf32> to vector<16x128xf32>
    %c0_181 = arith.constant 0 : index
    %c2_182 = arith.constant 2 : index
    %c0_183 = arith.constant 0 : index
    %c0_184 = arith.constant 0 : index
    %134 = vector.load %arg1[%c0_181, %c2_182, %c0_183, %c0_184] : memref<2x7x128x16xf32, #tpu.memory_space<vmem>>, vector<1x1x128x16xf32>
    %135 = vector.shape_cast %134 : vector<1x1x128x16xf32> to vector<128x16xf32>
    %cst_185 = arith.constant dense<0.000000e+00> : vector<16x16xf32>
    %136 = tpu.matmul %133, %135, %cst_185 {dimension_numbers = #tpu.dot_dimension_numbers<[1], [0], [0], [1], [0, 0, 1, 1], [], []>} : vector<16x128xf32>, vector<128x16xf32>, vector<16x16xf32> -> vector<16x16xf32>
    %137 = arith.addf %125, %136 : vector<16x16xf32>
    %c1_186 = arith.constant 1 : index
    %c1_187 = arith.constant 1 : index
    %c2_188 = arith.constant 2 : index
    %c0_189 = arith.constant 0 : index
    %138 = vector.load %arg5[%c1_186, %c1_187, %c2_188, %c0_189] : memref<2x2x22x128xf32, #tpu.memory_space<vmem>>, vector<1x1x16x128xf32>
    %139 = vector.shape_cast %138 : vector<1x1x16x128xf32> to vector<16x128xf32>
    %c1_190 = arith.constant 1 : index
    %c2_191 = arith.constant 2 : index
    %c0_192 = arith.constant 0 : index
    %c0_193 = arith.constant 0 : index
    %140 = vector.load %arg1[%c1_190, %c2_191, %c0_192, %c0_193] : memref<2x7x128x16xf32, #tpu.memory_space<vmem>>, vector<1x1x128x16xf32>
    %141 = vector.shape_cast %140 : vector<1x1x128x16xf32> to vector<128x16xf32>
    %cst_194 = arith.constant dense<0.000000e+00> : vector<16x16xf32>
    %142 = tpu.matmul %139, %141, %cst_194 {dimension_numbers = #tpu.dot_dimension_numbers<[1], [0], [0], [1], [0, 0, 1, 1], [], []>} : vector<16x128xf32>, vector<128x16xf32>, vector<16x16xf32> -> vector<16x16xf32>
    %143 = arith.addf %131, %142 : vector<16x16xf32>
    %c1_195 = arith.constant 1 : index
    %c0_196 = arith.constant 0 : index
    %c3_197 = arith.constant 3 : index
    %c0_198 = arith.constant 0 : index
    %144 = vector.load %arg5[%c1_195, %c0_196, %c3_197, %c0_198] : memref<2x2x22x128xf32, #tpu.memory_space<vmem>>, vector<1x1x16x128xf32>
    %145 = vector.shape_cast %144 : vector<1x1x16x128xf32> to vector<16x128xf32>
    %c0_199 = arith.constant 0 : index
    %c3_200 = arith.constant 3 : index
    %c0_201 = arith.constant 0 : index
    %c0_202 = arith.constant 0 : index
    %146 = vector.load %arg1[%c0_199, %c3_200, %c0_201, %c0_202] : memref<2x7x128x16xf32, #tpu.memory_space<vmem>>, vector<1x1x128x16xf32>
    %147 = vector.shape_cast %146 : vector<1x1x128x16xf32> to vector<128x16xf32>
    %cst_203 = arith.constant dense<0.000000e+00> : vector<16x16xf32>
    %148 = tpu.matmul %145, %147, %cst_203 {dimension_numbers = #tpu.dot_dimension_numbers<[1], [0], [0], [1], [0, 0, 1, 1], [], []>} : vector<16x128xf32>, vector<128x16xf32>, vector<16x16xf32> -> vector<16x16xf32>
    %149 = arith.addf %137, %148 : vector<16x16xf32>
    %c1_204 = arith.constant 1 : index
    %c1_205 = arith.constant 1 : index
    %c3_206 = arith.constant 3 : index
    %c0_207 = arith.constant 0 : index
    %150 = vector.load %arg5[%c1_204, %c1_205, %c3_206, %c0_207] : memref<2x2x22x128xf32, #tpu.memory_space<vmem>>, vector<1x1x16x128xf32>
    %151 = vector.shape_cast %150 : vector<1x1x16x128xf32> to vector<16x128xf32>
    %c1_208 = arith.constant 1 : index
    %c3_209 = arith.constant 3 : index
    %c0_210 = arith.constant 0 : index
    %c0_211 = arith.constant 0 : index
    %152 = vector.load %arg1[%c1_208, %c3_209, %c0_210, %c0_211] : memref<2x7x128x16xf32, #tpu.memory_space<vmem>>, vector<1x1x128x16xf32>
    %153 = vector.shape_cast %152 : vector<1x1x128x16xf32> to vector<128x16xf32>
    %cst_212 = arith.constant dense<0.000000e+00> : vector<16x16xf32>
    %154 = tpu.matmul %151, %153, %cst_212 {dimension_numbers = #tpu.dot_dimension_numbers<[1], [0], [0], [1], [0, 0, 1, 1], [], []>} : vector<16x128xf32>, vector<128x16xf32>, vector<16x16xf32> -> vector<16x16xf32>
    %155 = arith.addf %143, %154 : vector<16x16xf32>
    %c1_213 = arith.constant 1 : index
    %c0_214 = arith.constant 0 : index
    %c4_215 = arith.constant 4 : index
    %c0_216 = arith.constant 0 : index
    %156 = vector.load %arg5[%c1_213, %c0_214, %c4_215, %c0_216] : memref<2x2x22x128xf32, #tpu.memory_space<vmem>>, vector<1x1x16x128xf32>
    %157 = vector.shape_cast %156 : vector<1x1x16x128xf32> to vector<16x128xf32>
    %c0_217 = arith.constant 0 : index
    %c4_218 = arith.constant 4 : index
    %c0_219 = arith.constant 0 : index
    %c0_220 = arith.constant 0 : index
    %158 = vector.load %arg1[%c0_217, %c4_218, %c0_219, %c0_220] : memref<2x7x128x16xf32, #tpu.memory_space<vmem>>, vector<1x1x128x16xf32>
    %159 = vector.shape_cast %158 : vector<1x1x128x16xf32> to vector<128x16xf32>
    %cst_221 = arith.constant dense<0.000000e+00> : vector<16x16xf32>
    %160 = tpu.matmul %157, %159, %cst_221 {dimension_numbers = #tpu.dot_dimension_numbers<[1], [0], [0], [1], [0, 0, 1, 1], [], []>} : vector<16x128xf32>, vector<128x16xf32>, vector<16x16xf32> -> vector<16x16xf32>
    %161 = arith.addf %149, %160 : vector<16x16xf32>
    %c1_222 = arith.constant 1 : index
    %c1_223 = arith.constant 1 : index
    %c4_224 = arith.constant 4 : index
    %c0_225 = arith.constant 0 : index
    %162 = vector.load %arg5[%c1_222, %c1_223, %c4_224, %c0_225] : memref<2x2x22x128xf32, #tpu.memory_space<vmem>>, vector<1x1x16x128xf32>
    %163 = vector.shape_cast %162 : vector<1x1x16x128xf32> to vector<16x128xf32>
    %c1_226 = arith.constant 1 : index
    %c4_227 = arith.constant 4 : index
    %c0_228 = arith.constant 0 : index
    %c0_229 = arith.constant 0 : index
    %164 = vector.load %arg1[%c1_226, %c4_227, %c0_228, %c0_229] : memref<2x7x128x16xf32, #tpu.memory_space<vmem>>, vector<1x1x128x16xf32>
    %165 = vector.shape_cast %164 : vector<1x1x128x16xf32> to vector<128x16xf32>
    %cst_230 = arith.constant dense<0.000000e+00> : vector<16x16xf32>
    %166 = tpu.matmul %163, %165, %cst_230 {dimension_numbers = #tpu.dot_dimension_numbers<[1], [0], [0], [1], [0, 0, 1, 1], [], []>} : vector<16x128xf32>, vector<128x16xf32>, vector<16x16xf32> -> vector<16x16xf32>
    %167 = arith.addf %155, %166 : vector<16x16xf32>
    %c1_231 = arith.constant 1 : index
    %c0_232 = arith.constant 0 : index
    %c5_233 = arith.constant 5 : index
    %c0_234 = arith.constant 0 : index
    %168 = vector.load %arg5[%c1_231, %c0_232, %c5_233, %c0_234] : memref<2x2x22x128xf32, #tpu.memory_space<vmem>>, vector<1x1x16x128xf32>
    %169 = vector.shape_cast %168 : vector<1x1x16x128xf32> to vector<16x128xf32>
    %c0_235 = arith.constant 0 : index
    %c5_236 = arith.constant 5 : index
    %c0_237 = arith.constant 0 : index
    %c0_238 = arith.constant 0 : index
    %170 = vector.load %arg1[%c0_235, %c5_236, %c0_237, %c0_238] : memref<2x7x128x16xf32, #tpu.memory_space<vmem>>, vector<1x1x128x16xf32>
    %171 = vector.shape_cast %170 : vector<1x1x128x16xf32> to vector<128x16xf32>
    %cst_239 = arith.constant dense<0.000000e+00> : vector<16x16xf32>
    %172 = tpu.matmul %169, %171, %cst_239 {dimension_numbers = #tpu.dot_dimension_numbers<[1], [0], [0], [1], [0, 0, 1, 1], [], []>} : vector<16x128xf32>, vector<128x16xf32>, vector<16x16xf32> -> vector<16x16xf32>
    %173 = arith.addf %161, %172 : vector<16x16xf32>
    %c1_240 = arith.constant 1 : index
    %c1_241 = arith.constant 1 : index
    %c5_242 = arith.constant 5 : index
    %c0_243 = arith.constant 0 : index
    %174 = vector.load %arg5[%c1_240, %c1_241, %c5_242, %c0_243] : memref<2x2x22x128xf32, #tpu.memory_space<vmem>>, vector<1x1x16x128xf32>
    %175 = vector.shape_cast %174 : vector<1x1x16x128xf32> to vector<16x128xf32>
    %c1_244 = arith.constant 1 : index
    %c5_245 = arith.constant 5 : index
    %c0_246 = arith.constant 0 : index
    %c0_247 = arith.constant 0 : index
    %176 = vector.load %arg1[%c1_244, %c5_245, %c0_246, %c0_247] : memref<2x7x128x16xf32, #tpu.memory_space<vmem>>, vector<1x1x128x16xf32>
    %177 = vector.shape_cast %176 : vector<1x1x128x16xf32> to vector<128x16xf32>
    %cst_248 = arith.constant dense<0.000000e+00> : vector<16x16xf32>
    %178 = tpu.matmul %175, %177, %cst_248 {dimension_numbers = #tpu.dot_dimension_numbers<[1], [0], [0], [1], [0, 0, 1, 1], [], []>} : vector<16x128xf32>, vector<128x16xf32>, vector<16x16xf32> -> vector<16x16xf32>
    %179 = arith.addf %167, %178 : vector<16x16xf32>
    %c1_249 = arith.constant 1 : index
    %c0_250 = arith.constant 0 : index
    %c6_251 = arith.constant 6 : index
    %c0_252 = arith.constant 0 : index
    %180 = vector.load %arg5[%c1_249, %c0_250, %c6_251, %c0_252] : memref<2x2x22x128xf32, #tpu.memory_space<vmem>>, vector<1x1x16x128xf32>
    %181 = vector.shape_cast %180 : vector<1x1x16x128xf32> to vector<16x128xf32>
    %c0_253 = arith.constant 0 : index
    %c6_254 = arith.constant 6 : index
    %c0_255 = arith.constant 0 : index
    %c0_256 = arith.constant 0 : index
    %182 = vector.load %arg1[%c0_253, %c6_254, %c0_255, %c0_256] : memref<2x7x128x16xf32, #tpu.memory_space<vmem>>, vector<1x1x128x16xf32>
    %183 = vector.shape_cast %182 : vector<1x1x128x16xf32> to vector<128x16xf32>
    %cst_257 = arith.constant dense<0.000000e+00> : vector<16x16xf32>
    %184 = tpu.matmul %181, %183, %cst_257 {dimension_numbers = #tpu.dot_dimension_numbers<[1], [0], [0], [1], [0, 0, 1, 1], [], []>} : vector<16x128xf32>, vector<128x16xf32>, vector<16x16xf32> -> vector<16x16xf32>
    %185 = arith.addf %173, %184 : vector<16x16xf32>
    %c1_258 = arith.constant 1 : index
    %c1_259 = arith.constant 1 : index
    %c6_260 = arith.constant 6 : index
    %c0_261 = arith.constant 0 : index
    %186 = vector.load %arg5[%c1_258, %c1_259, %c6_260, %c0_261] : memref<2x2x22x128xf32, #tpu.memory_space<vmem>>, vector<1x1x16x128xf32>
    %187 = vector.shape_cast %186 : vector<1x1x16x128xf32> to vector<16x128xf32>
    %c1_262 = arith.constant 1 : index
    %c6_263 = arith.constant 6 : index
    %c0_264 = arith.constant 0 : index
    %c0_265 = arith.constant 0 : index
    %188 = vector.load %arg1[%c1_262, %c6_263, %c0_264, %c0_265] : memref<2x7x128x16xf32, #tpu.memory_space<vmem>>, vector<1x1x128x16xf32>
    %189 = vector.shape_cast %188 : vector<1x1x128x16xf32> to vector<128x16xf32>
    %cst_266 = arith.constant dense<0.000000e+00> : vector<16x16xf32>
    %190 = tpu.matmul %187, %189, %cst_266 {dimension_numbers = #tpu.dot_dimension_numbers<[1], [0], [0], [1], [0, 0, 1, 1], [], []>} : vector<16x128xf32>, vector<128x16xf32>, vector<16x16xf32> -> vector<16x16xf32>
    %191 = arith.addf %179, %190 : vector<16x16xf32>
    %192 = arith.addf %185, %191 : vector<16x16xf32>
    %193 = arith.negf %192 : vector<16x16xf32>
    %194 = math.exp %193 : vector<16x16xf32>
    %cst_267 = arith.constant 1.000000e+00 : f32
    %195 = vector.broadcast %cst_267 : f32 to vector<16x16xf32>
    %196 = arith.addf %195, %194 : vector<16x16xf32>
    %197 = arith.divf %195, %196 : vector<16x16xf32>
    %c1_268 = arith.constant 1 : index
    %c0_269 = arith.constant 0 : index
    %c0_270 = arith.constant 0 : index
    %198 = vector.load %arg4[%c1_268, %c0_269, %c0_270] : memref<2x16x16xf32, #tpu.memory_space<vmem>>, vector<1x16x16xf32>
    %199 = vector.shape_cast %198 : vector<1x16x16xf32> to vector<16x16xf32>
    %200 = vector.shape_cast %197 : vector<16x16xf32> to vector<1x16x16xf32>
    tpu.vector_store %arg4[%c1_268, %c0_269, %c0_270], %200 {strides = array<i32>} : memref<2x16x16xf32, #tpu.memory_space<vmem>>, vector<1x16x16xf32>,
    return
  }
  func.func @transform_0(%arg0: i32) -> (i32, i32, i32, i32) {
    %c0_i32 = arith.constant 0 : i32
    %c0_i32_0 = arith.constant 0 : i32
    %c0_i32_1 = arith.constant 0 : i32
    %c0_i32_2 = arith.constant 0 : i32
    %c0_i32_3 = arith.constant 0 : i32
    return %c0_i32, %c0_i32_0, %c0_i32_1, %c0_i32_2 : i32, i32, i32, i32
  }
  func.func @transform_1(%arg0: i32) -> (i32, i32, i32) {
    %c0_i32 = arith.constant 0 : i32
    %c0_i32_0 = arith.constant 0 : i32
    %c0_i32_1 = arith.constant 0 : i32
    return %arg0, %c0_i32, %c0_i32_0 : i32, i32, i32
  }
  func.func @transform_2(%arg0: i32) -> (i32, i32, i32) {
    %c0_i32 = arith.constant 0 : i32
    %c0_i32_0 = arith.constant 0 : i32
    %c0_i32_1 = arith.constant 0 : i32
    return %arg0, %c0_i32, %c0_i32_0 : i32, i32, i32
  }
  func.func @transform_3(%arg0: i32) -> (i32, i32, i32) {
    %c0_i32 = arith.constant 0 : i32
    %c0_i32_0 = arith.constant 0 : i32
    %c0_i32_1 = arith.constant 0 : i32
    return %arg0, %c0_i32, %c0_i32_0 : i32, i32, i32
  }
}

</mosaic_0001>

<bundles_post_ra>
// kernel: spatial_attention.2
= control target key start
LH: loop header
LB: loop body
LE: loop exit
PB: predicated region body
PF: predicated region fallthrough
CT: control target
= control target key end

     0   :  { %s497_s9 = smov 0   ;;  %s499_s10 = smov 0   ;;  %s537_s0 = inlined_call_operand.vmem [shape: f32[2,4,256], index: 0, kind: input, shape index: {}]   ;;  %s538_s1 = inlined_call_operand.vmem [shape: f32[2,1,256], index: 1, kind: output, shape index: {0}]   ;;  %s539_s2 = inlined_call_operand.vmem [shape: f32[2,1,256], index: 2, kind: output, shape index: {1}]  }
   0x1   :  { %s501_s11 = smov 0  }
   0x2 LB: > { %s25_s12 = sadd.s32 1, %s475_s10  ;;  %p423_p0 = scmp.ge.s32.totalorder %s479_s11, 1  ;;  %s479_s11 = sphi %s501_s11, %s13_s11   ;;  %s475_s10 = sphi %s499_s10, %s541_s10   ;;  %s471_s9 = sphi %s497_s9, %s540_s9  }
   0x3   : > { %p27_p1 = scmp.ge.s32.totalorder %s25_s12, 2  ;;  %p133_p2 = scmp.lt.s32.totalorder %s479_s11, 3 }
   0x5   : > { %s543_s12 = smov (%p27_p1, %s25_s12), 0  ;;  %p134_p3 = pnand %p423_p0, %p133_p2 }
   0x6   : > { %p162_p4 = scmp.lt.s32.totalorder (!%p134_p3), %s471_s9, 1 }
   0x7   : > { %137 = sbr.rel (%p134_p3) target bundleno = 48 (0x30), region = 24 }
   0xc   : > { %s545_s9 = smov (!%p162_p4, %s471_s9), 1  ;;  %vm183_vm0 = vcmask 1043456   ;;  %v481_v12 = vmov 1966171168   ;;  %v222_v14 = vlaneseq }
   0xd   : > { %s430_s13 = sshll.u32 %s545_s9, 3  ;;  %v220_v13 = vunpack.c.l.s4 %v481_v12  ;;  %s426_s17 = sshll.u32 %s545_s9, 1 }
   0xe   : > { %s170_s16 = scalar_lea.vmem %s537_s0, %s430_s13  ;;  %v223_v24 = vshrl.u32 %v222_v14, 7  ;;  %s174_s20 = scalar_lea.vmem %s538_s1, %s426_s17  ;;  %vm236_vm1 = vcmp.lt.s32.totalorder %v222_v14, 256 }
   0xf   : > { %v179_v0 = vld [vmem:[%s170_s16] sm:$0xff]  ;;  %v221_v23 = vunpack.c.0.s8 %v220_v13  ;;  %s178_s23 = scalar_lea.vmem %s539_s2, %s426_s17 }
  0x10   : > { %v181_v1 = vcombine.high %v179_v0, %v179_v0  ;;  %v184_v2 = vsel %vm183_vm0, %v179_v0, 0.0  ;;  %v198_v3 = vsel %vm183_vm0, %v179_v0, -inf }
  0x11   : > { %v185_v4 = vrot.slane %v184_v2, 4  ;;  %v199_v5 = vrot.slane %v198_v3, 4  ;;  %v224_v34 = vsub.s32 %v221_v23, %v223_v24 }
  0x12   : > { %v191_v6 = vsel %vm183_vm0, %v181_v1, 0.0  ;;  %v205_v7 = vsel %vm183_vm0, %v181_v1, -inf }
  0x13   : > { %v186_v8 = vadd.f32 %v185_v4, %v184_v2  ;;  %v192_v9 = vrot.slane %v191_v6, 4  ;;  %v200_v10 = vmax.f32 %v198_v3, %v199_v5  ;;  %v206_v11 = vrot.slane %v205_v7, 4 }
  0x15   : > { %v187_v15 = vrot.slane %v186_v8, 2  ;;  %v193_v16 = vadd.f32 %v192_v9, %v191_v6  ;;  %v201_v17 = vrot.slane %v200_v10, 2  ;;  %v207_v18 = vmax.f32 %v205_v7, %v206_v11 }
  0x17   : > { %v188_v19 = vadd.f32 %v187_v15, %v186_v8  ;;  %v194_v20 = vrot.slane %v193_v16, 2  ;;  %v202_v21 = vmax.f32 %v200_v10, %v201_v17  ;;  %v208_v22 = vrot.slane %v207_v18, 2 }
  0x19   : > { %v189_v25 = vrot.slane %v188_v19, 1  ;;  %v195_v26 = vadd.f32 %v194_v20, %v193_v16  ;;  %v203_v27 = vrot.slane %v202_v21, 1  ;;  %v209_v28 = vmax.f32 %v207_v18, %v208_v22 }
  0x1b   : > { %v190_v29 = vadd.f32 %v189_v25, %v188_v19  ;;  %v196_v30 = vrot.slane %v195_v26, 1  ;;  %v204_v31 = vmax.f32 %v202_v21, %v203_v27  ;;  %v210_v32 = vrot.slane %v209_v28, 1 }
  0x1d   : > { %v197_v33 = vadd.f32 %v196_v30, %v195_v26  ;;  %v211_v35 = vmax.f32 %v209_v28, %v210_v32 }
  0x1f   : > { %v218_v36 = vcombine.low %v190_v29, %v197_v33  ;;  %v241_v37 = vcombine.low %v204_v31, %v211_v35 }
  0x21   : > { %v225_v38 = vrot.slane %v218_v36, %v224_v34  ;;  %v248_v39 = vrot.slane %v241_v37, %v224_v34 }
  0x23   : > { %v232_v40 = vrot.slane %v225_v38, %v224_v34  ;;  %v255_v41 = vrot.slane %v248_v39, %v224_v34 }
  0x25   : > { %238 = vst.msk [vmem:[%s174_s20] sm:$0x3] %vm236_vm1, %v232_v40  ;;  %257 = vst.msk [vmem:[%s178_s23] sm:$0x3] %vm236_vm1, %v255_v41 }
  0x2c   : > { %v311_v42 = vld [vmem:[%s174_s20] sm:$0x3] }
  0x2d   : > { %v312_v43 = vmul.f32 0.25, %v311_v42 }
  0x2f   : > { %317 = vst.msk [vmem:[%s174_s20] sm:$0x3] %vm236_vm1, %v312_v43 }
  0x30 PF: > { %s13_s11 = sadd.s32 1, %s479_s11   ;;  %s540_s9 = smov %s475_s10 }
  0x31   : > { %p10_p5 = scmp.ge.s32.totalorder %s13_s11, 4   ;;  %s541_s10 = smov %s543_s12 }
  0x33   :  { %12 = sbr.rel (!%p10_p5) target bundleno = 2 (0x2), region = 78 }

// kernel: spatial_attention.3
= control target key start
LH: loop header
LB: loop body
LE: loop exit
PB: predicated region body
PF: predicated region fallthrough
CT: control target
= control target key end

     0   :  { %s4737_s16 = smov 3   ;;  %v4738_v4 = vmov 0.0   ;;  %s6189_s0 = inlined_call_operand.vmem [shape: f32[2,7,128,16], index: 0, kind: input, shape index: {}]   ;;  %s6190_s1 = inlined_call_operand.vmem [shape: f32[2,16,16], index: 1, kind: input, shape index: {}]   ;;  %s6191_s2 = inlined_call_operand.vmem [shape: f32[2,16,16], index: 2, kind: input, shape index: {}]   ;;  %s6192_s3 = inlined_call_operand.hbm [shape: f32[2,16,16], index: 3, kind: output, shape index: {}]  }
   0x1   :  { %v31_v0 = vld [vmem:[%s6190_s1] sm:$0xff]  ;;  %v32_v2 = vld [vmem:[%s6190_s1 + $0x8] sm:$0xff]  ;;  %v2821_v3 = vld [vmem:[%s6189_s0 + $0xf8] sm:$0xff]  ;;  %19 = vst [vmem:[#allocation2] sm:$0xff] %v4738_v4 }
   0x2   :  { %v56_v1 = vld [vmem:[%s6191_s2] sm:$0xff]  ;;  %39 = vrot.lane.b32.xlu0 %v31_v0, %s4737_s16  ;;  %20 = vst [vmem:[#allocation2 + $0x8] sm:$0xff] %v4738_v4  ;;  %21 = vst [vmem:[#allocation2 + $0x10] sm:$0x3f] %v4738_v4  ;;  %v57_v5 = vld [vmem:[%s6191_s2 + $0x8] sm:$0xff]  ;;  %3714 = vmatprep.subr.mxu0 %v2821_v3 }
   0x3   :  { %64 = vrot.lane.b32.xlu1 %v56_v1, %s4737_s16  ;;  %22 = vst [vmem:[#allocation2 + $0x18] sm:$0xff] %v4738_v4  ;;  %23 = vst [vmem:[#allocation2 + $0x20] sm:$0xff] %v4738_v4  ;;  %v98_v6 = vld [vmem:[%s6189_s0 + $0x78] sm:$0xff]  ;;  %v2820_v7 = vld [vmem:[%s6189_s0 + $0xf0] sm:$0xff]  ;;  %3715 = vmatpush3.msra.mxu0 %v2821_v3 }
   0x4   :  { %24 = vst [vmem:[#allocation2 + $0x28] sm:$0x3f] %v4738_v4  ;;  %25 = vst [vmem:[#allocation2 + $0x30] sm:$0xff] %v4738_v4  ;;  %3749 = vmatprep.subr.mxu1 %v98_v6  ;;  %v97_v8 = vld [vmem:[%s6189_s0 + $0x70] sm:$0xff]  ;;  %3716 = vmatprep.subr.mxu0 %v2820_v7  ;;  %v2819_v9 = vld [vmem:[%s6189_s0 + $0xe8] sm:$0xff] }
   0x5   :  { %26 = vst [vmem:[#allocation2 + $0x38] sm:$0xff] %v4738_v4  ;;  %27 = vst [vmem:[#allocation2 + $0x40] sm:$0x3f] %v4738_v4  ;;  %3750 = vmatpush3.msra.mxu1 %v98_v6  ;;  %v96_v10 = vld [vmem:[%s6189_s0 + $0x68] sm:$0xff]  ;;  %3717 = vmatpush3.msra.mxu0 %v2820_v7  ;;  %v2818_v11 = vld [vmem:[%s6189_s0 + $0xe0] sm:$0xff] }
   0x6   :  { %28 = vst [vmem:[#allocation2 + $0x48] sm:$0xff] %v4738_v4  ;;  %29 = vst [vmem:[#allocation2 + $0x50] sm:$0xff] %v4738_v4  ;;  %41 = vrot.lane.b32.xlu0 %v32_v2, %s4737_s16  ;;  %3751 = vmatprep.subr.mxu1 %v97_v8  ;;  %v95_v12 = vld [vmem:[%s6189_s0 + $0x60] sm:$0xff]  ;;  %v2817_v13 = vld [vmem:[%s6189_s0 + $0xd8] sm:$0xff] }
   0x7   :  { %30 = vst [vmem:[#allocation2 + $0x58] sm:$0x3f] %v4738_v4  ;;  %66 = vrot.lane.b32.xlu1 %v57_v5, %s4737_s16  ;;  %3752 = vmatpush3.msra.mxu1 %v97_v8  ;;  %v94_v14 = vld [vmem:[%s6189_s0 + $0x58] sm:$0xff]  ;;  %v2816_v15 = vld [vmem:[%s6189_s0 + $0xd0] sm:$0xff]  ;;  %v2815_v17 = vld [vmem:[%s6189_s0 + $0xc8] sm:$0xff] }
   0x8   :  { %3718 = vmatprep.subr.mxu0 %v2819_v9  ;;  %3753 = vmatprep.subr.mxu1 %v96_v10  ;;  %v93_v16 = vld [vmem:[%s6189_s0 + $0x50] sm:$0xff]  ;;  %v92_v18 = vld [vmem:[%s6189_s0 + $0x48] sm:$0xff]  ;;  %v2814_v19 = vld [vmem:[%s6189_s0 + $0xc0] sm:$0xff] }
   0x9   :  { %3719 = vmatpush3.msra.mxu0 %v2819_v9  ;;  %3754 = vmatpush3.msra.mxu1 %v96_v10  ;;  %v91_v20 = vld [vmem:[%s6189_s0 + $0x40] sm:$0xff]  ;;  %v2813_v21 = vld [vmem:[%s6189_s0 + $0xb8] sm:$0xff]  ;;  %v2812_v23 = vld [vmem:[%s6189_s0 + $0xb0] sm:$0xff] }
   0xa   :  { %3720 = vmatprep.subr.mxu0 %v2818_v11  ;;  %3755 = vmatprep.subr.mxu1 %v95_v12  ;;  %v90_v22 = vld [vmem:[%s6189_s0 + $0x38] sm:$0xff]  ;;  %v89_v24 = vld [vmem:[%s6189_s0 + $0x30] sm:$0xff]  ;;  %v2811_v25 = vld [vmem:[%s6189_s0 + $0xa8] sm:$0xff] }
   0xb   :  { %3721 = vmatpush3.msra.mxu0 %v2818_v11  ;;  %3756 = vmatpush3.msra.mxu1 %v95_v12 }
   0xc   :  { %3722 = vmatprep.subr.mxu0 %v2817_v13  ;;  %3757 = vmatprep.subr.mxu1 %v94_v14 }
   0xd   :  { %3723 = vmatpush3.msra.mxu0 %v2817_v13  ;;  %3758 = vmatpush3.msra.mxu1 %v94_v14 }
   0xe   :  { %3724 = vmatprep.subr.mxu0 %v2816_v15  ;;  %3759 = vmatprep.subr.mxu1 %v93_v16 }
   0xf   :  { %3725 = vmatpush3.msra.mxu0 %v2816_v15  ;;  %3760 = vmatpush3.msra.mxu1 %v93_v16 }
  0x10   :  { %3726 = vmatprep.subr.mxu0 %v2815_v17  ;;  %3761 = vmatprep.subr.mxu1 %v92_v18 }
  0x11   :  { %3727 = vmatpush3.msra.mxu0 %v2815_v17  ;;  %3762 = vmatpush3.msra.mxu1 %v92_v18 }
  0x12   :  { %3728 = vmatprep.subr.mxu0 %v2814_v19  ;;  %3763 = vmatprep.subr.mxu1 %v91_v20 }
  0x13   :  { %3729 = vmatpush3.msra.mxu0 %v2814_v19  ;;  %3764 = vmatpush3.msra.mxu1 %v91_v20 }
  0x14   :  { %3730 = vmatprep.subr.mxu0 %v2813_v21  ;;  %3765 = vmatprep.subr.mxu1 %v90_v22 }
  0x15   :  { %3731 = vmatpush3.msra.mxu0 %v2813_v21 }
  0x16   :  { %8 = vsyncpa [#allocation4], 0  ;;  %3766 = vmatpush3.msra.mxu1 %v90_v22  ;;  %3732 = vmatprep.subr.mxu0 %v2812_v23  ;;  %v88_v26 = vld [vmem:[%s6189_s0 + $0x28] sm:$0xff]  ;;  %v2810_v27 = vld [vmem:[%s6189_s0 + $0xa0] sm:$0xff]  ;;  %vm51_vm0 = vcmask 154648   ;;  %vm1430_vm1 = vcmask 130048  }
  0x17   :  { %3767 = vmatprep.subr.mxu1 %v89_v24  ;;  %3733 = vmatpush3.msra.mxu0 %v2812_v23  ;;  %v87_v28 = vld [vmem:[%s6189_s0 + $0x20] sm:$0xff]  ;;  %v2809_v29 = vld [vmem:[%s6189_s0 + $0x98] sm:$0xff]  ;;  %v2808_v31 = vld [vmem:[%s6189_s0 + $0x90] sm:$0xff] }
  0x18   :  { %3768 = vmatpush3.msra.mxu1 %v89_v24  ;;  %3734 = vmatprep.subr.mxu0 %v2811_v25  ;;  %v86_v30 = vld [vmem:[%s6189_s0 + $0x18] sm:$0xff]  ;;  %v85_v32 = vld [vmem:[%s6189_s0 + $0x10] sm:$0xff]  ;;  %v2807_v33 = vld [vmem:[%s6189_s0 + $0x88] sm:$0xff] }
  0x19   :  { %3769 = vmatprep.subr.mxu1 %v88_v26  ;;  %3735 = vmatpush3.msra.mxu0 %v2811_v25  ;;  %v84_v34 = vld [vmem:[%s6189_s0 + $0x8] sm:$0xff]  ;;  %v2806_v35 = vld [vmem:[%s6189_s0 + $0x80] sm:$0xff]  ;;  %v2837_v37 = vld [vmem:[%s6189_s0 + $0x478] sm:$0xff] }
  0x1a   :  { %3770 = vmatpush3.msra.mxu1 %v88_v26  ;;  %3736 = vmatprep.subr.mxu0 %v2810_v27  ;;  %v83_v36 = vld [vmem:[%s6189_s0] sm:$0xff]  ;;  %v2805_v38 = vld [vmem:[%s6189_s0 + $0x3f8] sm:$0xff]  ;;  %v33_v39 = vld [vmem:[%s6190_s1 + $0x10] sm:$0xff] }
  0x1b   :  { %3771 = vmatprep.subr.mxu1 %v87_v28  ;;  %3737 = vmatpush3.msra.mxu0 %v2810_v27  ;;  %v34_v40 = vld [vmem:[%s6190_s1 + $0x18] sm:$0xff]  ;;  %v2836_v47 = vld [vmem:[%s6189_s0 + $0x470] sm:$0xff]  ;;  %v2835_v51 = vld [vmem:[%s6189_s0 + $0x468] sm:$0xff] }
  0x1c   :  { %3772 = vmatpush3.msra.mxu1 %v87_v28  ;;  %3738 = vmatprep.subr.mxu0 %v2809_v29  ;;  %v2804_v50 = vld [vmem:[%s6189_s0 + $0x3f0] sm:$0xff]  ;;  %v2803_v52 = vld [vmem:[%s6189_s0 + $0x3e8] sm:$0xff]  ;;  %v2834_v53 = vld [vmem:[%s6189_s0 + $0x460] sm:$0xff] }
  0x1d   :  { %3773 = vmatprep.subr.mxu1 %v86_v30  ;;  %3739 = vmatpush3.msra.mxu0 %v2809_v29  ;;  %v2802_v54 = vld [vmem:[%s6189_s0 + $0x3e0] sm:$0xff]  ;;  %v2833_v55 = vld [vmem:[%s6189_s0 + $0x458] sm:$0xff]  ;;  %v2832_v57 = vld [vmem:[%s6189_s0 + $0x450] sm:$0xff] }
  0x1e   :  { %3774 = vmatpush3.msra.mxu1 %v86_v30  ;;  %3740 = vmatprep.subr.mxu0 %v2808_v31  ;;  %v2801_v56 = vld [vmem:[%s6189_s0 + $0x3d8] sm:$0xff]  ;;  %v2800_v58 = vld [vmem:[%s6189_s0 + $0x3d0] sm:$0xff]  ;;  %v2831_v59 = vld [vmem:[%s6189_s0 + $0x448] sm:$0xff] }
  0x1f   :  { %3775 = vmatprep.subr.mxu1 %v85_v32  ;;  %3741 = vmatpush3.msra.mxu0 %v2808_v31  ;;  %v2799_v60 = vld [vmem:[%s6189_s0 + $0x3c8] sm:$0xff]  ;;  %v2830_v61 = vld [vmem:[%s6189_s0 + $0x440] sm:$0xff]  ;;  %v2829_v63 = vld [vmem:[%s6189_s0 + $0x438] sm:$0xff] }
  0x20   :  { %3776 = vmatpush3.msra.mxu1 %v85_v32  ;;  %3742 = vmatprep.subr.mxu0 %v2807_v33  ;;  %v2798_v62 = vld [vmem:[%s6189_s0 + $0x3c0] sm:$0xff]  ;;  %v2797_v0 = vld [vmem:[%s6189_s0 + $0x3b8] sm:$0xff]  ;;  %v2828_v1 = vld [vmem:[%s6189_s0 + $0x430] sm:$0xff] }
  0x21   :  { %3777 = vmatprep.subr.mxu1 %v84_v34  ;;  %3743 = vmatpush3.msra.mxu0 %v2807_v33  ;;  %v2796_v2 = vld [vmem:[%s6189_s0 + $0x3b0] sm:$0xff]  ;;  %v2827_v3 = vld [vmem:[%s6189_s0 + $0x428] sm:$0xff]  ;;  %v2826_v5 = vld [vmem:[%s6189_s0 + $0x420] sm:$0xff] }
  0x22   :  { %3778 = vmatpush3.msra.mxu1 %v84_v34  ;;  %3744 = vmatprep.subr.mxu0 %v2806_v35  ;;  %v2795_v4 = vld [vmem:[%s6189_s0 + $0x3a8] sm:$0xff]  ;;  %v2794_v6 = vld [vmem:[%s6189_s0 + $0x3a0] sm:$0xff]  ;;  %v2825_v7 = vld [vmem:[%s6189_s0 + $0x418] sm:$0xff] }
  0x23   :  { %3779 = vmatprep.subr.mxu1 %v83_v36  ;;  %3745 = vmatpush3.msra.mxu0 %v2806_v35  ;;  %v2793_v8 = vld [vmem:[%s6189_s0 + $0x398] sm:$0xff]  ;;  %v2824_v9 = vld [vmem:[%s6189_s0 + $0x410] sm:$0xff]  ;;  %v2823_v11 = vld [vmem:[%s6189_s0 + $0x408] sm:$0xff] }
  0x24   :  { %3780 = vmatpush3.msra.mxu1 %v83_v36  ;;  %3784 = vmatprep.subr.mxu0 %v2837_v37  ;;  %v2792_v10 = vld [vmem:[%s6189_s0 + $0x390] sm:$0xff]  ;;  %v2791_v12 = vld [vmem:[%s6189_s0 + $0x388] sm:$0xff]  ;;  %v2822_v15 = vld [vmem:[%s6189_s0 + $0x400] sm:$0xff] }
  0x25   :  { %3819 = vmatprep.subr.mxu1 %v2805_v38  ;;  %43 = vrot.lane.b32.xlu0 %v33_v39, %s4737_s16  ;;  %v2790_v16 = vld [vmem:[%s6189_s0 + $0x380] sm:$0xff]  ;;  %v2853_v17 = vld [vmem:[%s6189_s0 + $0x178] sm:$0xff]  ;;  %v2852_v22 = vld [vmem:[%s6189_s0 + $0x170] sm:$0xff] }
  0x26   :  { %45 = vrot.lane.b32.xlu1 %v34_v40, %s4737_s16  ;;  %v2869_v18 = vld [vmem:[%s6189_s0 + $0x4f8] sm:$0xff]  ;;  %v2868_v23 = vld [vmem:[%s6189_s0 + $0x4f0] sm:$0xff]  ;;  %v2851_v25 = vld [vmem:[%s6189_s0 + $0x168] sm:$0xff] }
  0x27   :  { %v2867_v26 = vld [vmem:[%s6189_s0 + $0x4e8] sm:$0xff]  ;;  %v2850_v27 = vld [vmem:[%s6189_s0 + $0x160] sm:$0xff]  ;;  %v2849_v29 = vld [vmem:[%s6189_s0 + $0x158] sm:$0xff] }
  0x28   :  { %v2866_v28 = vld [vmem:[%s6189_s0 + $0x4e0] sm:$0xff]  ;;  %v2865_v30 = vld [vmem:[%s6189_s0 + $0x4d8] sm:$0xff]  ;;  %v2848_v31 = vld [vmem:[%s6189_s0 + $0x150] sm:$0xff] }
  0x29   :  { %v2864_v32 = vld [vmem:[%s6189_s0 + $0x4d0] sm:$0xff]  ;;  %v2847_v33 = vld [vmem:[%s6189_s0 + $0x148] sm:$0xff]  ;;  %v2846_v35 = vld [vmem:[%s6189_s0 + $0x140] sm:$0xff] }
  0x2a   :  { %v2863_v34 = vld [vmem:[%s6189_s0 + $0x4c8] sm:$0xff]  ;;  %v2862_v36 = vld [vmem:[%s6189_s0 + $0x4c0] sm:$0xff]  ;;  %v2844_v39 = vld [vmem:[%s6189_s0 + $0x130] sm:$0xff] }
  0x2b   :  { %v2860_v40 = vld [vmem:[%s6189_s0 + $0x4b0] sm:$0xff] }
  0x74   :  { %v40_v41 = vpop.permute.xlu0 %39 }
  0x75   :  { %v65_v42 = vpop.permute.xlu1 %64  ;;  %52 = vst.msk [vmem:[#allocation2 + $0x3] sm:$0xff] %vm51_vm0, %v40_v41  ;;  %v2843_v41 = vld [vmem:[%s6189_s0 + $0x128] sm:$0xff] }
  0x76   :  { %77 = vst.msk [vmem:[#allocation2 + $0x1b] sm:$0xff] %vm51_vm0, %v65_v42  ;;  %v2859_v42 = vld [vmem:[%s6189_s0 + $0x4a8] sm:$0xff] }
  0x78   :  { %v42_v43 = vpop.permute.xlu0 %41 }
  0x79   :  { %v67_v44 = vpop.permute.xlu1 %66  ;;  %53 = vst.msk [vmem:[#allocation2 + $0xb] sm:$0xff] %vm51_vm0, %v42_v43  ;;  %v2842_v43 = vld [vmem:[%s6189_s0 + $0x120] sm:$0xff] }
  0x7a   :  { %78 = vst.msk [vmem:[#allocation2 + $0x23] sm:$0xff] %vm51_vm0, %v67_v44  ;;  %v2858_v44 = vld [vmem:[%s6189_s0 + $0x4a0] sm:$0xff] }
  0x7c   :  { %v118_v45 = vld [vmem:[#allocation2 + $0x1] sm:$0xff] }
  0x7d   :  { %v81_v46 = vld [vmem:[#allocation2] sm:$0xff]  ;;  %3746 = vmatprep.mubr.f32.mxu0 %v118_v45  ;;  %v99_v14 = vld [vmem:[#allocation2 + $0x18] sm:$0xff] }
  0x7e   :  { %3781 = vmatprep.mubr.f32.mxu1 %v81_v46  ;;  %v287_v13 = vld [vmem:[#allocation2 + $0x19] sm:$0xff]  ;;  %v456_v21 = vld [vmem:[#allocation2 + $0x2] sm:$0xff] }
  0x7f   :  { %v552_v24 = vld [vmem:[#allocation2 + $0x1a] sm:$0xff] }
  0x80   :  { %v119_v48 = vld [vmem:[#allocation2 + $0x9] sm:$0xff]  ;;  %v2841_v45 = vld [vmem:[%s6189_s0 + $0x118] sm:$0xff] }
  0x81   :  { %v82_v49 = vld [vmem:[#allocation2 + $0x8] sm:$0xff]  ;;  %3747 = vmatmul.mubr.f32.vlgmr.msra.gmra.mxu0 %v119_v48  ;;  %v100_v20 = vld [vmem:[#allocation2 + $0x20] sm:$0xff]  ;;  %v2857_v46 = vld [vmem:[%s6189_s0 + $0x498] sm:$0xff] }
  0x82   :  { %3782 = vmatmul.mubr.f32.vlgmr.msra.gmra.mxu1 %v82_v49  ;;  %3785 = vmatpush3.msra.mxu0 %v2837_v37  ;;  %v288_v19 = vld [vmem:[#allocation2 + $0x21] sm:$0xff]  ;;  %v2845_v37 = vld [vmem:[%s6189_s0 + $0x138] sm:$0xff]  ;;  %v2856_v48 = vld [vmem:[%s6189_s0 + $0x490] sm:$0xff] }
  0x83   :  { %3820 = vmatpush3.msra.mxu1 %v2805_v38  ;;  %3786 = vmatprep.subr.mxu0 %v2836_v47  ;;  %v2861_v38 = vld [vmem:[%s6189_s0 + $0x4b8] sm:$0xff]  ;;  %v2839_v49 = vld [vmem:[%s6189_s0 + $0x108] sm:$0xff] }
  0x84   :  { %3821 = vmatprep.subr.mxu1 %v2804_v50  ;;  %3787 = vmatpush3.msra.mxu0 %v2836_v47  ;;  %v2840_v47 = vld [vmem:[%s6189_s0 + $0x110] sm:$0xff] }
  0x85   :  { %3822 = vmatpush3.msra.mxu1 %v2804_v50  ;;  %3788 = vmatprep.subr.mxu0 %v2835_v51  ;;  %v2855_v50 = vld [vmem:[%s6189_s0 + $0x488] sm:$0xff] }
  0x86   :  { %3823 = vmatprep.subr.mxu1 %v2803_v52  ;;  %3789 = vmatpush3.msra.mxu0 %v2835_v51  ;;  %v2838_v51 = vld [vmem:[%s6189_s0 + $0x100] sm:$0xff] }
  0x87   :  { %3824 = vmatpush3.msra.mxu1 %v2803_v52  ;;  %3790 = vmatprep.subr.mxu0 %v2834_v53  ;;  %v2854_v52 = vld [vmem:[%s6189_s0 + $0x480] sm:$0xff] }
  0x88   :  { %3825 = vmatprep.subr.mxu1 %v2802_v54  ;;  %3791 = vmatpush3.msra.mxu0 %v2834_v53  ;;  %v2885_v53 = vld [vmem:[%s6189_s0 + $0x1f8] sm:$0xff] }
  0x89   :  { %3826 = vmatpush3.msra.mxu1 %v2802_v54  ;;  %3792 = vmatprep.subr.mxu0 %v2833_v55  ;;  %v2901_v54 = vld [vmem:[%s6189_s0 + $0x578] sm:$0xff] }
  0x8a   :  { %3827 = vmatprep.subr.mxu1 %v2801_v56  ;;  %3793 = vmatpush3.msra.mxu0 %v2833_v55  ;;  %v457_v55 = vld [vmem:[#allocation2 + $0xa] sm:$0xff] }
  0x8b   :  { %3828 = vmatpush3.msra.mxu1 %v2801_v56  ;;  %3794 = vmatprep.subr.mxu0 %v2832_v57  ;;  %v553_v56 = vld [vmem:[#allocation2 + $0x22] sm:$0xff] }
  0x8c   :  { %3829 = vmatprep.subr.mxu1 %v2800_v58  ;;  %3795 = vmatpush3.msra.mxu0 %v2832_v57  ;;  %v648_v57 = vld [vmem:[#allocation2 + $0x3] sm:$0xff] }
  0x8d   :  { %3830 = vmatpush3.msra.mxu1 %v2800_v58  ;;  %3796 = vmatprep.subr.mxu0 %v2831_v59  ;;  %v2884_v58 = vld [vmem:[%s6189_s0 + $0x1f0] sm:$0xff] }
  0x8e   :  { %3831 = vmatprep.subr.mxu1 %v2799_v60  ;;  %3797 = vmatpush3.msra.mxu0 %v2831_v59  ;;  %v2900_v59 = vld [vmem:[%s6189_s0 + $0x570] sm:$0xff] }
  0x8f   :  { %3832 = vmatpush3.msra.mxu1 %v2799_v60  ;;  %3798 = vmatprep.subr.mxu0 %v2830_v61  ;;  %v744_v60 = vld [vmem:[#allocation2 + $0x1b] sm:$0xff] }
  0x90   :  { %3833 = vmatprep.subr.mxu1 %v2798_v62  ;;  %3799 = vmatpush3.msra.mxu0 %v2830_v61  ;;  %v2883_v61 = vld [vmem:[%s6189_s0 + $0x1e8] sm:$0xff] }
  0x91   :  { %3834 = vmatpush3.msra.mxu1 %v2798_v62  ;;  %3800 = vmatprep.subr.mxu0 %v2829_v63  ;;  %v2899_v62 = vld [vmem:[%s6189_s0 + $0x568] sm:$0xff] }
  0x92   :  { %3835 = vmatprep.subr.mxu1 %v2797_v0  ;;  %3801 = vmatpush3.msra.mxu0 %v2829_v63  ;;  %v2882_v63 = vld [vmem:[%s6189_s0 + $0x1e0] sm:$0xff] }
  0x93   :  { %3836 = vmatpush3.msra.mxu1 %v2797_v0  ;;  %3802 = vmatprep.subr.mxu0 %v2828_v1  ;;  %v2898_v0 = vld [vmem:[%s6189_s0 + $0x560] sm:$0xff] }
  0x94   :  { %3837 = vmatprep.subr.mxu1 %v2796_v2  ;;  %3803 = vmatpush3.msra.mxu0 %v2828_v1  ;;  %v2881_v1 = vld [vmem:[%s6189_s0 + $0x1d8] sm:$0xff] }
  0x95   :  { %3838 = vmatpush3.msra.mxu1 %v2796_v2  ;;  %3804 = vmatprep.subr.mxu0 %v2827_v3  ;;  %v2897_v2 = vld [vmem:[%s6189_s0 + $0x558] sm:$0xff] }
  0x96   :  { %3839 = vmatprep.subr.mxu1 %v2795_v4  ;;  %3805 = vmatpush3.msra.mxu0 %v2827_v3  ;;  %v2880_v3 = vld [vmem:[%s6189_s0 + $0x1d0] sm:$0xff] }
  0x97   :  { %3840 = vmatpush3.msra.mxu1 %v2795_v4  ;;  %3806 = vmatprep.subr.mxu0 %v2826_v5  ;;  %v2896_v4 = vld [vmem:[%s6189_s0 + $0x550] sm:$0xff] }
  0x98   :  { %3841 = vmatprep.subr.mxu1 %v2794_v6  ;;  %3807 = vmatpush3.msra.mxu0 %v2826_v5  ;;  %v2879_v5 = vld [vmem:[%s6189_s0 + $0x1c8] sm:$0xff] }
  0x99   :  { %3842 = vmatpush3.msra.mxu1 %v2794_v6  ;;  %3808 = vmatprep.subr.mxu0 %v2825_v7  ;;  %v2895_v6 = vld [vmem:[%s6189_s0 + $0x548] sm:$0xff] }
  0x9a   :  { %3843 = vmatprep.subr.mxu1 %v2793_v8  ;;  %3809 = vmatpush3.msra.mxu0 %v2825_v7  ;;  %v2878_v7 = vld [vmem:[%s6189_s0 + $0x1c0] sm:$0xff] }
  0x9b   :  { %3844 = vmatpush3.msra.mxu1 %v2793_v8  ;;  %3810 = vmatprep.subr.mxu0 %v2824_v9  ;;  %v2894_v8 = vld [vmem:[%s6189_s0 + $0x540] sm:$0xff] }
  0x9c   :  { %3845 = vmatprep.subr.mxu1 %v2792_v10  ;;  %3811 = vmatpush3.msra.mxu0 %v2824_v9  ;;  %v2877_v9 = vld [vmem:[%s6189_s0 + $0x1b8] sm:$0xff] }
  0x9d   :  { %3846 = vmatpush3.msra.mxu1 %v2792_v10  ;;  %3812 = vmatprep.subr.mxu0 %v2823_v11  ;;  %v2893_v10 = vld [vmem:[%s6189_s0 + $0x538] sm:$0xff] }
  0x9e   :  { %3847 = vmatprep.subr.mxu1 %v2791_v12  ;;  %3813 = vmatpush3.msra.mxu0 %v2823_v11  ;;  %v2876_v11 = vld [vmem:[%s6189_s0 + $0x1b0] sm:$0xff] }
  0x9f   :  { %3816 = vmatprep.mubr.f32.mxu0 %v287_v13  ;;  %3848 = vmatpush3.msra.mxu1 %v2791_v12  ;;  %v2892_v12 = vld [vmem:[%s6189_s0 + $0x530] sm:$0xff]  ;;  %v2875_v13 = vld [vmem:[%s6189_s0 + $0x1a8] sm:$0xff] }
  0xa0   :  { %3851 = vmatprep.mubr.f32.mxu1 %v99_v14  ;;  %3814 = vmatprep.subr.mxu0 %v2822_v15  ;;  %v2891_v14 = vld [vmem:[%s6189_s0 + $0x528] sm:$0xff] }
  0xa1   :  { %3849 = vmatprep.subr.mxu1 %v2790_v16  ;;  %3815 = vmatpush3.msra.mxu0 %v2822_v15  ;;  %v2874_v15 = vld [vmem:[%s6189_s0 + $0x1a0] sm:$0xff] }
  0xa2   :  { %3850 = vmatpush3.msra.mxu1 %v2790_v16  ;;  %3817 = vmatmul.mubr.f32.vlgmr.msra.gmra.mxu0 %v288_v19  ;;  %v2890_v16 = vld [vmem:[%s6189_s0 + $0x520] sm:$0xff]  ;;  %v2872_v19 = vld [vmem:[%s6189_s0 + $0x190] sm:$0xff] }
  0xa3   :  { %3852 = vmatmul.mubr.f32.vlgmr.msra.gmra.mxu1 %v100_v20  ;;  %3854 = vmatprep.subr.mxu0 %v2853_v17  ;;  %v2888_v20 = vld [vmem:[%s6189_s0 + $0x510] sm:$0xff] }
  0xa4   :  { %3889 = vmatprep.subr.mxu1 %v2869_v18  ;;  %3855 = vmatpush3.msra.mxu0 %v2853_v17  ;;  %v2873_v17 = vld [vmem:[%s6189_s0 + $0x198] sm:$0xff] }
  0xa5   :  { %3886 = vmatprep.mubr.f32.mxu0 %v456_v21  ;;  %3890 = vmatpush3.msra.mxu1 %v2869_v18  ;;  %v2889_v18 = vld [vmem:[%s6189_s0 + $0x518] sm:$0xff]  ;;  %v2871_v21 = vld [vmem:[%s6189_s0 + $0x188] sm:$0xff] }
  0xa6   :  { %3921 = vmatprep.mubr.f32.mxu1 %v552_v24  ;;  %3856 = vmatprep.subr.mxu0 %v2852_v22  ;;  %v2886_v24 = vld [vmem:[%s6189_s0 + $0x500] sm:$0xff] }
  0xa7   :  { %3891 = vmatprep.subr.mxu1 %v2868_v23  ;;  %3857 = vmatpush3.msra.mxu0 %v2852_v22  ;;  %v2887_v22 = vld [vmem:[%s6189_s0 + $0x508] sm:$0xff] }
  0xa8   :  { %3892 = vmatpush3.msra.mxu1 %v2868_v23  ;;  %3858 = vmatprep.subr.mxu0 %v2851_v25  ;;  %v2870_v23 = vld [vmem:[%s6189_s0 + $0x180] sm:$0xff] }
  0xa9   :  { %3893 = vmatprep.subr.mxu1 %v2867_v26  ;;  %3859 = vmatpush3.msra.mxu0 %v2851_v25  ;;  %v44_v25 = vpop.permute.xlu0 %43 }
  0xaa   :  { %3894 = vmatpush3.msra.mxu1 %v2867_v26  ;;  %3860 = vmatprep.subr.mxu0 %v2850_v27  ;;  %v2917_v26 = vld [vmem:[%s6189_s0 + $0x278] sm:$0xff]  ;;  %54 = vst.msk [vmem:[#allocation2 + $0x33] sm:$0xff] %vm51_vm0, %v44_v25  ;;  %v2939_v25 = vld [vmem:[%s6189_s0 + $0x2a8] sm:$0xff] }
  0xab   :  { %3895 = vmatprep.subr.mxu1 %v2866_v28  ;;  %3861 = vmatpush3.msra.mxu0 %v2850_v27  ;;  %v2933_v27 = vld [vmem:[%s6189_s0 + $0x5f8] sm:$0xff] }
  0xac   :  { %3896 = vmatpush3.msra.mxu1 %v2866_v28  ;;  %3862 = vmatprep.subr.mxu0 %v2849_v29  ;;  %v46_v28 = vpop.permute.xlu1 %45 }
  0xad   :  { %3897 = vmatprep.subr.mxu1 %v2865_v30  ;;  %3863 = vmatpush3.msra.mxu0 %v2849_v29  ;;  %v649_v29 = vld [vmem:[#allocation2 + $0xb] sm:$0xff]  ;;  %55 = vst.msk [vmem:[#allocation2 + $0x3b] sm:$0xff] %vm51_vm0, %v46_v28  ;;  %v2954_v28 = vld [vmem:[%s6189_s0 + $0x620] sm:$0xff] }
  0xae   :  { %3898 = vmatpush3.msra.mxu1 %v2865_v30  ;;  %3864 = vmatprep.subr.mxu0 %v2848_v31  ;;  %v745_v30 = vld [vmem:[#allocation2 + $0x23] sm:$0xff] }
  0xaf   :  { %3899 = vmatprep.subr.mxu1 %v2864_v32  ;;  %3865 = vmatpush3.msra.mxu0 %v2848_v31  ;;  %v840_v31 = vld [vmem:[#allocation2 + $0x4] sm:$0xff] }
  0xb0   :  { %3900 = vmatpush3.msra.mxu1 %v2864_v32  ;;  %3866 = vmatprep.subr.mxu0 %v2847_v33  ;;  %v2916_v32 = vld [vmem:[%s6189_s0 + $0x270] sm:$0xff] }
  0xb1   :  { %3901 = vmatprep.subr.mxu1 %v2863_v34  ;;  %3867 = vmatpush3.msra.mxu0 %v2847_v33  ;;  %v2932_v33 = vld [vmem:[%s6189_s0 + $0x5f0] sm:$0xff] }
  0xb2   :  { %3902 = vmatpush3.msra.mxu1 %v2863_v34  ;;  %3868 = vmatprep.subr.mxu0 %v2846_v35  ;;  %v936_v34 = vld [vmem:[#allocation2 + $0x1c] sm:$0xff] }
  0xb3   :  { %3903 = vmatprep.subr.mxu1 %v2862_v36  ;;  %3869 = vmatpush3.msra.mxu0 %v2846_v35  ;;  %v2915_v35 = vld [vmem:[%s6189_s0 + $0x268] sm:$0xff] }
  0xb4   :  { %3904 = vmatpush3.msra.mxu1 %v2862_v36  ;;  %3870 = vmatprep.subr.mxu0 %v2845_v37  ;;  %v2931_v36 = vld [vmem:[%s6189_s0 + $0x5e8] sm:$0xff] }
  0xb5   :  { %3905 = vmatprep.subr.mxu1 %v2861_v38  ;;  %3871 = vmatpush3.msra.mxu0 %v2845_v37  ;;  %v2914_v37 = vld [vmem:[%s6189_s0 + $0x260] sm:$0xff] }
  0xb6   :  { %3906 = vmatpush3.msra.mxu1 %v2861_v38  ;;  %3872 = vmatprep.subr.mxu0 %v2844_v39  ;;  %v2930_v38 = vld [vmem:[%s6189_s0 + $0x5e0] sm:$0xff] }
  0xb7   :  { %3907 = vmatprep.subr.mxu1 %v2860_v40  ;;  %3873 = vmatpush3.msra.mxu0 %v2844_v39  ;;  %v2913_v39 = vld [vmem:[%s6189_s0 + $0x258] sm:$0xff] }
  0xb8   :  { %3908 = vmatpush3.msra.mxu1 %v2860_v40  ;;  %3874 = vmatprep.subr.mxu0 %v2843_v41  ;;  %v2929_v40 = vld [vmem:[%s6189_s0 + $0x5d8] sm:$0xff] }
  0xb9   :  { %3909 = vmatprep.subr.mxu1 %v2859_v42  ;;  %3875 = vmatpush3.msra.mxu0 %v2843_v41  ;;  %v2912_v41 = vld [vmem:[%s6189_s0 + $0x250] sm:$0xff] }
  0xba   :  { %3910 = vmatpush3.msra.mxu1 %v2859_v42  ;;  %3876 = vmatprep.subr.mxu0 %v2842_v43  ;;  %v2928_v42 = vld [vmem:[%s6189_s0 + $0x5d0] sm:$0xff] }
  0xbb   :  { %3911 = vmatprep.subr.mxu1 %v2858_v44  ;;  %3877 = vmatpush3.msra.mxu0 %v2842_v43  ;;  %v2911_v43 = vld [vmem:[%s6189_s0 + $0x248] sm:$0xff] }
  0xbc   :  { %3912 = vmatpush3.msra.mxu1 %v2858_v44  ;;  %3878 = vmatprep.subr.mxu0 %v2841_v45  ;;  %v2927_v44 = vld [vmem:[%s6189_s0 + $0x5c8] sm:$0xff] }
  0xbd   :  { %3913 = vmatprep.subr.mxu1 %v2857_v46  ;;  %3879 = vmatpush3.msra.mxu0 %v2841_v45  ;;  %v2910_v45 = vld [vmem:[%s6189_s0 + $0x240] sm:$0xff] }
  0xbe   :  { %3914 = vmatpush3.msra.mxu1 %v2857_v46  ;;  %3880 = vmatprep.subr.mxu0 %v2840_v47  ;;  %v2926_v46 = vld [vmem:[%s6189_s0 + $0x5c0] sm:$0xff] }
  0xbf   :  { %3915 = vmatprep.subr.mxu1 %v2856_v48  ;;  %3881 = vmatpush3.msra.mxu0 %v2840_v47  ;;  %v2909_v47 = vld [vmem:[%s6189_s0 + $0x238] sm:$0xff] }
  0xc0   :  { %3916 = vmatpush3.msra.mxu1 %v2856_v48  ;;  %3882 = vmatprep.subr.mxu0 %v2839_v49  ;;  %v2925_v48 = vld [vmem:[%s6189_s0 + $0x5b8] sm:$0xff] }
  0xc1   :  { %3917 = vmatprep.subr.mxu1 %v2855_v50  ;;  %3883 = vmatpush3.msra.mxu0 %v2839_v49  ;;  %v2908_v49 = vld [vmem:[%s6189_s0 + $0x230] sm:$0xff] }
  0xc2   :  { %3918 = vmatpush3.msra.mxu1 %v2855_v50  ;;  %3884 = vmatprep.subr.mxu0 %v2838_v51  ;;  %v2924_v50 = vld [vmem:[%s6189_s0 + $0x5b0] sm:$0xff] }
  0xc3   :  { %3919 = vmatprep.subr.mxu1 %v2854_v52  ;;  %3885 = vmatpush3.msra.mxu0 %v2838_v51  ;;  %v2907_v51 = vld [vmem:[%s6189_s0 + $0x228] sm:$0xff] }
  0xc4   :  { %3920 = vmatpush3.msra.mxu1 %v2854_v52  ;;  %3887 = vmatmul.mubr.f32.vlgmr.msra.gmra.mxu0 %v457_v55  ;;  %v2923_v52 = vld [vmem:[%s6189_s0 + $0x5a8] sm:$0xff]  ;;  %v2905_v55 = vld [vmem:[%s6189_s0 + $0x218] sm:$0xff] }
  0xc5   :  { %3922 = vmatmul.mubr.f32.vlgmr.msra.gmra.mxu1 %v553_v56  ;;  %3924 = vmatprep.subr.mxu0 %v2885_v53  ;;  %v2921_v56 = vld [vmem:[%s6189_s0 + $0x598] sm:$0xff] }
  0xc6   :  { %3959 = vmatprep.subr.mxu1 %v2901_v54  ;;  %3925 = vmatpush3.msra.mxu0 %v2885_v53  ;;  %v2906_v53 = vld [vmem:[%s6189_s0 + $0x220] sm:$0xff] }
  0xc7   :  { %3956 = vmatprep.mubr.f32.mxu0 %v648_v57  ;;  %3960 = vmatpush3.msra.mxu1 %v2901_v54  ;;  %v2922_v54 = vld [vmem:[%s6189_s0 + $0x5a0] sm:$0xff]  ;;  %v2904_v57 = vld [vmem:[%s6189_s0 + $0x210] sm:$0xff] }
  0xc8   :  { %3991 = vmatprep.mubr.f32.mxu1 %v744_v60  ;;  %3926 = vmatprep.subr.mxu0 %v2884_v58  ;;  %v2919_v60 = vld [vmem:[%s6189_s0 + $0x588] sm:$0xff] }
  0xc9   :  { %3961 = vmatprep.subr.mxu1 %v2900_v59  ;;  %3927 = vmatpush3.msra.mxu0 %v2884_v58  ;;  %v2920_v58 = vld [vmem:[%s6189_s0 + $0x590] sm:$0xff] }
  0xca   :  { %3962 = vmatpush3.msra.mxu1 %v2900_v59  ;;  %3928 = vmatprep.subr.mxu0 %v2883_v61  ;;  %v2903_v59 = vld [vmem:[%s6189_s0 + $0x208] sm:$0xff] }
  0xcb   :  { %3963 = vmatprep.subr.mxu1 %v2899_v62  ;;  %3929 = vmatpush3.msra.mxu0 %v2883_v61  ;;  %v2902_v61 = vld [vmem:[%s6189_s0 + $0x200] sm:$0xff] }
  0xcc   :  { %3964 = vmatpush3.msra.mxu1 %v2899_v62  ;;  %3930 = vmatprep.subr.mxu0 %v2882_v63  ;;  %v2918_v62 = vld [vmem:[%s6189_s0 + $0x580] sm:$0xff] }
  0xcd   :  { %3965 = vmatprep.subr.mxu1 %v2898_v0  ;;  %3931 = vmatpush3.msra.mxu0 %v2882_v63  ;;  %v2949_v63 = vld [vmem:[%s6189_s0 + $0x2f8] sm:$0xff] }
  0xce   :  { %3966 = vmatpush3.msra.mxu1 %v2898_v0  ;;  %3932 = vmatprep.subr.mxu0 %v2881_v1  ;;  %v2965_v0 = vld [vmem:[%s6189_s0 + $0x678] sm:$0xff] }
  0xcf   :  { %3967 = vmatprep.subr.mxu1 %v2897_v2  ;;  %3933 = vmatpush3.msra.mxu0 %v2881_v1  ;;  %v841_v1 = vld [vmem:[#allocation2 + $0xc] sm:$0xff] }
  0xd0   :  { %3968 = vmatpush3.msra.mxu1 %v2897_v2  ;;  %3934 = vmatprep.subr.mxu0 %v2880_v3  ;;  %v937_v2 = vld [vmem:[#allocation2 + $0x24] sm:$0xff] }
  0xd1   :  { %3969 = vmatprep.subr.mxu1 %v2896_v4  ;;  %3935 = vmatpush3.msra.mxu0 %v2880_v3  ;;  %v1032_v3 = vld [vmem:[#allocation2 + $0x5] sm:$0xff] }
  0xd2   :  { %3970 = vmatpush3.msra.mxu1 %v2896_v4  ;;  %3936 = vmatprep.subr.mxu0 %v2879_v5  ;;  %v2948_v4 = vld [vmem:[%s6189_s0 + $0x2f0] sm:$0xff] }
  0xd3   :  { %3971 = vmatprep.subr.mxu1 %v2895_v6  ;;  %3937 = vmatpush3.msra.mxu0 %v2879_v5  ;;  %v2964_v5 = vld [vmem:[%s6189_s0 + $0x670] sm:$0xff] }
  0xd4   :  { %3972 = vmatpush3.msra.mxu1 %v2895_v6  ;;  %3938 = vmatprep.subr.mxu0 %v2878_v7  ;;  %v1128_v6 = vld [vmem:[#allocation2 + $0x1d] sm:$0xff] }
  0xd5   :  { %3973 = vmatprep.subr.mxu1 %v2894_v8  ;;  %3939 = vmatpush3.msra.mxu0 %v2878_v7  ;;  %v58_v7 = vld [vmem:[%s6191_s2 + $0x10] sm:$0xff] }
  0xd6   :  { %3974 = vmatpush3.msra.mxu1 %v2894_v8  ;;  %3940 = vmatprep.subr.mxu0 %v2877_v9  ;;  %v2947_v8 = vld [vmem:[%s6189_s0 + $0x2e8] sm:$0xff] }
  0xd7   :  { %3975 = vmatprep.subr.mxu1 %v2893_v10  ;;  %3941 = vmatpush3.msra.mxu0 %v2877_v9  ;;  %v2963_v9 = vld [vmem:[%s6189_s0 + $0x668] sm:$0xff] }
  0xd8   :  { %3976 = vmatpush3.msra.mxu1 %v2893_v10  ;;  %3942 = vmatprep.subr.mxu0 %v2876_v11  ;;  %v59_v10 = vld [vmem:[%s6191_s2 + $0x18] sm:$0xff] }
  0xd9   :  { %3977 = vmatprep.subr.mxu1 %v2892_v12  ;;  %3943 = vmatpush3.msra.mxu0 %v2876_v11  ;;  %v2946_v11 = vld [vmem:[%s6189_s0 + $0x2e0] sm:$0xff] }
  0xda   :  { %3978 = vmatpush3.msra.mxu1 %v2892_v12  ;;  %3944 = vmatprep.subr.mxu0 %v2875_v13  ;;  %v2962_v12 = vld [vmem:[%s6189_s0 + $0x660] sm:$0xff] }
  0xdb   :  { %3979 = vmatprep.subr.mxu1 %v2891_v14  ;;  %3945 = vmatpush3.msra.mxu0 %v2875_v13  ;;  %v2945_v13 = vld [vmem:[%s6189_s0 + $0x2d8] sm:$0xff] }
  0xdc   :  { %3980 = vmatpush3.msra.mxu1 %v2891_v14  ;;  %3946 = vmatprep.subr.mxu0 %v2874_v15  ;;  %v2961_v14 = vld [vmem:[%s6189_s0 + $0x658] sm:$0xff] }
  0xdd   :  { %3981 = vmatprep.subr.mxu1 %v2890_v16  ;;  %3947 = vmatpush3.msra.mxu0 %v2874_v15  ;;  %v2944_v15 = vld [vmem:[%s6189_s0 + $0x2d0] sm:$0xff] }
  0xde   :  { %3982 = vmatpush3.msra.mxu1 %v2890_v16  ;;  %3948 = vmatprep.subr.mxu0 %v2873_v17  ;;  %v2960_v16 = vld [vmem:[%s6189_s0 + $0x650] sm:$0xff] }
  0xdf   :  { %3983 = vmatprep.subr.mxu1 %v2889_v18  ;;  %3949 = vmatpush3.msra.mxu0 %v2873_v17  ;;  %v2943_v17 = vld [vmem:[%s6189_s0 + $0x2c8] sm:$0xff] }
  0xe0   :  { %3984 = vmatpush3.msra.mxu1 %v2889_v18  ;;  %3950 = vmatprep.subr.mxu0 %v2872_v19  ;;  %v2959_v18 = vld [vmem:[%s6189_s0 + $0x648] sm:$0xff] }
  0xe1   :  { %3985 = vmatprep.subr.mxu1 %v2888_v20  ;;  %3951 = vmatpush3.msra.mxu0 %v2872_v19  ;;  %v2942_v19 = vld [vmem:[%s6189_s0 + $0x2c0] sm:$0xff] }
  0xe2   :  { %3986 = vmatpush3.msra.mxu1 %v2888_v20  ;;  %3952 = vmatprep.subr.mxu0 %v2871_v21  ;;  %v2958_v20 = vld [vmem:[%s6189_s0 + $0x640] sm:$0xff] }
  0xe3   :  { %3987 = vmatprep.subr.mxu1 %v2887_v22  ;;  %3953 = vmatpush3.msra.mxu0 %v2871_v21  ;;  %v2941_v21 = vld [vmem:[%s6189_s0 + $0x2b8] sm:$0xff] }
  0xe4   :  { %3988 = vmatpush3.msra.mxu1 %v2887_v22  ;;  %3954 = vmatprep.subr.mxu0 %v2870_v23  ;;  %v2957_v22 = vld [vmem:[%s6189_s0 + $0x638] sm:$0xff] }
  0xe5   :  { %3989 = vmatprep.subr.mxu1 %v2886_v24  ;;  %3955 = vmatpush3.msra.mxu0 %v2870_v23  ;;  %v2940_v23 = vld [vmem:[%s6189_s0 + $0x2b0] sm:$0xff] }
  0xe6   :  { %3990 = vmatpush3.msra.mxu1 %v2886_v24  ;;  %3957 = vmatmul.mubr.f32.vlgmr.msra.gmra.mxu0 %v649_v29  ;;  %v2956_v24 = vld [vmem:[%s6189_s0 + $0x630] sm:$0xff]  ;;  %v2937_v29 = vld [vmem:[%s6189_s0 + $0x298] sm:$0xff] }
  0xe7   :  { %3992 = vmatmul.mubr.f32.vlgmr.msra.gmra.mxu1 %v745_v30  ;;  %3994 = vmatprep.subr.mxu0 %v2917_v26  ;;  %v2953_v30 = vld [vmem:[%s6189_s0 + $0x618] sm:$0xff] }
  0xe8   :  { %4029 = vmatprep.subr.mxu1 %v2933_v27  ;;  %3995 = vmatpush3.msra.mxu0 %v2917_v26  ;;  %v2955_v26 = vld [vmem:[%s6189_s0 + $0x628] sm:$0xff] }
  0xe9   :  { %4026 = vmatprep.mubr.f32.mxu0 %v840_v31  ;;  %4030 = vmatpush3.msra.mxu1 %v2933_v27  ;;  %v2938_v27 = vld [vmem:[%s6189_s0 + $0x2a0] sm:$0xff]  ;;  %v2936_v31 = vld [vmem:[%s6189_s0 + $0x290] sm:$0xff] }
  0xea   :  { %4061 = vmatprep.mubr.f32.mxu1 %v936_v34  ;;  %3996 = vmatprep.subr.mxu0 %v2916_v32  ;;  %v2951_v34 = vld [vmem:[%s6189_s0 + $0x608] sm:$0xff] }
  0xeb   :  { %4031 = vmatprep.subr.mxu1 %v2932_v33  ;;  %3997 = vmatpush3.msra.mxu0 %v2916_v32  ;;  %v2952_v32 = vld [vmem:[%s6189_s0 + $0x610] sm:$0xff] }
  0xec   :  { %4032 = vmatpush3.msra.mxu1 %v2932_v33  ;;  %3998 = vmatprep.subr.mxu0 %v2915_v35  ;;  %v2935_v33 = vld [vmem:[%s6189_s0 + $0x288] sm:$0xff] }
  0xed   :  { %4033 = vmatprep.subr.mxu1 %v2931_v36  ;;  %3999 = vmatpush3.msra.mxu0 %v2915_v35  ;;  %v2934_v35 = vld [vmem:[%s6189_s0 + $0x280] sm:$0xff] }
  0xee   :  { %4034 = vmatpush3.msra.mxu1 %v2931_v36  ;;  %4000 = vmatprep.subr.mxu0 %v2914_v37  ;;  %v2950_v36 = vld [vmem:[%s6189_s0 + $0x600] sm:$0xff] }
  0xef   :  { %4035 = vmatprep.subr.mxu1 %v2930_v38  ;;  %4001 = vmatpush3.msra.mxu0 %v2914_v37  ;;  %v2981_v37 = vld [vmem:[%s6189_s0 + $0x378] sm:$0xff] }
  0xf0   :  { %4036 = vmatpush3.msra.mxu1 %v2930_v38  ;;  %4002 = vmatprep.subr.mxu0 %v2913_v39  ;;  %v2997_v38 = vld [vmem:[%s6189_s0 + $0x6f8] sm:$0xff] }
  0xf1   :  { %4037 = vmatprep.subr.mxu1 %v2929_v40  ;;  %4003 = vmatpush3.msra.mxu0 %v2913_v39  ;;  %v1033_v39 = vld [vmem:[#allocation2 + $0xd] sm:$0xff] }
  0xf2   :  { %4038 = vmatpush3.msra.mxu1 %v2929_v40  ;;  %4004 = vmatprep.subr.mxu0 %v2912_v41  ;;  %v1129_v40 = vld [vmem:[#allocation2 + $0x25] sm:$0xff] }
  0xf3   :  { %4039 = vmatprep.subr.mxu1 %v2928_v42  ;;  %4005 = vmatpush3.msra.mxu0 %v2912_v41  ;;  %v1224_v41 = vld [vmem:[#allocation2 + $0x6] sm:$0xff] }
  0xf4   :  { %4040 = vmatpush3.msra.mxu1 %v2928_v42  ;;  %4006 = vmatprep.subr.mxu0 %v2911_v43  ;;  %v2980_v42 = vld [vmem:[%s6189_s0 + $0x370] sm:$0xff] }
  0xf5   :  { %4041 = vmatprep.subr.mxu1 %v2927_v44  ;;  %4007 = vmatpush3.msra.mxu0 %v2911_v43  ;;  %v2996_v43 = vld [vmem:[%s6189_s0 + $0x6f0] sm:$0xff] }
  0xf6   :  { %4042 = vmatpush3.msra.mxu1 %v2927_v44  ;;  %4008 = vmatprep.subr.mxu0 %v2910_v45  ;;  %v1320_v44 = vld [vmem:[#allocation2 + $0x1e] sm:$0xff] }
  0xf7   :  { %4043 = vmatprep.subr.mxu1 %v2926_v46  ;;  %4009 = vmatpush3.msra.mxu0 %v2910_v45  ;;  %v2979_v45 = vld [vmem:[%s6189_s0 + $0x368] sm:$0xff] }
  0xf8   :  { %4044 = vmatpush3.msra.mxu1 %v2926_v46  ;;  %4010 = vmatprep.subr.mxu0 %v2909_v47  ;;  %v2995_v46 = vld [vmem:[%s6189_s0 + $0x6e8] sm:$0xff] }
  0xf9   :  { %4045 = vmatprep.subr.mxu1 %v2925_v48  ;;  %4011 = vmatpush3.msra.mxu0 %v2909_v47  ;;  %v2978_v47 = vld [vmem:[%s6189_s0 + $0x360] sm:$0xff] }
  0xfa   :  { %4046 = vmatpush3.msra.mxu1 %v2925_v48  ;;  %4012 = vmatprep.subr.mxu0 %v2908_v49  ;;  %v2994_v48 = vld [vmem:[%s6189_s0 + $0x6e0] sm:$0xff] }
  0xfb   :  { %4047 = vmatprep.subr.mxu1 %v2924_v50  ;;  %4013 = vmatpush3.msra.mxu0 %v2908_v49  ;;  %v2977_v49 = vld [vmem:[%s6189_s0 + $0x358] sm:$0xff] }
  0xfc   :  { %4048 = vmatpush3.msra.mxu1 %v2924_v50  ;;  %4014 = vmatprep.subr.mxu0 %v2907_v51  ;;  %v2993_v50 = vld [vmem:[%s6189_s0 + $0x6d8] sm:$0xff] }
  0xfd   :  { %4049 = vmatprep.subr.mxu1 %v2923_v52  ;;  %4015 = vmatpush3.msra.mxu0 %v2907_v51  ;;  %v2976_v51 = vld [vmem:[%s6189_s0 + $0x350] sm:$0xff] }
  0xfe   :  { %4050 = vmatpush3.msra.mxu1 %v2923_v52  ;;  %4016 = vmatprep.subr.mxu0 %v2906_v53  ;;  %v2992_v52 = vld [vmem:[%s6189_s0 + $0x6d0] sm:$0xff] }
  0xff   :  { %4051 = vmatprep.subr.mxu1 %v2922_v54  ;;  %4017 = vmatpush3.msra.mxu0 %v2906_v53  ;;  %v2975_v53 = vld [vmem:[%s6189_s0 + $0x348] sm:$0xff] }
 0x100   :  { %4052 = vmatpush3.msra.mxu1 %v2922_v54  ;;  %4018 = vmatprep.subr.mxu0 %v2905_v55  ;;  %v2991_v54 = vld [vmem:[%s6189_s0 + $0x6c8] sm:$0xff] }
 0x101   :  { %4053 = vmatprep.subr.mxu1 %v2921_v56  ;;  %4019 = vmatpush3.msra.mxu0 %v2905_v55  ;;  %v2974_v55 = vld [vmem:[%s6189_s0 + $0x340] sm:$0xff] }
 0x102   :  { %4054 = vmatpush3.msra.mxu1 %v2921_v56  ;;  %4020 = vmatprep.subr.mxu0 %v2904_v57  ;;  %v2990_v56 = vld [vmem:[%s6189_s0 + $0x6c0] sm:$0xff] }
 0x103   :  { %4055 = vmatprep.subr.mxu1 %v2920_v58  ;;  %4021 = vmatpush3.msra.mxu0 %v2904_v57  ;;  %v2973_v57 = vld [vmem:[%s6189_s0 + $0x338] sm:$0xff] }
 0x104   :  { %4056 = vmatpush3.msra.mxu1 %v2920_v58  ;;  %4022 = vmatprep.subr.mxu0 %v2903_v59  ;;  %v2989_v58 = vld [vmem:[%s6189_s0 + $0x6b8] sm:$0xff] }
 0x105   :  { %4057 = vmatprep.subr.mxu1 %v2919_v60  ;;  %4023 = vmatpush3.msra.mxu0 %v2903_v59  ;;  %v2972_v59 = vld [vmem:[%s6189_s0 + $0x330] sm:$0xff] }
 0x106   :  { %4058 = vmatpush3.msra.mxu1 %v2919_v60  ;;  %4024 = vmatprep.subr.mxu0 %v2902_v61  ;;  %v2988_v60 = vld [vmem:[%s6189_s0 + $0x6b0] sm:$0xff] }
 0x107   :  { %4059 = vmatprep.subr.mxu1 %v2918_v62  ;;  %4025 = vmatpush3.msra.mxu0 %v2902_v61  ;;  %v2971_v61 = vld [vmem:[%s6189_s0 + $0x328] sm:$0xff] }
 0x108   :  { %4060 = vmatpush3.msra.mxu1 %v2918_v62  ;;  %4027 = vmatmul.mubr.f32.vlgmr.msra.gmra.mxu0 %v841_v1  ;;  %v2987_v62 = vld [vmem:[%s6189_s0 + $0x6a8] sm:$0xff]  ;;  %v2969_v1 = vld [vmem:[%s6189_s0 + $0x318] sm:$0xff] }
 0x109   :  { %4062 = vmatmul.mubr.f32.vlgmr.msra.gmra.mxu1 %v937_v2  ;;  %4064 = vmatprep.subr.mxu0 %v2949_v63  ;;  %v2985_v2 = vld [vmem:[%s6189_s0 + $0x698] sm:$0xff] }
 0x10a   :  { %4099 = vmatprep.subr.mxu1 %v2965_v0  ;;  %4065 = vmatpush3.msra.mxu0 %v2949_v63  ;;  %v2970_v63 = vld [vmem:[%s6189_s0 + $0x320] sm:$0xff] }
 0x10b   :  { %4096 = vmatprep.mubr.f32.mxu0 %v1032_v3  ;;  %4100 = vmatpush3.msra.mxu1 %v2965_v0  ;;  %v2986_v0 = vld [vmem:[%s6189_s0 + $0x6a0] sm:$0xff]  ;;  %v2968_v3 = vld [vmem:[%s6189_s0 + $0x310] sm:$0xff] }
 0x10c   :  { %4131 = vmatprep.mubr.f32.mxu1 %v1128_v6  ;;  %4066 = vmatprep.subr.mxu0 %v2948_v4  ;;  %v2983_v6 = vld [vmem:[%s6189_s0 + $0x688] sm:$0xff] }
 0x10d   :  { %4101 = vmatprep.subr.mxu1 %v2964_v5  ;;  %4067 = vmatpush3.msra.mxu0 %v2948_v4  ;;  %v2984_v4 = vld [vmem:[%s6189_s0 + $0x690] sm:$0xff] }
 0x10e   :  { %4102 = vmatpush3.msra.mxu1 %v2964_v5  ;;  %68 = vrot.lane.b32.xlu0 %v58_v7, %s4737_s16  ;;  %v2967_v5 = vld [vmem:[%s6189_s0 + $0x308] sm:$0xff]  ;;  %v2966_v7 = vld [vmem:[%s6189_s0 + $0x300] sm:$0xff] }
 0x10f   :  { %4068 = vmatprep.subr.mxu0 %v2947_v8  ;;  %4103 = vmatprep.subr.mxu1 %v2963_v9 }
 0x110   :  { %70 = vrot.lane.b32.xlu1 %v59_v10, %s4737_s16  ;;  %4069 = vmatpush3.msra.mxu0 %v2947_v8  ;;  %v2982_v8 = vld [vmem:[%s6189_s0 + $0x680] sm:$0xff]  ;;  %v1451_v10 = vld [vmem:[%s6189_s0 + $0x78] sm:$0xff] }
 0x111   :  { %4104 = vmatpush3.msra.mxu1 %v2963_v9  ;;  %4070 = vmatprep.subr.mxu0 %v2946_v11  ;;  %v3031_v9 = vld [vmem:[%s6189_s0 + $0xf8] sm:$0xff] }
 0x112   :  { %4105 = vmatprep.subr.mxu1 %v2962_v12  ;;  %4071 = vmatpush3.msra.mxu0 %v2946_v11  ;;  %v1225_v11 = vld [vmem:[#allocation2 + $0xe] sm:$0xff] }
 0x113   :  { %4106 = vmatpush3.msra.mxu1 %v2962_v12  ;;  %4072 = vmatprep.subr.mxu0 %v2945_v13  ;;  %v1321_v12 = vld [vmem:[#allocation2 + $0x26] sm:$0xff] }
 0x114   :  { %4107 = vmatprep.subr.mxu1 %v2961_v14  ;;  %4073 = vmatpush3.msra.mxu0 %v2945_v13  ;;  %v3030_v13 = vld [vmem:[%s6189_s0 + $0xf0] sm:$0xff] }
 0x115   :  { %4108 = vmatpush3.msra.mxu1 %v2961_v14  ;;  %4074 = vmatprep.subr.mxu0 %v2944_v15  ;;  %v1450_v14 = vld [vmem:[%s6189_s0 + $0x70] sm:$0xff] }
 0x116   :  { %4109 = vmatprep.subr.mxu1 %v2960_v16  ;;  %4075 = vmatpush3.msra.mxu0 %v2944_v15  ;;  %v3029_v15 = vld [vmem:[%s6189_s0 + $0xe8] sm:$0xff] }
 0x117   :  { %4110 = vmatpush3.msra.mxu1 %v2960_v16  ;;  %4076 = vmatprep.subr.mxu0 %v2943_v17  ;;  %v1449_v16 = vld [vmem:[%s6189_s0 + $0x68] sm:$0xff] }
 0x118   :  { %4111 = vmatprep.subr.mxu1 %v2959_v18  ;;  %4077 = vmatpush3.msra.mxu0 %v2943_v17  ;;  %v3028_v17 = vld [vmem:[%s6189_s0 + $0xe0] sm:$0xff] }
 0x119   :  { %4112 = vmatpush3.msra.mxu1 %v2959_v18  ;;  %4078 = vmatprep.subr.mxu0 %v2942_v19  ;;  %v1448_v18 = vld [vmem:[%s6189_s0 + $0x60] sm:$0xff] }
 0x11a   :  { %4113 = vmatprep.subr.mxu1 %v2958_v20  ;;  %4079 = vmatpush3.msra.mxu0 %v2942_v19  ;;  %v3027_v19 = vld [vmem:[%s6189_s0 + $0xd8] sm:$0xff] }
 0x11b   :  { %4114 = vmatpush3.msra.mxu1 %v2958_v20  ;;  %4080 = vmatprep.subr.mxu0 %v2941_v21  ;;  %v1447_v20 = vld [vmem:[%s6189_s0 + $0x58] sm:$0xff] }
 0x11c   :  { %4115 = vmatprep.subr.mxu1 %v2957_v22  ;;  %4081 = vmatpush3.msra.mxu0 %v2941_v21  ;;  %v3026_v21 = vld [vmem:[%s6189_s0 + $0xd0] sm:$0xff] }
 0x11d   :  { %4116 = vmatpush3.msra.mxu1 %v2957_v22  ;;  %4082 = vmatprep.subr.mxu0 %v2940_v23  ;;  %v1446_v22 = vld [vmem:[%s6189_s0 + $0x50] sm:$0xff] }
 0x11e   :  { %4117 = vmatprep.subr.mxu1 %v2956_v24  ;;  %4083 = vmatpush3.msra.mxu0 %v2940_v23  ;;  %v3025_v23 = vld [vmem:[%s6189_s0 + $0xc8] sm:$0xff] }
 0x11f   :  { %4118 = vmatpush3.msra.mxu1 %v2956_v24  ;;  %4084 = vmatprep.subr.mxu0 %v2939_v25  ;;  %v1445_v24 = vld [vmem:[%s6189_s0 + $0x48] sm:$0xff] }
 0x120   :  { %4119 = vmatprep.subr.mxu1 %v2955_v26  ;;  %4085 = vmatpush3.msra.mxu0 %v2939_v25  ;;  %v3024_v25 = vld [vmem:[%s6189_s0 + $0xc0] sm:$0xff] }
 0x121   :  { %4120 = vmatpush3.msra.mxu1 %v2955_v26  ;;  %4086 = vmatprep.subr.mxu0 %v2938_v27  ;;  %v1444_v26 = vld [vmem:[%s6189_s0 + $0x40] sm:$0xff] }
 0x122   :  { %4121 = vmatprep.subr.mxu1 %v2954_v28  ;;  %4087 = vmatpush3.msra.mxu0 %v2938_v27  ;;  %v3023_v27 = vld [vmem:[%s6189_s0 + $0xb8] sm:$0xff] }
 0x123   :  { %4122 = vmatpush3.msra.mxu1 %v2954_v28  ;;  %4088 = vmatprep.subr.mxu0 %v2937_v29  ;;  %v1443_v28 = vld [vmem:[%s6189_s0 + $0x38] sm:$0xff] }
 0x124   :  { %4123 = vmatprep.subr.mxu1 %v2953_v30  ;;  %4089 = vmatpush3.msra.mxu0 %v2937_v29  ;;  %v3022_v29 = vld [vmem:[%s6189_s0 + $0xb0] sm:$0xff] }
 0x125   :  { %4124 = vmatpush3.msra.mxu1 %v2953_v30  ;;  %4090 = vmatprep.subr.mxu0 %v2936_v31  ;;  %v1442_v30 = vld [vmem:[%s6189_s0 + $0x30] sm:$0xff] }
 0x126   :  { %4125 = vmatprep.subr.mxu1 %v2952_v32  ;;  %4091 = vmatpush3.msra.mxu0 %v2936_v31  ;;  %v3021_v31 = vld [vmem:[%s6189_s0 + $0xa8] sm:$0xff] }
 0x127   :  { %4126 = vmatpush3.msra.mxu1 %v2952_v32  ;;  %4092 = vmatprep.subr.mxu0 %v2935_v33  ;;  %v1441_v32 = vld [vmem:[%s6189_s0 + $0x28] sm:$0xff] }
 0x128   :  { %4127 = vmatprep.subr.mxu1 %v2951_v34  ;;  %4093 = vmatpush3.msra.mxu0 %v2935_v33  ;;  %v3020_v33 = vld [vmem:[%s6189_s0 + $0xa0] sm:$0xff] }
 0x129   :  { %4128 = vmatpush3.msra.mxu1 %v2951_v34  ;;  %4094 = vmatprep.subr.mxu0 %v2934_v35  ;;  %v1440_v34 = vld [vmem:[%s6189_s0 + $0x20] sm:$0xff] }
 0x12a   :  { %4129 = vmatprep.subr.mxu1 %v2950_v36  ;;  %4095 = vmatpush3.msra.mxu0 %v2934_v35  ;;  %v3019_v35 = vld [vmem:[%s6189_s0 + $0x98] sm:$0xff] }
 0x12b   :  { %4130 = vmatpush3.msra.mxu1 %v2950_v36  ;;  %4097 = vmatmul.mubr.f32.vlgmr.msra.gmra.mxu0 %v1033_v39  ;;  %v1439_v36 = vld [vmem:[%s6189_s0 + $0x18] sm:$0xff]  ;;  %v3017_v39 = vld [vmem:[%s6189_s0 + $0x88] sm:$0xff] }
 0x12c   :  { %4132 = vmatmul.mubr.f32.vlgmr.msra.gmra.mxu1 %v1129_v40  ;;  %4134 = vmatprep.subr.mxu0 %v2981_v37  ;;  %v1437_v40 = vld [vmem:[%s6189_s0 + $0x8] sm:$0xff] }
 0x12d   :  { %4169 = vmatprep.subr.mxu1 %v2997_v38  ;;  %4135 = vmatpush3.msra.mxu0 %v2981_v37  ;;  %v3018_v37 = vld [vmem:[%s6189_s0 + $0x90] sm:$0xff] }
 0x12e   :  { %4166 = vmatprep.mubr.f32.mxu0 %v1224_v41  ;;  %4170 = vmatpush3.msra.mxu1 %v2997_v38  ;;  %v1438_v38 = vld [vmem:[%s6189_s0 + $0x10] sm:$0xff]  ;;  %v3016_v41 = vld [vmem:[%s6189_s0 + $0x80] sm:$0xff] }
 0x12f   :  { %4201 = vmatprep.mubr.f32.mxu1 %v1320_v44  ;;  %4136 = vmatprep.subr.mxu0 %v2980_v42  ;;  %v1434_v44 = vld [vmem:[#allocation2 + $0x30] sm:$0xff] }
 0x130   :  { %4171 = vmatprep.subr.mxu1 %v2996_v43  ;;  %4137 = vmatpush3.msra.mxu0 %v2980_v42  ;;  %v1436_v42 = vld [vmem:[%s6189_s0] sm:$0xff] }
 0x131   :  { %4172 = vmatpush3.msra.mxu1 %v2996_v43  ;;  %4138 = vmatprep.subr.mxu0 %v2979_v45  ;;  %v1471_v43 = vld [vmem:[#allocation2 + $0x31] sm:$0xff] }
 0x132   :  { %4173 = vmatprep.subr.mxu1 %v2995_v46  ;;  %4139 = vmatpush3.msra.mxu0 %v2979_v45  ;;  %v1472_v45 = vld [vmem:[#allocation2 + $0x39] sm:$0xff] }
 0x133   :  { %4174 = vmatpush3.msra.mxu1 %v2995_v46  ;;  %4140 = vmatprep.subr.mxu0 %v2978_v47  ;;  %v1435_v46 = vld [vmem:[#allocation2 + $0x38] sm:$0xff] }
 0x134   :  { %4175 = vmatprep.subr.mxu1 %v2994_v48  ;;  %4141 = vmatpush3.msra.mxu0 %v2978_v47  ;;  %v3047_v47 = vld [vmem:[%s6189_s0 + $0x478] sm:$0xff] }
 0x135   :  { %4176 = vmatpush3.msra.mxu1 %v2994_v48  ;;  %4142 = vmatprep.subr.mxu0 %v2977_v49  ;;  %v3015_v48 = vld [vmem:[%s6189_s0 + $0x3f8] sm:$0xff] }
 0x136   :  { %4177 = vmatprep.subr.mxu1 %v2993_v50  ;;  %4143 = vmatpush3.msra.mxu0 %v2977_v49  ;;  %v3046_v49 = vld [vmem:[%s6189_s0 + $0x470] sm:$0xff] }
 0x137   :  { %4178 = vmatpush3.msra.mxu1 %v2993_v50  ;;  %4144 = vmatprep.subr.mxu0 %v2976_v51  ;;  %v3014_v50 = vld [vmem:[%s6189_s0 + $0x3f0] sm:$0xff] }
 0x138   :  { %4179 = vmatprep.subr.mxu1 %v2992_v52  ;;  %4145 = vmatpush3.msra.mxu0 %v2976_v51  ;;  %v3045_v51 = vld [vmem:[%s6189_s0 + $0x468] sm:$0xff] }
 0x139   :  { %4180 = vmatpush3.msra.mxu1 %v2992_v52  ;;  %4146 = vmatprep.subr.mxu0 %v2975_v53  ;;  %v3013_v52 = vld [vmem:[%s6189_s0 + $0x3e8] sm:$0xff] }
 0x13a   :  { %4181 = vmatprep.subr.mxu1 %v2991_v54  ;;  %4147 = vmatpush3.msra.mxu0 %v2975_v53  ;;  %v3044_v53 = vld [vmem:[%s6189_s0 + $0x460] sm:$0xff] }
 0x13b   :  { %4182 = vmatpush3.msra.mxu1 %v2991_v54  ;;  %4148 = vmatprep.subr.mxu0 %v2974_v55  ;;  %v3012_v54 = vld [vmem:[%s6189_s0 + $0x3e0] sm:$0xff] }
 0x13c   :  { %4183 = vmatprep.subr.mxu1 %v2990_v56  ;;  %4149 = vmatpush3.msra.mxu0 %v2974_v55  ;;  %v3043_v55 = vld [vmem:[%s6189_s0 + $0x458] sm:$0xff] }
 0x13d   :  { %4184 = vmatpush3.msra.mxu1 %v2990_v56  ;;  %4150 = vmatprep.subr.mxu0 %v2973_v57  ;;  %v3011_v56 = vld [vmem:[%s6189_s0 + $0x3d8] sm:$0xff] }
 0x13e   :  { %4185 = vmatprep.subr.mxu1 %v2989_v58  ;;  %4151 = vmatpush3.msra.mxu0 %v2973_v57  ;;  %v3042_v57 = vld [vmem:[%s6189_s0 + $0x450] sm:$0xff] }
 0x13f   :  { %4186 = vmatpush3.msra.mxu1 %v2989_v58  ;;  %4152 = vmatprep.subr.mxu0 %v2972_v59  ;;  %v3010_v58 = vld [vmem:[%s6189_s0 + $0x3d0] sm:$0xff] }
 0x140   :  { %4187 = vmatprep.subr.mxu1 %v2988_v60  ;;  %4153 = vmatpush3.msra.mxu0 %v2972_v59  ;;  %v3041_v59 = vld [vmem:[%s6189_s0 + $0x448] sm:$0xff] }
 0x141   :  { %4188 = vmatpush3.msra.mxu1 %v2988_v60  ;;  %4154 = vmatprep.subr.mxu0 %v2971_v61  ;;  %v3009_v60 = vld [vmem:[%s6189_s0 + $0x3c8] sm:$0xff] }
 0x142   :  { %4189 = vmatprep.subr.mxu1 %v2987_v62  ;;  %4155 = vmatpush3.msra.mxu0 %v2971_v61  ;;  %v3040_v61 = vld [vmem:[%s6189_s0 + $0x440] sm:$0xff] }
 0x143   :  { %4190 = vmatpush3.msra.mxu1 %v2987_v62  ;;  %4156 = vmatprep.subr.mxu0 %v2970_v63  ;;  %v3008_v62 = vld [vmem:[%s6189_s0 + $0x3c0] sm:$0xff] }
 0x144   :  { %4191 = vmatprep.subr.mxu1 %v2986_v0  ;;  %4157 = vmatpush3.msra.mxu0 %v2970_v63  ;;  %v3039_v63 = vld [vmem:[%s6189_s0 + $0x438] sm:$0xff] }
 0x145   :  { %4192 = vmatpush3.msra.mxu1 %v2986_v0  ;;  %4158 = vmatprep.subr.mxu0 %v2969_v1  ;;  %v3007_v0 = vld [vmem:[%s6189_s0 + $0x3b8] sm:$0xff] }
 0x146   :  { %4193 = vmatprep.subr.mxu1 %v2985_v2  ;;  %4159 = vmatpush3.msra.mxu0 %v2969_v1  ;;  %v3038_v1 = vld [vmem:[%s6189_s0 + $0x430] sm:$0xff] }
 0x147   :  { %4194 = vmatpush3.msra.mxu1 %v2985_v2  ;;  %4160 = vmatprep.subr.mxu0 %v2968_v3  ;;  %v3006_v2 = vld [vmem:[%s6189_s0 + $0x3b0] sm:$0xff] }
 0x148   :  { %4195 = vmatprep.subr.mxu1 %v2984_v4  ;;  %4161 = vmatpush3.msra.mxu0 %v2968_v3 }
 0x149   :  { %4196 = vmatpush3.msra.mxu1 %v2984_v4  ;;  %4162 = vmatprep.subr.mxu0 %v2967_v5  ;;  %v3037_v4 = vld [vmem:[%s6189_s0 + $0x428] sm:$0xff] }
 0x14a   :  { %4197 = vmatprep.subr.mxu1 %v2983_v6  ;;  %4163 = vmatpush3.msra.mxu0 %v2967_v5  ;;  %v3005_v5 = vld [vmem:[%s6189_s0 + $0x3a8] sm:$0xff] }
 0x14b   :  { %4198 = vmatpush3.msra.mxu1 %v2983_v6  ;;  %4164 = vmatprep.subr.mxu0 %v2966_v7 }
 0x14c   :  { %4199 = vmatprep.subr.mxu1 %v2982_v8  ;;  %4165 = vmatpush3.msra.mxu0 %v2966_v7  ;;  %v3036_v7 = vld [vmem:[%s6189_s0 + $0x420] sm:$0xff] }
 0x14d   :  { %4200 = vmatpush3.msra.mxu1 %v2982_v8  ;;  %4167 = vmatmul.mubr.f32.vlgmr.msra.gmra.mxu0 %v1225_v11  ;;  %v3004_v8 = vld [vmem:[%s6189_s0 + $0x3a0] sm:$0xff]  ;;  %v3034_v11 = vld [vmem:[%s6189_s0 + $0x410] sm:$0xff] }
 0x14e   :  { %4202 = vmatmul.mubr.f32.vlgmr.msra.gmra.mxu1 %v1321_v12  ;;  %4204 = vmatprep.subr.mxu0 %v3031_v9  ;;  %v3002_v12 = vld [vmem:[%s6189_s0 + $0x390] sm:$0xff] }
 0x14f   :  { %4239 = vmatprep.subr.mxu1 %v1451_v10  ;;  %4205 = vmatpush3.msra.mxu0 %v3031_v9  ;;  %v3035_v9 = vld [vmem:[%s6189_s0 + $0x418] sm:$0xff] }
 0x150   :  { %4240 = vmatpush3.msra.mxu1 %v1451_v10  ;;  %4206 = vmatprep.subr.mxu0 %v3030_v13  ;;  %v3003_v10 = vld [vmem:[%s6189_s0 + $0x398] sm:$0xff] }
 0x151   :  { %4241 = vmatprep.subr.mxu1 %v1450_v14  ;;  %4207 = vmatpush3.msra.mxu0 %v3030_v13  ;;  %v3033_v13 = vld [vmem:[%s6189_s0 + $0x408] sm:$0xff] }
 0x152   :  { %4242 = vmatpush3.msra.mxu1 %v1450_v14  ;;  %4208 = vmatprep.subr.mxu0 %v3029_v15  ;;  %v3001_v14 = vld [vmem:[%s6189_s0 + $0x388] sm:$0xff] }
 0x153   :  { %4243 = vmatprep.subr.mxu1 %v1449_v16  ;;  %4209 = vmatpush3.msra.mxu0 %v3029_v15  ;;  %v3032_v15 = vld [vmem:[%s6189_s0 + $0x400] sm:$0xff] }
 0x154   :  { %4244 = vmatpush3.msra.mxu1 %v1449_v16  ;;  %4210 = vmatprep.subr.mxu0 %v3028_v17  ;;  %v3000_v16 = vld [vmem:[%s6189_s0 + $0x380] sm:$0xff] }
 0x155   :  { %4245 = vmatprep.subr.mxu1 %v1448_v18  ;;  %4211 = vmatpush3.msra.mxu0 %v3028_v17 }
 0x156   :  { %4246 = vmatpush3.msra.mxu1 %v1448_v18  ;;  %4212 = vmatprep.subr.mxu0 %v3027_v19 }
 0x157   :  { %4247 = vmatprep.subr.mxu1 %v1447_v20  ;;  %4213 = vmatpush3.msra.mxu0 %v3027_v19 }
 0x158   :  { %4248 = vmatpush3.msra.mxu1 %v1447_v20  ;;  %4214 = vmatprep.subr.mxu0 %v3026_v21 }
 0x159   :  { %4249 = vmatprep.subr.mxu1 %v1446_v22  ;;  %4215 = vmatpush3.msra.mxu0 %v3026_v21  ;;  %v3063_v21 = vld [vmem:[%s6189_s0 + $0x178] sm:$0xff] }
 0x15a   :  { %4250 = vmatpush3.msra.mxu1 %v1446_v22  ;;  %4216 = vmatprep.subr.mxu0 %v3025_v23  ;;  %v3079_v22 = vld [vmem:[%s6189_s0 + $0x4f8] sm:$0xff] }
 0x15b   :  { %4251 = vmatprep.subr.mxu1 %v1445_v24  ;;  %4217 = vmatpush3.msra.mxu0 %v3025_v23 }
 0x15c   :  { %4252 = vmatpush3.msra.mxu1 %v1445_v24  ;;  %4218 = vmatprep.subr.mxu0 %v3024_v25  ;;  %v1807_v24 = vld [vmem:[#allocation2 + $0x32] sm:$0xff] }
 0x15d   :  { %4253 = vmatprep.subr.mxu1 %v1444_v26  ;;  %4219 = vmatpush3.msra.mxu0 %v3024_v25  ;;  %v3062_v25 = vld [vmem:[%s6189_s0 + $0x170] sm:$0xff] }
 0x15e   :  { %4254 = vmatpush3.msra.mxu1 %v1444_v26  ;;  %4220 = vmatprep.subr.mxu0 %v3023_v27  ;;  %v3078_v26 = vld [vmem:[%s6189_s0 + $0x4f0] sm:$0xff] }
 0x15f   :  { %4255 = vmatprep.subr.mxu1 %v1443_v28  ;;  %4221 = vmatpush3.msra.mxu0 %v3023_v27  ;;  %v3061_v27 = vld [vmem:[%s6189_s0 + $0x168] sm:$0xff] }
 0x160   :  { %4256 = vmatpush3.msra.mxu1 %v1443_v28  ;;  %4222 = vmatprep.subr.mxu0 %v3022_v29  ;;  %v3077_v28 = vld [vmem:[%s6189_s0 + $0x4e8] sm:$0xff] }
 0x161   :  { %4257 = vmatprep.subr.mxu1 %v1442_v30  ;;  %4223 = vmatpush3.msra.mxu0 %v3022_v29  ;;  %v3060_v29 = vld [vmem:[%s6189_s0 + $0x160] sm:$0xff] }
 0x162   :  { %4258 = vmatpush3.msra.mxu1 %v1442_v30  ;;  %4224 = vmatprep.subr.mxu0 %v3021_v31  ;;  %v3076_v30 = vld [vmem:[%s6189_s0 + $0x4e0] sm:$0xff] }
 0x163   :  { %4259 = vmatprep.subr.mxu1 %v1441_v32  ;;  %4225 = vmatpush3.msra.mxu0 %v3021_v31  ;;  %v3059_v31 = vld [vmem:[%s6189_s0 + $0x158] sm:$0xff] }
 0x164   :  { %4260 = vmatpush3.msra.mxu1 %v1441_v32  ;;  %4226 = vmatprep.subr.mxu0 %v3020_v33  ;;  %v3075_v32 = vld [vmem:[%s6189_s0 + $0x4d8] sm:$0xff] }
 0x165   :  { %4261 = vmatprep.subr.mxu1 %v1440_v34  ;;  %4227 = vmatpush3.msra.mxu0 %v3020_v33  ;;  %v3058_v33 = vld [vmem:[%s6189_s0 + $0x150] sm:$0xff] }
 0x166   :  { %4262 = vmatpush3.msra.mxu1 %v1440_v34  ;;  %4228 = vmatprep.subr.mxu0 %v3019_v35  ;;  %v3074_v34 = vld [vmem:[%s6189_s0 + $0x4d0] sm:$0xff] }
 0x167   :  { %4263 = vmatprep.subr.mxu1 %v1439_v36  ;;  %4229 = vmatpush3.msra.mxu0 %v3019_v35  ;;  %v3057_v35 = vld [vmem:[%s6189_s0 + $0x148] sm:$0xff] }
 0x168   :  { %4264 = vmatpush3.msra.mxu1 %v1439_v36  ;;  %4230 = vmatprep.subr.mxu0 %v3018_v37  ;;  %v3073_v36 = vld [vmem:[%s6189_s0 + $0x4c8] sm:$0xff] }
 0x169   :  { %4265 = vmatprep.subr.mxu1 %v1438_v38  ;;  %4231 = vmatpush3.msra.mxu0 %v3018_v37  ;;  %v3056_v37 = vld [vmem:[%s6189_s0 + $0x140] sm:$0xff] }
 0x16a   :  { %4266 = vmatpush3.msra.mxu1 %v1438_v38  ;;  %4232 = vmatprep.subr.mxu0 %v3017_v39  ;;  %v3072_v38 = vld [vmem:[%s6189_s0 + $0x4c0] sm:$0xff] }
 0x16b   :  { %4267 = vmatprep.subr.mxu1 %v1437_v40  ;;  %4233 = vmatpush3.msra.mxu0 %v3017_v39  ;;  %v3055_v39 = vld [vmem:[%s6189_s0 + $0x138] sm:$0xff] }
 0x16c   :  { %4268 = vmatpush3.msra.mxu1 %v1437_v40  ;;  %4234 = vmatprep.subr.mxu0 %v3016_v41  ;;  %v3071_v40 = vld [vmem:[%s6189_s0 + $0x4b8] sm:$0xff] }
 0x16d   :  { %4269 = vmatprep.subr.mxu1 %v1436_v42  ;;  %4235 = vmatpush3.msra.mxu0 %v3016_v41  ;;  %v3054_v41 = vld [vmem:[%s6189_s0 + $0x130] sm:$0xff] }
 0x16e   :  { %4236 = vmatprep.mubr.f32.mxu0 %v1471_v43  ;;  %4270 = vmatpush3.msra.mxu1 %v1436_v42  ;;  %v3070_v42 = vld [vmem:[%s6189_s0 + $0x4b0] sm:$0xff]  ;;  %v3053_v43 = vld [vmem:[%s6189_s0 + $0x128] sm:$0xff] }
 0x16f   :  { %4271 = vmatprep.mubr.f32.mxu1 %v1434_v44  ;;  %4237 = vmatmul.mubr.f32.vlgmr.msra.gmra.mxu0 %v1472_v45  ;;  %v3069_v44 = vld [vmem:[%s6189_s0 + $0x4a8] sm:$0xff]  ;;  %v3052_v45 = vld [vmem:[%s6189_s0 + $0x120] sm:$0xff] }
 0x170   :  { %4272 = vmatmul.mubr.f32.vlgmr.msra.gmra.mxu1 %v1435_v46  ;;  %4274 = vmatprep.subr.mxu0 %v3047_v47  ;;  %v3068_v46 = vld [vmem:[%s6189_s0 + $0x4a0] sm:$0xff] }
 0x171   :  { %4309 = vmatprep.subr.mxu1 %v3015_v48  ;;  %4275 = vmatpush3.msra.mxu0 %v3047_v47  ;;  %v3051_v47 = vld [vmem:[%s6189_s0 + $0x118] sm:$0xff] }
 0x172   :  { %4310 = vmatpush3.msra.mxu1 %v3015_v48  ;;  %4276 = vmatprep.subr.mxu0 %v3046_v49  ;;  %v3067_v48 = vld [vmem:[%s6189_s0 + $0x498] sm:$0xff] }
 0x173   :  { %4311 = vmatprep.subr.mxu1 %v3014_v50  ;;  %4277 = vmatpush3.msra.mxu0 %v3046_v49  ;;  %v3050_v49 = vld [vmem:[%s6189_s0 + $0x110] sm:$0xff] }
 0x174   :  { %4312 = vmatpush3.msra.mxu1 %v3014_v50  ;;  %4278 = vmatprep.subr.mxu0 %v3045_v51  ;;  %v3066_v50 = vld [vmem:[%s6189_s0 + $0x490] sm:$0xff] }
 0x175   :  { %4313 = vmatprep.subr.mxu1 %v3013_v52  ;;  %4279 = vmatpush3.msra.mxu0 %v3045_v51  ;;  %v3049_v51 = vld [vmem:[%s6189_s0 + $0x108] sm:$0xff] }
 0x176   :  { %4314 = vmatpush3.msra.mxu1 %v3013_v52  ;;  %4280 = vmatprep.subr.mxu0 %v3044_v53  ;;  %v3065_v52 = vld [vmem:[%s6189_s0 + $0x488] sm:$0xff] }
 0x177   :  { %4315 = vmatprep.subr.mxu1 %v3012_v54  ;;  %4281 = vmatpush3.msra.mxu0 %v3044_v53  ;;  %v3048_v53 = vld [vmem:[%s6189_s0 + $0x100] sm:$0xff] }
 0x178   :  { %4316 = vmatpush3.msra.mxu1 %v3012_v54  ;;  %4282 = vmatprep.subr.mxu0 %v3043_v55  ;;  %v3064_v54 = vld [vmem:[%s6189_s0 + $0x480] sm:$0xff] }
 0x179   :  { %4317 = vmatprep.subr.mxu1 %v3011_v56  ;;  %4283 = vmatpush3.msra.mxu0 %v3043_v55  ;;  %v3095_v55 = vld [vmem:[%s6189_s0 + $0x1f8] sm:$0xff] }
 0x17a   :  { %4318 = vmatpush3.msra.mxu1 %v3011_v56  ;;  %4284 = vmatprep.subr.mxu0 %v3042_v57  ;;  %v3111_v56 = vld [vmem:[%s6189_s0 + $0x578] sm:$0xff] }
 0x17b   :  { %4319 = vmatprep.subr.mxu1 %v3010_v58  ;;  %4285 = vmatpush3.msra.mxu0 %v3042_v57  ;;  %v1808_v57 = vld [vmem:[#allocation2 + $0x3a] sm:$0xff] }
 0x17c   :  { %4320 = vmatpush3.msra.mxu1 %v3010_v58  ;;  %4286 = vmatprep.subr.mxu0 %v3041_v59 }
 0x17d   :  { %4321 = vmatprep.subr.mxu1 %v3009_v60  ;;  %4287 = vmatpush3.msra.mxu0 %v3041_v59  ;;  %v1997_v59 = vld [vmem:[#allocation2 + $0x33] sm:$0xff] }
 0x17e   :  { %4322 = vmatpush3.msra.mxu1 %v3009_v60  ;;  %4288 = vmatprep.subr.mxu0 %v3040_v61  ;;  %v3094_v60 = vld [vmem:[%s6189_s0 + $0x1f0] sm:$0xff] }
 0x17f   :  { %4323 = vmatprep.subr.mxu1 %v3008_v62  ;;  %4289 = vmatpush3.msra.mxu0 %v3040_v61  ;;  %v3110_v61 = vld [vmem:[%s6189_s0 + $0x570] sm:$0xff] }
 0x180   :  { %4324 = vmatpush3.msra.mxu1 %v3008_v62  ;;  %4290 = vmatprep.subr.mxu0 %v3039_v63  ;;  %v69_v3 = vpop.permute.xlu0 %68 }
 0x181   :  { %4325 = vmatprep.subr.mxu1 %v3007_v0  ;;  %4291 = vmatpush3.msra.mxu0 %v3039_v63  ;;  %79 = vst.msk [vmem:[#allocation2 + $0x4b] sm:$0xff] %vm51_vm0, %v69_v3  ;;  %v3093_v63 = vld [vmem:[%s6189_s0 + $0x1e8] sm:$0xff]  ;;  %v3091_v3 = vld [vmem:[%s6189_s0 + $0x1d8] sm:$0xff] }
 0x182   :  { %4326 = vmatpush3.msra.mxu1 %v3007_v0  ;;  %v71_v6 = vpop.permute.xlu1 %70  ;;  %4292 = vmatprep.subr.mxu0 %v3038_v1  ;;  %v3109_v0 = vld [vmem:[%s6189_s0 + $0x568] sm:$0xff] }
 0x183   :  { %4327 = vmatprep.subr.mxu1 %v3006_v2  ;;  %80 = vst.msk [vmem:[#allocation2 + $0x53] sm:$0xff] %vm51_vm0, %v71_v6  ;;  %4293 = vmatpush3.msra.mxu0 %v3038_v1  ;;  %v3092_v1 = vld [vmem:[%s6189_s0 + $0x1e0] sm:$0xff]  ;;  %v3106_v6 = vld [vmem:[%s6189_s0 + $0x550] sm:$0xff] }
 0x184   :  { %4328 = vmatpush3.msra.mxu1 %v3006_v2  ;;  %4294 = vmatprep.subr.mxu0 %v3037_v4  ;;  %v3108_v2 = vld [vmem:[%s6189_s0 + $0x560] sm:$0xff] }
 0x185   :  { %4329 = vmatprep.subr.mxu1 %v3005_v5  ;;  %4295 = vmatpush3.msra.mxu0 %v3037_v4  ;;  %v3107_v4 = vld [vmem:[%s6189_s0 + $0x558] sm:$0xff] }
 0x186   :  { %4330 = vmatpush3.msra.mxu1 %v3005_v5  ;;  %4296 = vmatprep.subr.mxu0 %v3036_v7  ;;  %v3090_v5 = vld [vmem:[%s6189_s0 + $0x1d0] sm:$0xff] }
 0x187   :  { %4331 = vmatprep.subr.mxu1 %v3004_v8  ;;  %4297 = vmatpush3.msra.mxu0 %v3036_v7  ;;  %v3089_v7 = vld [vmem:[%s6189_s0 + $0x1c8] sm:$0xff] }
 0x188   :  { %4332 = vmatpush3.msra.mxu1 %v3004_v8  ;;  %4298 = vmatprep.subr.mxu0 %v3035_v9  ;;  %v1639_v17 = vld [vmem:[#allocation2 + $0x49] sm:$0xff] }
 0x189   :  { %4333 = vmatprep.subr.mxu1 %v3003_v10  ;;  %4299 = vmatpush3.msra.mxu0 %v3035_v9  ;;  %v1453_v18 = vld [vmem:[#allocation2 + $0x48] sm:$0xff]  ;;  %v3088_v9 = vld [vmem:[%s6189_s0 + $0x1c0] sm:$0xff] }
 0x18a   :  { %4334 = vmatpush3.msra.mxu1 %v3003_v10  ;;  %4300 = vmatprep.subr.mxu0 %v3034_v11  ;;  %v1640_v19 = vld [vmem:[#allocation2 + $0x51] sm:$0xff]  ;;  %v3105_v8 = vld [vmem:[%s6189_s0 + $0x548] sm:$0xff]  ;;  %v3104_v10 = vld [vmem:[%s6189_s0 + $0x540] sm:$0xff] }
 0x18b   :  { %4335 = vmatprep.subr.mxu1 %v3002_v12  ;;  %4301 = vmatpush3.msra.mxu0 %v3034_v11  ;;  %v1454_v20 = vld [vmem:[#allocation2 + $0x50] sm:$0xff]  ;;  %v3087_v11 = vld [vmem:[%s6189_s0 + $0x1b8] sm:$0xff] }
 0x18c   :  { %4336 = vmatpush3.msra.mxu1 %v3002_v12  ;;  %4302 = vmatprep.subr.mxu0 %v3033_v13  ;;  %v1902_v23 = vld [vmem:[#allocation2 + $0x4a] sm:$0xff]  ;;  %v1903_v58 = vld [vmem:[#allocation2 + $0x52] sm:$0xff] }
 0x18d   :  { %4337 = vmatprep.subr.mxu1 %v3001_v14  ;;  %4303 = vmatpush3.msra.mxu0 %v3033_v13  ;;  %v2092_v62 = vld [vmem:[#allocation2 + $0x4b] sm:$0xff]  ;;  %v3103_v12 = vld [vmem:[%s6189_s0 + $0x538] sm:$0xff] }
 0x18e   :  { %4338 = vmatpush3.msra.mxu1 %v3001_v14  ;;  %4304 = vmatprep.subr.mxu0 %v3032_v15  ;;  %v3086_v13 = vld [vmem:[%s6189_s0 + $0x1b0] sm:$0xff] }
 0x18f   :  { %4339 = vmatprep.subr.mxu1 %v3000_v16  ;;  %4305 = vmatpush3.msra.mxu0 %v3032_v15  ;;  %v3102_v14 = vld [vmem:[%s6189_s0 + $0x530] sm:$0xff]  ;;  %v3085_v15 = vld [vmem:[%s6189_s0 + $0x1a8] sm:$0xff] }
 0x190   :  { %4306 = vmatprep.mubr.f32.mxu0 %v1639_v17  ;;  %4340 = vmatpush3.msra.mxu1 %v3000_v16  ;;  %v3101_v16 = vld [vmem:[%s6189_s0 + $0x528] sm:$0xff]  ;;  %v3084_v17 = vld [vmem:[%s6189_s0 + $0x1a0] sm:$0xff] }
 0x191   :  { %4341 = vmatprep.mubr.f32.mxu1 %v1453_v18  ;;  %4307 = vmatmul.mubr.f32.vlgmr.msra.gmra.mxu0 %v1640_v19  ;;  %v3100_v18 = vld [vmem:[%s6189_s0 + $0x520] sm:$0xff]  ;;  %v3083_v19 = vld [vmem:[%s6189_s0 + $0x198] sm:$0xff] }
 0x192   :  { %4342 = vmatmul.mubr.f32.vlgmr.msra.gmra.mxu1 %v1454_v20  ;;  %4344 = vmatprep.subr.mxu0 %v3063_v21  ;;  %v3099_v20 = vld [vmem:[%s6189_s0 + $0x518] sm:$0xff] }
 0x193   :  { %4379 = vmatprep.subr.mxu1 %v3079_v22  ;;  %4345 = vmatpush3.msra.mxu0 %v3063_v21  ;;  %v3082_v21 = vld [vmem:[%s6189_s0 + $0x190] sm:$0xff] }
 0x194   :  { %4376 = vmatprep.mubr.f32.mxu0 %v1807_v24  ;;  %4380 = vmatpush3.msra.mxu1 %v3079_v22  ;;  %v3098_v22 = vld [vmem:[%s6189_s0 + $0x510] sm:$0xff]  ;;  %v3097_v24 = vld [vmem:[%s6189_s0 + $0x508] sm:$0xff] }
 0x195   :  { %4411 = vmatprep.mubr.f32.mxu1 %v1902_v23  ;;  %4346 = vmatprep.subr.mxu0 %v3062_v25  ;;  %v3081_v23 = vld [vmem:[%s6189_s0 + $0x188] sm:$0xff] }
 0x196   :  { %4381 = vmatprep.subr.mxu1 %v3078_v26  ;;  %4347 = vmatpush3.msra.mxu0 %v3062_v25  ;;  %v3080_v25 = vld [vmem:[%s6189_s0 + $0x180] sm:$0xff] }
 0x197   :  { %4382 = vmatpush3.msra.mxu1 %v3078_v26  ;;  %4348 = vmatprep.subr.mxu0 %v3061_v27  ;;  %v3096_v26 = vld [vmem:[%s6189_s0 + $0x500] sm:$0xff] }
 0x198   :  { %4383 = vmatprep.subr.mxu1 %v3077_v28  ;;  %4349 = vmatpush3.msra.mxu0 %v3061_v27  ;;  %v3127_v27 = vld [vmem:[%s6189_s0 + $0x278] sm:$0xff] }
 0x199   :  { %4384 = vmatpush3.msra.mxu1 %v3077_v28  ;;  %4350 = vmatprep.subr.mxu0 %v3060_v29  ;;  %v3143_v28 = vld [vmem:[%s6189_s0 + $0x5f8] sm:$0xff] }
 0x19a   :  { %4385 = vmatprep.subr.mxu1 %v3076_v30  ;;  %4351 = vmatpush3.msra.mxu0 %v3060_v29  ;;  %v1998_v29 = vld [vmem:[#allocation2 + $0x3b] sm:$0xff] }
 0x19b   :  { %4386 = vmatpush3.msra.mxu1 %v3076_v30  ;;  %4352 = vmatprep.subr.mxu0 %v3059_v31  ;;  %v2093_v30 = vld [vmem:[#allocation2 + $0x53] sm:$0xff] }
 0x19c   :  { %4387 = vmatprep.subr.mxu1 %v3075_v32  ;;  %4353 = vmatpush3.msra.mxu0 %v3059_v31  ;;  %v2187_v31 = vld [vmem:[#allocation2 + $0x34] sm:$0xff] }
 0x19d   :  { %4388 = vmatpush3.msra.mxu1 %v3075_v32  ;;  %4354 = vmatprep.subr.mxu0 %v3058_v33  ;;  %v3126_v32 = vld [vmem:[%s6189_s0 + $0x270] sm:$0xff] }
 0x19e   :  { %4389 = vmatprep.subr.mxu1 %v3074_v34  ;;  %4355 = vmatpush3.msra.mxu0 %v3058_v33  ;;  %v3142_v33 = vld [vmem:[%s6189_s0 + $0x5f0] sm:$0xff] }
 0x19f   :  { %4390 = vmatpush3.msra.mxu1 %v3074_v34  ;;  %4356 = vmatprep.subr.mxu0 %v3057_v35  ;;  %v2282_v34 = vld [vmem:[#allocation2 + $0x4c] sm:$0xff] }
 0x1a0   :  { %4391 = vmatprep.subr.mxu1 %v3073_v36  ;;  %4357 = vmatpush3.msra.mxu0 %v3057_v35  ;;  %v3125_v35 = vld [vmem:[%s6189_s0 + $0x268] sm:$0xff] }
 0x1a1   :  { %4392 = vmatpush3.msra.mxu1 %v3073_v36  ;;  %4358 = vmatprep.subr.mxu0 %v3056_v37  ;;  %v3141_v36 = vld [vmem:[%s6189_s0 + $0x5e8] sm:$0xff] }
 0x1a2   :  { %4393 = vmatprep.subr.mxu1 %v3072_v38  ;;  %4359 = vmatpush3.msra.mxu0 %v3056_v37  ;;  %v3124_v37 = vld [vmem:[%s6189_s0 + $0x260] sm:$0xff] }
 0x1a3   :  { %4394 = vmatpush3.msra.mxu1 %v3072_v38  ;;  %4360 = vmatprep.subr.mxu0 %v3055_v39  ;;  %v3140_v38 = vld [vmem:[%s6189_s0 + $0x5e0] sm:$0xff] }
 0x1a4   :  { %4395 = vmatprep.subr.mxu1 %v3071_v40  ;;  %4361 = vmatpush3.msra.mxu0 %v3055_v39  ;;  %v3123_v39 = vld [vmem:[%s6189_s0 + $0x258] sm:$0xff] }
 0x1a5   :  { %4396 = vmatpush3.msra.mxu1 %v3071_v40  ;;  %4362 = vmatprep.subr.mxu0 %v3054_v41  ;;  %v3139_v40 = vld [vmem:[%s6189_s0 + $0x5d8] sm:$0xff] }
 0x1a6   :  { %4397 = vmatprep.subr.mxu1 %v3070_v42  ;;  %4363 = vmatpush3.msra.mxu0 %v3054_v41  ;;  %v3122_v41 = vld [vmem:[%s6189_s0 + $0x250] sm:$0xff] }
 0x1a7   :  { %4398 = vmatpush3.msra.mxu1 %v3070_v42  ;;  %4364 = vmatprep.subr.mxu0 %v3053_v43  ;;  %v3138_v42 = vld [vmem:[%s6189_s0 + $0x5d0] sm:$0xff] }
 0x1a8   :  { %4399 = vmatprep.subr.mxu1 %v3069_v44  ;;  %4365 = vmatpush3.msra.mxu0 %v3053_v43  ;;  %v3121_v43 = vld [vmem:[%s6189_s0 + $0x248] sm:$0xff] }
 0x1a9   :  { %4400 = vmatpush3.msra.mxu1 %v3069_v44  ;;  %4366 = vmatprep.subr.mxu0 %v3052_v45  ;;  %v3137_v44 = vld [vmem:[%s6189_s0 + $0x5c8] sm:$0xff] }
 0x1aa   :  { %4401 = vmatprep.subr.mxu1 %v3068_v46  ;;  %4367 = vmatpush3.msra.mxu0 %v3052_v45  ;;  %v3120_v45 = vld [vmem:[%s6189_s0 + $0x240] sm:$0xff] }
 0x1ab   :  { %4402 = vmatpush3.msra.mxu1 %v3068_v46  ;;  %4368 = vmatprep.subr.mxu0 %v3051_v47  ;;  %v3136_v46 = vld [vmem:[%s6189_s0 + $0x5c0] sm:$0xff] }
 0x1ac   :  { %4403 = vmatprep.subr.mxu1 %v3067_v48  ;;  %4369 = vmatpush3.msra.mxu0 %v3051_v47  ;;  %v3119_v47 = vld [vmem:[%s6189_s0 + $0x238] sm:$0xff] }
 0x1ad   :  { %4404 = vmatpush3.msra.mxu1 %v3067_v48  ;;  %4370 = vmatprep.subr.mxu0 %v3050_v49  ;;  %v3135_v48 = vld [vmem:[%s6189_s0 + $0x5b8] sm:$0xff] }
 0x1ae   :  { %4405 = vmatprep.subr.mxu1 %v3066_v50  ;;  %4371 = vmatpush3.msra.mxu0 %v3050_v49  ;;  %v3118_v49 = vld [vmem:[%s6189_s0 + $0x230] sm:$0xff] }
 0x1af   :  { %4406 = vmatpush3.msra.mxu1 %v3066_v50  ;;  %4372 = vmatprep.subr.mxu0 %v3049_v51  ;;  %v3134_v50 = vld [vmem:[%s6189_s0 + $0x5b0] sm:$0xff] }
 0x1b0   :  { %4407 = vmatprep.subr.mxu1 %v3065_v52  ;;  %4373 = vmatpush3.msra.mxu0 %v3049_v51  ;;  %v5918_v51 = vpop.f32.mrf.mxu0 }
 0x1b1   :  { %4408 = vmatpush3.msra.mxu1 %v3065_v52  ;;  %4374 = vmatprep.subr.mxu0 %v3048_v53  ;;  %v3117_v52 = vld [vmem:[%s6189_s0 + $0x228] sm:$0xff] }
 0x1b2   :  { %4409 = vmatprep.subr.mxu1 %v3064_v54  ;;  %4375 = vmatpush3.msra.mxu0 %v3048_v53  ;;  %v3133_v53 = vld [vmem:[%s6189_s0 + $0x5a8] sm:$0xff] }
 0x1b3   :  { %4410 = vmatpush3.msra.mxu1 %v3064_v54  ;;  %4377 = vmatmul.mubr.f32.vlgmr.msra.gmra.mxu0 %v1808_v57  ;;  %v5926_v54 = vpop.f32.mrf.mxu1  ;;  %v5934_v57 = vpop.f32.mrf.mxu0 }
 0x1b4   :  { %4412 = vmatmul.mubr.f32.vlgmr.msra.gmra.mxu1 %v1903_v58  ;;  %4414 = vmatprep.subr.mxu0 %v3095_v55  ;;  %v3115_v58 = vld [vmem:[%s6189_s0 + $0x218] sm:$0xff] }
 0x1b5   :  { %4449 = vmatprep.subr.mxu1 %v3111_v56  ;;  %4415 = vmatpush3.msra.mxu0 %v3095_v55  ;;  %v3116_v55 = vld [vmem:[%s6189_s0 + $0x220] sm:$0xff] }
 0x1b6   :  { %4446 = vmatprep.mubr.f32.mxu0 %v1997_v59  ;;  %4450 = vmatpush3.msra.mxu1 %v3111_v56  ;;  %v3132_v56 = vld [vmem:[%s6189_s0 + $0x5a0] sm:$0xff]  ;;  %v3131_v59 = vld [vmem:[%s6189_s0 + $0x598] sm:$0xff] }
 0x1b7   :  { %4481 = vmatprep.mubr.f32.mxu1 %v2092_v62  ;;  %4416 = vmatprep.subr.mxu0 %v3094_v60  ;;  %v3114_v62 = vld [vmem:[%s6189_s0 + $0x210] sm:$0xff] }
 0x1b8   :  { %4451 = vmatprep.subr.mxu1 %v3110_v61  ;;  %4417 = vmatpush3.msra.mxu0 %v3094_v60  ;;  %v5942_v60 = vpop.f32.mrf.mxu1 }
 0x1b9   :  { %4452 = vmatpush3.msra.mxu1 %v3110_v61  ;;  %4418 = vmatprep.subr.mxu0 %v3093_v63  ;;  %v5944_v61 = vpop.f32.mrf.mxu0 }
 0x1ba   :  { %4453 = vmatprep.subr.mxu1 %v3109_v0  ;;  %4419 = vmatpush3.msra.mxu0 %v3093_v63  ;;  %v3130_v63 = vld [vmem:[%s6189_s0 + $0x590] sm:$0xff] }
 0x1bb   :  { %4454 = vmatpush3.msra.mxu1 %v3109_v0  ;;  %4420 = vmatprep.subr.mxu0 %v3092_v1  ;;  %v5952_v0 = vpop.f32.mrf.mxu1 }
 0x1bc   :  { %4455 = vmatprep.subr.mxu1 %v3108_v2  ;;  %4421 = vmatpush3.msra.mxu0 %v3092_v1  ;;  %v3113_v1 = vld [vmem:[%s6189_s0 + $0x208] sm:$0xff] }
 0x1bd   :  { %4456 = vmatpush3.msra.mxu1 %v3108_v2  ;;  %4422 = vmatprep.subr.mxu0 %v3091_v3  ;;  %v3129_v2 = vld [vmem:[%s6189_s0 + $0x588] sm:$0xff] }
 0x1be   :  { %4457 = vmatprep.subr.mxu1 %v3107_v4  ;;  %4423 = vmatpush3.msra.mxu0 %v3091_v3  ;;  %v5960_v3 = vpop.f32.mrf.mxu0 }
 0x1bf   :  { %4458 = vmatpush3.msra.mxu1 %v3107_v4  ;;  %4424 = vmatprep.subr.mxu0 %v3090_v5  ;;  %v3112_v4 = vld [vmem:[%s6189_s0 + $0x200] sm:$0xff] }
 0x1c0   :  { %4459 = vmatprep.subr.mxu1 %v3106_v6  ;;  %4425 = vmatpush3.msra.mxu0 %v3090_v5  ;;  %v3128_v5 = vld [vmem:[%s6189_s0 + $0x580] sm:$0xff] }
 0x1c1   :  { %4460 = vmatpush3.msra.mxu1 %v3106_v6  ;;  %4426 = vmatprep.subr.mxu0 %v3089_v7  ;;  %v5968_v6 = vpop.f32.mrf.mxu1 }
 0x1c2   :  { %4461 = vmatprep.subr.mxu1 %v3105_v8  ;;  %4427 = vmatpush3.msra.mxu0 %v3089_v7  ;;  %v5970_v7 = vpop.f32.mrf.mxu0 }
 0x1c3   :  { %4462 = vmatpush3.msra.mxu1 %v3105_v8  ;;  %4428 = vmatprep.subr.mxu0 %v3088_v9  ;;  %v5972_v8 = vpop.f32.mrf.mxu1 }
 0x1c4   :  { %4463 = vmatprep.subr.mxu1 %v3104_v10  ;;  %4429 = vmatpush3.msra.mxu0 %v3088_v9  ;;  %v3159_v9 = vld [vmem:[%s6189_s0 + $0x2f8] sm:$0xff] }
 0x1c5   :  { %4464 = vmatpush3.msra.mxu1 %v3104_v10  ;;  %4430 = vmatprep.subr.mxu0 %v3087_v11  ;;  %v3175_v10 = vld [vmem:[%s6189_s0 + $0x678] sm:$0xff] }
 0x1c6   :  { %4465 = vmatprep.subr.mxu1 %v3103_v12  ;;  %4431 = vmatpush3.msra.mxu0 %v3087_v11  ;;  %v2188_v11 = vld [vmem:[#allocation2 + $0x3c] sm:$0xff] }
 0x1c7   :  { %4466 = vmatpush3.msra.mxu1 %v3103_v12  ;;  %4432 = vmatprep.subr.mxu0 %v3086_v13  ;;  %v2283_v12 = vld [vmem:[#allocation2 + $0x54] sm:$0xff] }
 0x1c8   :  { %4467 = vmatprep.subr.mxu1 %v3102_v14  ;;  %4433 = vmatpush3.msra.mxu0 %v3086_v13  ;;  %v5980_v13 = vpop.f32.mrf.mxu0 }
 0x1c9   :  { %4468 = vmatpush3.msra.mxu1 %v3102_v14  ;;  %4434 = vmatprep.subr.mxu0 %v3085_v15  ;;  %v2377_v14 = vld [vmem:[#allocation2 + $0x35] sm:$0xff] }
 0x1ca   :  { %4469 = vmatprep.subr.mxu1 %v3101_v16  ;;  %4435 = vmatpush3.msra.mxu0 %v3085_v15  ;;  %v3158_v15 = vld [vmem:[%s6189_s0 + $0x2f0] sm:$0xff] }
 0x1cb   :  { %4470 = vmatpush3.msra.mxu1 %v3101_v16  ;;  %4436 = vmatprep.subr.mxu0 %v3084_v17  ;;  %v3174_v16 = vld [vmem:[%s6189_s0 + $0x670] sm:$0xff] }
 0x1cc   :  { %4471 = vmatprep.subr.mxu1 %v3100_v18  ;;  %4437 = vmatpush3.msra.mxu0 %v3084_v17  ;;  %v5988_v17 = vpop.f32.mrf.mxu1 }
 0x1cd   :  { %4472 = vmatpush3.msra.mxu1 %v3100_v18  ;;  %4438 = vmatprep.subr.mxu0 %v3083_v19  ;;  %v2472_v18 = vld [vmem:[#allocation2 + $0x4d] sm:$0xff] }
 0x1ce   :  { %4473 = vmatprep.subr.mxu1 %v3099_v20  ;;  %4439 = vmatpush3.msra.mxu0 %v3083_v19  ;;  %v3958_v19 = vpop.f32.mrf.mxu0 }
 0x1cf   :  { %4474 = vmatpush3.msra.mxu1 %v3099_v20  ;;  %4440 = vmatprep.subr.mxu0 %v3082_v21  ;;  %v3157_v20 = vld [vmem:[%s6189_s0 + $0x2e8] sm:$0xff] }
 0x1d0   :  { %4475 = vmatprep.subr.mxu1 %v3098_v22  ;;  %4441 = vmatpush3.msra.mxu0 %v3082_v21  ;;  %v3173_v21 = vld [vmem:[%s6189_s0 + $0x668] sm:$0xff] }
 0x1d1   :  { %4476 = vmatpush3.msra.mxu1 %v3098_v22  ;;  %4442 = vmatprep.subr.mxu0 %v3081_v23  ;;  %v3993_v22 = vpop.f32.mrf.mxu1 }
 0x1d2   :  { %4477 = vmatprep.subr.mxu1 %v3097_v24  ;;  %4443 = vmatpush3.msra.mxu0 %v3081_v23  ;;  %v3156_v23 = vld [vmem:[%s6189_s0 + $0x2e0] sm:$0xff] }
 0x1d3   :  { %4478 = vmatpush3.msra.mxu1 %v3097_v24  ;;  %4444 = vmatprep.subr.mxu0 %v3080_v25  ;;  %v3172_v24 = vld [vmem:[%s6189_s0 + $0x660] sm:$0xff] }
 0x1d4   :  { %4479 = vmatprep.subr.mxu1 %v3096_v26  ;;  %4445 = vmatpush3.msra.mxu0 %v3080_v25  ;;  %v733_v25 = vpop.f32.mrf.mxu0 }
 0x1d5   :  { %4480 = vmatpush3.msra.mxu1 %v3096_v26  ;;  %4447 = vmatmul.mubr.f32.vlgmr.msra.gmra.mxu0 %v1998_v29  ;;  %v3155_v26 = vld [vmem:[%s6189_s0 + $0x2d8] sm:$0xff] }
 0x1d6   :  { %4482 = vmatmul.mubr.f32.vlgmr.msra.gmra.mxu1 %v2093_v30  ;;  %4484 = vmatprep.subr.mxu0 %v3127_v27  ;;  %v4028_v29 = vpop.f32.mrf.mxu0  ;;  %v3154_v30 = vld [vmem:[%s6189_s0 + $0x2d0] sm:$0xff] }
 0x1d7   :  { %4519 = vmatprep.subr.mxu1 %v3143_v28  ;;  %4485 = vmatpush3.msra.mxu0 %v3127_v27  ;;  %v3171_v27 = vld [vmem:[%s6189_s0 + $0x658] sm:$0xff] }
 0x1d8   :  { %4516 = vmatprep.mubr.f32.mxu0 %v2187_v31  ;;  %4520 = vmatpush3.msra.mxu1 %v3143_v28  ;;  %v829_v28 = vpop.f32.mrf.mxu1  ;;  %v3170_v31 = vld [vmem:[%s6189_s0 + $0x650] sm:$0xff] }
 0x1d9   :  { %4551 = vmatprep.mubr.f32.mxu1 %v2282_v34  ;;  %4486 = vmatprep.subr.mxu0 %v3126_v32  ;;  %v3169_v34 = vld [vmem:[%s6189_s0 + $0x648] sm:$0xff] }
 0x1da   :  { %4521 = vmatprep.subr.mxu1 %v3142_v33  ;;  %4487 = vmatpush3.msra.mxu0 %v3126_v32  ;;  %v4063_v32 = vpop.f32.mrf.mxu1 }
 0x1db   :  { %4522 = vmatpush3.msra.mxu1 %v3142_v33  ;;  %4488 = vmatprep.subr.mxu0 %v3125_v35  ;;  %v3153_v33 = vld [vmem:[%s6189_s0 + $0x2c8] sm:$0xff] }
 0x1dc   :  { %4523 = vmatprep.subr.mxu1 %v3141_v36  ;;  %4489 = vmatpush3.msra.mxu0 %v3125_v35  ;;  %v284_v35 = vadd.f32 %v5926_v54, %v5918_v51  ;;  %v3166_v54 = vld [vmem:[%s6189_s0 + $0x630] sm:$0xff] }
 0x1dd   :  { %4524 = vmatpush3.msra.mxu1 %v3141_v36  ;;  %4490 = vmatprep.subr.mxu0 %v3124_v37  ;;  %v453_v36 = vadd.f32 %v5952_v0, %v5944_v61  ;;  %v3165_v61 = vld [vmem:[%s6189_s0 + $0x628] sm:$0xff] }
 0x1de   :  { %4525 = vmatprep.subr.mxu1 %v3140_v38  ;;  %4491 = vmatpush3.msra.mxu0 %v3124_v37  ;;  %v925_v37 = vpop.f32.mrf.mxu0 }
 0x1df   :  { %4526 = vmatpush3.msra.mxu1 %v3140_v38  ;;  %4492 = vmatprep.subr.mxu0 %v3123_v39  ;;  %v3152_v38 = vld [vmem:[%s6189_s0 + $0x2c0] sm:$0xff] }
 0x1e0   :  { %4527 = vmatprep.subr.mxu1 %v3139_v40  ;;  %4493 = vmatpush3.msra.mxu0 %v3123_v39  ;;  %v3168_v39 = vld [vmem:[%s6189_s0 + $0x640] sm:$0xff] }
 0x1e1   :  { %4528 = vmatpush3.msra.mxu1 %v3139_v40  ;;  %4494 = vmatprep.subr.mxu0 %v3122_v41  ;;  %v279_v40 = vadd.f32 %v5942_v60, %v5934_v57  ;;  %v3149_v60 = vld [vmem:[%s6189_s0 + $0x2a8] sm:$0xff] }
 0x1e2   :  { %4529 = vmatprep.subr.mxu1 %v3138_v42  ;;  %4495 = vmatpush3.msra.mxu0 %v3122_v41  ;;  %v1021_v41 = vpop.f32.mrf.mxu1 }
 0x1e3   :  { %4530 = vmatpush3.msra.mxu1 %v3138_v42  ;;  %4496 = vmatprep.subr.mxu0 %v3121_v43  ;;  %v448_v42 = vadd.f32 %v5968_v6, %v5960_v3  ;;  %v3148_v3 = vld [vmem:[%s6189_s0 + $0x2a0] sm:$0xff] }
 0x1e4   :  { %4531 = vmatprep.subr.mxu1 %v3137_v44  ;;  %4497 = vmatpush3.msra.mxu0 %v3121_v43  ;;  %v551_v43 = vadd.f32 %v5970_v7, %v284_v35  ;;  %v3189_v35 = vld [vmem:[%s6189_s0 + $0x368] sm:$0xff] }
 0x1e5   :  { %4532 = vmatpush3.msra.mxu1 %v3137_v44  ;;  %4498 = vmatprep.subr.mxu0 %v3120_v45  ;;  %v647_v44 = vadd.f32 %v5972_v8, %v453_v36  ;;  %v3205_v36 = vld [vmem:[%s6189_s0 + $0x6e8] sm:$0xff] }
 0x1e6   :  { %4533 = vmatprep.subr.mxu1 %v3136_v46  ;;  %4499 = vmatpush3.msra.mxu0 %v3120_v45  ;;  %v743_v51 = vadd.f32 %v3958_v19, %v551_v43  ;;  %v3186_v43 = vld [vmem:[%s6189_s0 + $0x350] sm:$0xff] }
 0x1e7   :  { %4534 = vmatpush3.msra.mxu1 %v3136_v46  ;;  %4500 = vmatprep.subr.mxu0 %v3119_v47  ;;  %v3151_v46 = vld [vmem:[%s6189_s0 + $0x2b8] sm:$0xff] }
 0x1e8   :  { %4535 = vmatprep.subr.mxu1 %v3135_v48  ;;  %4501 = vmatpush3.msra.mxu0 %v3119_v47  ;;  %v3167_v47 = vld [vmem:[%s6189_s0 + $0x638] sm:$0xff]  ;;  %v935_v57 = vadd.f32 %v4028_v29, %v743_v51 }
 0x1e9   :  { %4536 = vmatpush3.msra.mxu1 %v3135_v48  ;;  %4502 = vmatprep.subr.mxu0 %v3118_v49  ;;  %v550_v48 = vadd.f32 %v5980_v13, %v279_v40  ;;  %v2378_v29 = vld [vmem:[#allocation2 + $0x3d] sm:$0xff] }
 0x1ea   :  { %4537 = vmatprep.subr.mxu1 %v3134_v50  ;;  %4503 = vmatpush3.msra.mxu0 %v3118_v49  ;;  %v3203_v40 = vld [vmem:[%s6189_s0 + $0x6d8] sm:$0xff] }
 0x1eb   :  { %4538 = vmatpush3.msra.mxu1 %v3134_v50  ;;  %4504 = vmatprep.subr.mxu0 %v3117_v52  ;;  %v4098_v45 = vpop.f32.mrf.mxu0  ;;  %v646_v50 = vadd.f32 %v5988_v17, %v448_v42  ;;  %v3183_v51 = vld [vmem:[%s6189_s0 + $0x338] sm:$0xff] }
 0x1ec   :  { %4539 = vmatprep.subr.mxu1 %v3133_v53  ;;  %4505 = vmatpush3.msra.mxu0 %v3117_v52  ;;  %v4133_v49 = vpop.f32.mrf.mxu1  ;;  %v839_v52 = vadd.f32 %v3993_v22, %v647_v44  ;;  %v3202_v44 = vld [vmem:[%s6189_s0 + $0x6d0] sm:$0xff] }
 0x1ed   :  { %4540 = vmatpush3.msra.mxu1 %v3133_v53  ;;  %4506 = vmatprep.subr.mxu0 %v3116_v55  ;;  %v3150_v53 = vld [vmem:[%s6189_s0 + $0x2b0] sm:$0xff] }
 0x1ee   :  { %4541 = vmatprep.subr.mxu1 %v3132_v56  ;;  %4507 = vmatpush3.msra.mxu0 %v3116_v55  ;;  %v742_v55 = vadd.f32 %v733_v25, %v550_v48  ;;  %v3160_v25 = vld [vmem:[%s6189_s0 + $0x600] sm:$0xff]  ;;  %v3201_v48 = vld [vmem:[%s6189_s0 + $0x6c8] sm:$0xff] }
 0x1ef   :  { %4542 = vmatpush3.msra.mxu1 %v3132_v56  ;;  %4508 = vmatprep.subr.mxu0 %v3115_v58  ;;  %v838_v56 = vadd.f32 %v829_v28, %v646_v50  ;;  %v3207_v28 = vld [vmem:[%s6189_s0 + $0x6f8] sm:$0xff]  ;;  %v3200_v50 = vld [vmem:[%s6189_s0 + $0x6c0] sm:$0xff] }
 0x1f0   :  { %4543 = vmatprep.subr.mxu1 %v3131_v59  ;;  %4509 = vmatpush3.msra.mxu0 %v3115_v58  ;;  %v1031_v58 = vadd.f32 %v4063_v32, %v839_v52  ;;  %v3190_v32 = vld [vmem:[%s6189_s0 + $0x370] sm:$0xff]  ;;  %v3199_v52 = vld [vmem:[%s6189_s0 + $0x6b8] sm:$0xff] }
 0x1f1   :  { %4544 = vmatpush3.msra.mxu1 %v3131_v59  ;;  %4510 = vmatprep.subr.mxu0 %v3114_v62  ;;  %v1117_v59 = vpop.f32.mrf.mxu0  ;;  %v1030_v0 = vadd.f32 %v1021_v41, %v838_v56  ;;  %v3197_v56 = vld [vmem:[%s6189_s0 + $0x6a8] sm:$0xff] }
 0x1f2   :  { %4545 = vmatprep.subr.mxu1 %v3130_v63  ;;  %4511 = vmatpush3.msra.mxu0 %v3114_v62  ;;  %v934_v62 = vadd.f32 %v925_v37, %v742_v55  ;;  %v3188_v37 = vld [vmem:[%s6189_s0 + $0x360] sm:$0xff]  ;;  %v3181_v55 = vld [vmem:[%s6189_s0 + $0x328] sm:$0xff] }
 0x1f3   :  { %4546 = vmatpush3.msra.mxu1 %v3130_v63  ;;  %4512 = vmatprep.subr.mxu0 %v3113_v1  ;;  %v1213_v63 = vpop.f32.mrf.mxu1 }
 0x1f4   :  { %4547 = vmatprep.subr.mxu1 %v3129_v2  ;;  %4513 = vmatpush3.msra.mxu0 %v3113_v1  ;;  %v1127_v1 = vadd.f32 %v4098_v45, %v935_v57  ;;  %v1222_v8 = vadd.f32 %v1213_v63, %v1030_v0  ;;  %v3180_v57 = vld [vmem:[%s6189_s0 + $0x320] sm:$0xff]  ;;  %v3194_v63 = vld [vmem:[%s6189_s0 + $0x690] sm:$0xff] }
 0x1f5   :  { %4548 = vmatpush3.msra.mxu1 %v3129_v2  ;;  %4514 = vmatprep.subr.mxu0 %v3112_v4  ;;  %v1223_v2 = vadd.f32 %v4133_v49, %v1031_v58  ;;  %v3184_v49 = vld [vmem:[%s6189_s0 + $0x340] sm:$0xff] }
 0x1f6   :  { %4549 = vmatprep.subr.mxu1 %v3128_v5  ;;  %4515 = vmatpush3.msra.mxu0 %v3112_v4  ;;  %v3164_v4 = vld [vmem:[%s6189_s0 + $0x620] sm:$0xff] }
 0x1f7   :  { %4550 = vmatpush3.msra.mxu1 %v3128_v5  ;;  %4517 = vmatmul.mubr.f32.vlgmr.msra.gmra.mxu0 %v2188_v11  ;;  %v1126_v5 = vadd.f32 %v1117_v59, %v934_v62  ;;  %v3196_v58 = vld [vmem:[%s6189_s0 + $0x6a0] sm:$0xff]  ;;  %v3179_v59 = vld [vmem:[%s6189_s0 + $0x318] sm:$0xff]  ;;  %v3178_v62 = vld [vmem:[%s6189_s0 + $0x310] sm:$0xff] }
 0x1f8   :  { %4552 = vmatmul.mubr.f32.vlgmr.msra.gmra.mxu1 %v2283_v12  ;;  %4554 = vmatprep.subr.mxu0 %v3159_v9 }
 0x1f9   :  { %4589 = vmatprep.subr.mxu1 %v3175_v10  ;;  %4555 = vmatpush3.msra.mxu0 %v3159_v9  ;;  %v3147_v9 = vld [vmem:[%s6189_s0 + $0x298] sm:$0xff] }
 0x1fa   :  { %4586 = vmatprep.mubr.f32.mxu0 %v2377_v14  ;;  %4590 = vmatpush3.msra.mxu1 %v3175_v10  ;;  %v3163_v10 = vld [vmem:[%s6189_s0 + $0x618] sm:$0xff] }
 0x1fb   :  { %4621 = vmatprep.mubr.f32.mxu1 %v2472_v18  ;;  %4556 = vmatprep.subr.mxu0 %v3158_v15 }
 0x1fc   :  { %4591 = vmatprep.subr.mxu1 %v3174_v16  ;;  %4557 = vmatpush3.msra.mxu0 %v3158_v15  ;;  %v3146_v15 = vld [vmem:[%s6189_s0 + $0x290] sm:$0xff] }
 0x1fd   :  { %4592 = vmatpush3.msra.mxu1 %v3174_v16  ;;  %4558 = vmatprep.subr.mxu0 %v3157_v20  ;;  %v3162_v16 = vld [vmem:[%s6189_s0 + $0x610] sm:$0xff] }
 0x1fe   :  { %4593 = vmatprep.subr.mxu1 %v3173_v21  ;;  %4559 = vmatpush3.msra.mxu0 %v3157_v20  ;;  %v3145_v20 = vld [vmem:[%s6189_s0 + $0x288] sm:$0xff] }
 0x1ff   :  { %4594 = vmatpush3.msra.mxu1 %v3173_v21  ;;  %4560 = vmatprep.subr.mxu0 %v3156_v23  ;;  %v3161_v21 = vld [vmem:[%s6189_s0 + $0x608] sm:$0xff] }
 0x200   :  { %4595 = vmatprep.subr.mxu1 %v3172_v24  ;;  %4561 = vmatpush3.msra.mxu0 %v3156_v23 }
 0x201   :  { %4596 = vmatpush3.msra.mxu1 %v3172_v24  ;;  %4562 = vmatprep.subr.mxu0 %v3155_v26  ;;  %v3144_v24 = vld [vmem:[%s6189_s0 + $0x280] sm:$0xff] }
 0x202   :  { %4597 = vmatprep.subr.mxu1 %v3171_v27  ;;  %4563 = vmatpush3.msra.mxu0 %v3155_v26 }
 0x203   :  { %4598 = vmatpush3.msra.mxu1 %v3171_v27  ;;  %4564 = vmatprep.subr.mxu0 %v3154_v30  ;;  %v3191_v27 = vld [vmem:[%s6189_s0 + $0x378] sm:$0xff] }
 0x204   :  { %4599 = vmatprep.subr.mxu1 %v3170_v31  ;;  %4565 = vmatpush3.msra.mxu0 %v3154_v30  ;;  %v2473_v30 = vld [vmem:[#allocation2 + $0x55] sm:$0xff] }
 0x205   :  { %4600 = vmatpush3.msra.mxu1 %v3170_v31  ;;  %4566 = vmatprep.subr.mxu0 %v3153_v33  ;;  %v2567_v31 = vld [vmem:[#allocation2 + $0x36] sm:$0xff] }
 0x206   :  { %4601 = vmatprep.subr.mxu1 %v3169_v34  ;;  %4567 = vmatpush3.msra.mxu0 %v3153_v33  ;;  %v3206_v33 = vld [vmem:[%s6189_s0 + $0x6f0] sm:$0xff] }
 0x207   :  { %4602 = vmatpush3.msra.mxu1 %v3169_v34  ;;  %4568 = vmatprep.subr.mxu0 %v3152_v38  ;;  %v2662_v34 = vld [vmem:[#allocation2 + $0x4e] sm:$0xff] }
 0x208   :  { %4603 = vmatprep.subr.mxu1 %v3168_v39  ;;  %4569 = vmatpush3.msra.mxu0 %v3152_v38  ;;  %v3204_v38 = vld [vmem:[%s6189_s0 + $0x6e0] sm:$0xff] }
 0x209   :  { %4604 = vmatpush3.msra.mxu1 %v3168_v39  ;;  %4570 = vmatprep.subr.mxu0 %v3151_v46  ;;  %v3187_v39 = vld [vmem:[%s6189_s0 + $0x358] sm:$0xff] }
 0x20a   :  { %4605 = vmatprep.subr.mxu1 %v3167_v47  ;;  %4571 = vmatpush3.msra.mxu0 %v3151_v46 }
 0x20b   :  { %4606 = vmatpush3.msra.mxu1 %v3167_v47  ;;  %4572 = vmatprep.subr.mxu0 %v3150_v53  ;;  %v3185_v47 = vld [vmem:[%s6189_s0 + $0x348] sm:$0xff] }
 0x20c   :  { %4607 = vmatprep.subr.mxu1 %v3166_v54  ;;  %4573 = vmatpush3.msra.mxu0 %v3150_v53  ;;  %v3182_v53 = vld [vmem:[%s6189_s0 + $0x330] sm:$0xff] }
 0x20d   :  { %4608 = vmatpush3.msra.mxu1 %v3166_v54  ;;  %4574 = vmatprep.subr.mxu0 %v3149_v60  ;;  %v4168_v6 = vpop.f32.mrf.mxu0  ;;  %v3198_v54 = vld [vmem:[%s6189_s0 + $0x6b0] sm:$0xff] }
 0x20e   :  { %4609 = vmatprep.subr.mxu1 %v3165_v61  ;;  %v4203_v7 = vpop.f32.mrf.mxu1  ;;  %4575 = vmatpush3.msra.mxu0 %v3149_v60  ;;  %v1319_v11 = vadd.f32 %v4168_v6, %v1127_v1  ;;  %v3195_v60 = vld [vmem:[%s6189_s0 + $0x698] sm:$0xff]  ;;  %v3177_v1 = vld [vmem:[%s6189_s0 + $0x308] sm:$0xff] }
 0x20f   :  { %4610 = vmatpush3.msra.mxu1 %v3165_v61  ;;  %v1415_v12 = vadd.f32 %v4203_v7, %v1223_v2  ;;  %4576 = vmatprep.subr.mxu0 %v3148_v3  ;;  %v1309_v13 = vpop.f32.mrf.mxu0  ;;  %v3193_v2 = vld [vmem:[%s6189_s0 + $0x688] sm:$0xff]  ;;  %v2663_v6 = vld [vmem:[#allocation2 + $0x56] sm:$0xff] }
 0x210   :  { %4611 = vmatprep.subr.mxu1 %v3164_v4  ;;  %v1405_v14 = vpop.f32.mrf.mxu1  ;;  %4577 = vmatpush3.msra.mxu0 %v3148_v3  ;;  %v1318_v18 = vadd.f32 %v1309_v13, %v1126_v5  ;;  %v3176_v3 = vld [vmem:[%s6189_s0 + $0x300] sm:$0xff] }
 0x211   :  { %4612 = vmatpush3.msra.mxu1 %v3164_v4  ;;  %v1417_v17 = vadd.f32 %v1415_v12, %v1319_v11  ;;  %v1414_v19 = vadd.f32 %v1405_v14, %v1222_v8  ;;  %4578 = vmatprep.subr.mxu0 %v3147_v9  ;;  %v3192_v4 = vld [vmem:[%s6189_s0 + $0x680] sm:$0xff]  ;;  %s4739_s0 = smov [#allocation3]  }
 0x212   :  { %4613 = vmatprep.subr.mxu1 %v3163_v10  ;;  %4579 = vmatpush3.msra.mxu0 %v3147_v9  ;;  %v2568_v5 = vld [vmem:[#allocation2 + $0x3e] sm:$0xff]  ;;  %s2779_s23 = sshll.u32 %s4739_s0, 4  ;;  %s2780_s23 = int_to_ptr.vmem [resolvable:$true] %s2779_s23 }
 0x213   :  { %4614 = vmatpush3.msra.mxu1 %v3163_v10  ;;  %v2999_v22 = vmul.f32 -1.442695, %v1417_v17  ;;  %v1416_v23 = vadd.f32 %v1414_v19, %v1318_v18  ;;  %4580 = vmatprep.subr.mxu0 %v3146_v15  ;;  %s4715_s24 = scalar_lea.vmem %s2780_s23, 512  ;;  %p4720_p1 = scmp.lt.s32.totalorder %s2780_s23, %s2780_s23 }
 0x214   :  { %4615 = vmatprep.subr.mxu1 %v3162_v16  ;;  %4581 = vmatpush3.msra.mxu0 %v3146_v15  ;;  %p4716_p0 = scmp.ne.s32.totalorder %s2780_s23, %s4715_s24  ;;  %p4721_p2 = scmp.lt.s32.totalorder %s4715_s24, %s4715_s24 }
 0x215   :  { %4616 = vmatpush3.msra.mxu1 %v3162_v16  ;;  %4699 = vpow2.f32 %v2999_v22  ;;  %v2998_v26 = vmul.f32 -1.442695, %v1416_v23  ;;  %4582 = vmatprep.subr.mxu0 %v3145_v20 }
 0x216   :  { %4617 = vmatprep.subr.mxu1 %v3161_v21  ;;  %4583 = vmatpush3.msra.mxu0 %v3145_v20  ;;  %p4722_p3 = por %p4721_p2, %p4720_p1 }
 0x217   :  { %4618 = vmatpush3.msra.mxu1 %v3161_v21  ;;  %4701 = vpow2.f32 %v2998_v26  ;;  %4584 = vmatprep.subr.mxu0 %v3144_v24 }
 0x218   :  { %4619 = vmatprep.subr.mxu1 %v3160_v25  ;;  %4585 = vmatpush3.msra.mxu0 %v3144_v24  ;;  %p4723_p4 = pnand %p4722_p3, %p4716_p0 }
 0x219   :  { %4620 = vmatpush3.msra.mxu1 %v3160_v25  ;;  %4587 = vmatmul.mubr.f32.vlgmr.msra.gmra.mxu0 %v2378_v29 }
 0x21a   :  { %4622 = vmatmul.mubr.f32.vlgmr.msra.gmra.mxu1 %v2473_v30  ;;  %4624 = vmatprep.subr.mxu0 %v3191_v27 }
 0x21b   :  { %4659 = vmatprep.subr.mxu1 %v3207_v28  ;;  %4625 = vmatpush3.msra.mxu0 %v3191_v27 }
 0x21c   :  { %4656 = vmatprep.mubr.f32.mxu0 %v2567_v31  ;;  %4660 = vmatpush3.msra.mxu1 %v3207_v28 }
 0x21d   :  { %4691 = vmatprep.mubr.f32.mxu1 %v2662_v34  ;;  %4626 = vmatprep.subr.mxu0 %v3190_v32 }
 0x21e   :  { %4661 = vmatprep.subr.mxu1 %v3206_v33  ;;  %4627 = vmatpush3.msra.mxu0 %v3190_v32 }
 0x21f   :  { %4662 = vmatpush3.msra.mxu1 %v3206_v33  ;;  %4628 = vmatprep.subr.mxu0 %v3189_v35 }
 0x220   :  { %4663 = vmatprep.subr.mxu1 %v3205_v36  ;;  %4629 = vmatpush3.msra.mxu0 %v3189_v35 }
 0x221   :  { %4664 = vmatpush3.msra.mxu1 %v3205_v36  ;;  %4630 = vmatprep.subr.mxu0 %v3188_v37 }
 0x222   :  { %v4700_v41 = vpop.eup %4699  ;;  %4665 = vmatprep.subr.mxu1 %v3204_v38  ;;  %4631 = vmatpush3.msra.mxu0 %v3188_v37 }
 0x223   :  { %v1425_v42 = vadd.f32 1.0, %v4700_v41  ;;  %4666 = vmatpush3.msra.mxu1 %v3204_v38  ;;  %4632 = vmatprep.subr.mxu0 %v3187_v39 }
 0x224   :  { %v4702_v45 = vpop.eup %4701  ;;  %4667 = vmatprep.subr.mxu1 %v3203_v40  ;;  %4633 = vmatpush3.msra.mxu0 %v3187_v39 }
 0x225   :  { %4703 = vrcp.f32 %v1425_v42  ;;  %v1424_v46 = vadd.f32 1.0, %v4702_v45  ;;  %4668 = vmatpush3.msra.mxu1 %v3203_v40  ;;  %4634 = vmatprep.subr.mxu0 %v3186_v43 }
 0x226   :  { %4669 = vmatprep.subr.mxu1 %v3202_v44  ;;  %4635 = vmatpush3.msra.mxu0 %v3186_v43 }
 0x227   :  { %4705 = vrcp.f32 %v1424_v46  ;;  %4670 = vmatpush3.msra.mxu1 %v3202_v44  ;;  %4636 = vmatprep.subr.mxu0 %v3185_v47 }
 0x228   :  { %4671 = vmatprep.subr.mxu1 %v3201_v48  ;;  %4637 = vmatpush3.msra.mxu0 %v3185_v47 }
 0x229   :  { %4672 = vmatpush3.msra.mxu1 %v3201_v48  ;;  %4638 = vmatprep.subr.mxu0 %v3184_v49 }
 0x22a   :  { %4673 = vmatprep.subr.mxu1 %v3200_v50  ;;  %4639 = vmatpush3.msra.mxu0 %v3184_v49 }
 0x22b   :  { %4674 = vmatpush3.msra.mxu1 %v3200_v50  ;;  %4640 = vmatprep.subr.mxu0 %v3183_v51 }
 0x22c   :  { %4675 = vmatprep.subr.mxu1 %v3199_v52  ;;  %4641 = vmatpush3.msra.mxu0 %v3183_v51 }
 0x22d   :  { %4676 = vmatpush3.msra.mxu1 %v3199_v52  ;;  %4642 = vmatprep.subr.mxu0 %v3182_v53 }
 0x22e   :  { %4677 = vmatprep.subr.mxu1 %v3198_v54  ;;  %4643 = vmatpush3.msra.mxu0 %v3182_v53 }
 0x22f   :  { %4678 = vmatpush3.msra.mxu1 %v3198_v54  ;;  %4644 = vmatprep.subr.mxu0 %v3181_v55  ;;  %v4238_v7 = vpop.f32.mrf.mxu0 }
 0x230   :  { %4679 = vmatprep.subr.mxu1 %v3197_v56  ;;  %4645 = vmatpush3.msra.mxu0 %v3181_v55  ;;  %v4273_v8 = vpop.f32.mrf.mxu1 }
 0x231   :  { %4680 = vmatpush3.msra.mxu1 %v3197_v56  ;;  %4646 = vmatprep.subr.mxu0 %v3180_v57  ;;  %v1555_v9 = vpop.f32.mrf.mxu0  ;;  %v1636_v25 = vadd.f32 %v4273_v8, %v4238_v7 }
 0x232   :  { %v4704_v61 = vpop.eup %4703  ;;  %4681 = vmatprep.subr.mxu1 %v3196_v58  ;;  %4647 = vmatpush3.msra.mxu0 %v3180_v57  ;;  %v1630_v10 = vpop.f32.mrf.mxu1 }
 0x233   :  { %4682 = vmatpush3.msra.mxu1 %v3196_v58  ;;  %1432 = vst.msk [vmem:[#allocation3 + $0x8] sm:$0xff] %vm1430_vm1, %v4704_v61  ;;  %4648 = vmatprep.subr.mxu0 %v3179_v59  ;;  %v1631_v29 = vadd.f32 %v1630_v10, %v1555_v9 }
 0x234   :  { %v4706_v0 = vpop.eup %4705  ;;  %4683 = vmatprep.subr.mxu1 %v3195_v60  ;;  %4649 = vmatpush3.msra.mxu0 %v3179_v59 }
 0x235   :  { %4684 = vmatpush3.msra.mxu1 %v3195_v60  ;;  %1431 = vst.msk [vmem:[#allocation3] sm:$0xff] %vm1430_vm1, %v4706_v0  ;;  %4650 = vmatprep.subr.mxu0 %v3178_v62 }
 0x236   :  { %4685 = vmatprep.subr.mxu1 %v3194_v63  ;;  %4651 = vmatpush3.msra.mxu0 %v3178_v62 }
 0x237   :  { %4686 = vmatpush3.msra.mxu1 %v3194_v63  ;;  %4652 = vmatprep.subr.mxu0 %v3177_v1 }
 0x238   :  { %4687 = vmatprep.subr.mxu1 %v3193_v2  ;;  %4653 = vmatpush3.msra.mxu0 %v3177_v1 }
 0x239   :  { %4688 = vmatpush3.msra.mxu1 %v3193_v2  ;;  %4654 = vmatprep.subr.mxu0 %v3176_v3 }
 0x23a   :  { %4689 = vmatprep.subr.mxu1 %v3192_v4  ;;  %4655 = vmatpush3.msra.mxu0 %v3176_v3 }
 0x23b   :  { %4690 = vmatpush3.msra.mxu1 %v3192_v4  ;;  %4657 = vmatmul.mubr.f32.vlgmr.msra.gmra.mxu0 %v2568_v5 }
 0x23c   :  { %4692 = vmatmul.mubr.f32.vlgmr.msra.gmra.mxu1 %v2663_v6 }
 0x251   :  { %v4308_v11 = vpop.f32.mrf.mxu0 }
 0x252   :  { %v4343_v12 = vpop.f32.mrf.mxu1 }
 0x253   :  { %v1723_v13 = vpop.f32.mrf.mxu0  ;;  %v1804_v26 = vadd.f32 %v4343_v12, %v4308_v11 }
 0x254   :  { %v1798_v14 = vpop.f32.mrf.mxu1 }
 0x255   :  { %v1799_v30 = vadd.f32 %v1798_v14, %v1723_v13 }
 0x273   :  { %v4378_v15 = vpop.f32.mrf.mxu0 }
 0x274   :  { %v4413_v16 = vpop.f32.mrf.mxu1  ;;  %v1901_v31 = vadd.f32 %v4378_v15, %v1636_v25 }
 0x275   :  { %v1891_v17 = vpop.f32.mrf.mxu0  ;;  %v1996_v32 = vadd.f32 %v4413_v16, %v1804_v26 }
 0x276   :  { %v1986_v18 = vpop.f32.mrf.mxu1  ;;  %v1900_v35 = vadd.f32 %v1891_v17, %v1631_v29 }
 0x277   :  { %v1995_v36 = vadd.f32 %v1986_v18, %v1799_v30 }
 0x295   :  { %v4448_v19 = vpop.f32.mrf.mxu0 }
 0x296   :  { %v4483_v20 = vpop.f32.mrf.mxu1  ;;  %v2091_v37 = vadd.f32 %v4448_v19, %v1901_v31 }
 0x297   :  { %v2081_v21 = vpop.f32.mrf.mxu0  ;;  %v2186_v38 = vadd.f32 %v4483_v20, %v1996_v32 }
 0x298   :  { %v2176_v22 = vpop.f32.mrf.mxu1  ;;  %v2090_v39 = vadd.f32 %v2081_v21, %v1900_v35 }
 0x299   :  { %v2185_v40 = vadd.f32 %v2176_v22, %v1995_v36 }
 0x2b7   :  { %v4518_v23 = vpop.f32.mrf.mxu0 }
 0x2b8   :  { %v4553_v24 = vpop.f32.mrf.mxu1  ;;  %v2281_v41 = vadd.f32 %v4518_v23, %v2091_v37 }
 0x2b9   :  { %v2271_v27 = vpop.f32.mrf.mxu0  ;;  %v2376_v42 = vadd.f32 %v4553_v24, %v2186_v38 }
 0x2ba   :  { %v2366_v28 = vpop.f32.mrf.mxu1  ;;  %v2280_v45 = vadd.f32 %v2271_v27, %v2090_v39 }
 0x2bb   :  { %v2375_v46 = vadd.f32 %v2366_v28, %v2185_v40 }
 0x2d9   :  { %v4588_v33 = vpop.f32.mrf.mxu0 }
 0x2da   :  { %v4623_v34 = vpop.f32.mrf.mxu1  ;;  %v2471_v47 = vadd.f32 %v4588_v33, %v2281_v41 }
 0x2db   :  { %v2461_v43 = vpop.f32.mrf.mxu0  ;;  %v2566_v48 = vadd.f32 %v4623_v34, %v2376_v42 }
 0x2dc   :  { %v2556_v44 = vpop.f32.mrf.mxu1  ;;  %v2470_v51 = vadd.f32 %v2461_v43, %v2280_v45 }
 0x2dd   :  { %v2565_v52 = vadd.f32 %v2556_v44, %v2375_v46 }
 0x2fb   :  { %v4658_v49 = vpop.f32.mrf.mxu0 }
 0x2fc   :  { %v4693_v50 = vpop.f32.mrf.mxu1  ;;  %v2661_v53 = vadd.f32 %v4658_v49, %v2471_v47 }
 0x2fd   :  { %v2756_v54 = vadd.f32 %v4693_v50, %v2566_v48  ;;  %v2651_v55 = vpop.f32.mrf.mxu0 }
 0x2fe   :  { %v2746_v56 = vpop.f32.mrf.mxu1  ;;  %v2660_v58 = vadd.f32 %v2651_v55, %v2470_v51 }
 0x2ff   :  { %v2758_v57 = vadd.f32 %v2756_v54, %v2661_v53  ;;  %v2755_v59 = vadd.f32 %v2746_v56, %v2565_v52 }
 0x301   :  { %v3209_v60 = vmul.f32 -1.442695, %v2758_v57  ;;  %v2757_v61 = vadd.f32 %v2755_v59, %v2660_v58 }
 0x303   :  { %4707 = vpow2.f32 %v3209_v60  ;;  %v3208_v62 = vmul.f32 -1.442695, %v2757_v61 }
 0x305   :  { %4709 = vpow2.f32 %v3208_v62 }
 0x310   :  { %v4708_v63 = vpop.eup %4707 }
 0x311   :  { %v2766_v0 = vadd.f32 1.0, %v4708_v63 }
 0x312   :  { %v4710_v1 = vpop.eup %4709 }
 0x313   :  { %4711 = vrcp.f32 %v2766_v0  ;;  %v2765_v2 = vadd.f32 1.0, %v4710_v1 }
 0x315   :  { %4713 = vrcp.f32 %v2765_v2 }
 0x320   :  { %v4712_v3 = vpop.eup %4711 }
 0x321   :  { %2773 = vst.msk [vmem:[#allocation3 + $0x18] sm:$0xff] %vm1430_vm1, %v4712_v3 }
 0x322   :  { %v4714_v4 = vpop.eup %4713 }
 0x323   :  { %2772 = vst.msk [vmem:[#allocation3 + $0x10] sm:$0xff] %vm1430_vm1, %v4714_v4 }
 0x324   :  { %4726 = shalt.err (!%p4723_p4)
}
 0x325   :  { %s4740_s25 = smov 128   ;;  %s4741_s26 = smov 8  }
 0x326   :  { %2785 = dma.vmem_to_hbm [thread:$0]  %s2780_s23, 512, %s6192_s3, [#allocation4], %s4740_s25, %s4740_s25, %s4741_s26  }
 0x327   :  { %4735 = dma.done.wait [#allocation4], 512  }
 0x328   :  { %4736 = vsyncadd [#allocation4], 4294966784 }
 0x329   :  { %2789 = vsyncpa [#allocation4], 1 }

</bundles_post_ra>
